<compile_context>
chip_gen: v5e
topology: v5e:2x2
jax: 0.10.0
libtpu: 0.0.40
codegen_flags: <defaults>
</compile_context>

<pallas_src>
import functools
import math

import jax
import jax.numpy as jnp
from jax.experimental import pallas as pl
from jax.experimental.pallas import tpu as pltpu

EPS = 1e-5          # torch.nn.LayerNorm default eps
NEG_INF = -1e9      # masked_fill value used by the reference transformer


# ----------------------------------------------------------------------------- in-kernel helpers

def _layer_norm(x, g, b):
    """f32 LayerNorm over the last dim (biased variance, like torch)."""
    mean = jnp.mean(x, axis=-1, keepdims=True)
    var = jnp.mean(jnp.square(x - mean), axis=-1, keepdims=True)
    return (x - mean) * jax.lax.rsqrt(var + EPS) * g + b


def _heads_project(x_bf, w, b):
    """(S, D) bf16 -> (G, S, Dh) f32 via a group/head-batched einsum.

    w is (G, D, Dh) bf16, b is (G, 1, Dh) f32.  The head axis is the leading (major)
    axis of the result, so downstream attention never slices along the lane dim.
    """
    G = w.shape[0]
    xg = jnp.broadcast_to(x_bf[None], (G,) + x_bf.shape)
    return jnp.einsum('gsd,gdk->gsk', xg, w, preferred_element_type=jnp.float32) + b


def _mha(qh, kh, vh, bias, wo, bo, scale):
    """Head-batched attention + output projection.

    qh (H, Sq, Dh) f32, kh/vh (H, Sk, Dh) f32, bias (Sq, Sk) additive f32 {0, -1e9},
    wo (H, Dh, D) bf16, bo (1, D) f32.  Returns (Sq, D) f32.

    Scores, softmax and PV are single head-batched ops; the output projection is one
    head-batched (Sq,Dh)@(Dh,D) einsum summed over heads, which equals concat(heads)@Wo
    without materializing the concat or slicing Wo's sublanes.
    """
    q = (qh * scale).astype(jnp.bfloat16)                       # fold 1/sqrt(Dh) into q
    s = jnp.einsum('hqd,hkd->hqk', q, kh.astype(jnp.bfloat16),
                   preferred_element_type=jnp.float32)
    s = s + bias[None]                                          # additive mask, one VALU add
    s = s - jnp.max(s, axis=-1, keepdims=True)
    p = jnp.exp(s)
    p = p * pl.reciprocal(jnp.sum(p, axis=-1, keepdims=True), approx=True)
    o = jnp.einsum('hqk,hkd->hqd', p.astype(jnp.bfloat16), vh.astype(jnp.bfloat16),
                   preferred_element_type=jnp.float32)
    out = jnp.einsum('hqd,hde->hqe', o.astype(jnp.bfloat16), wo,
                     preferred_element_type=jnp.float32)        # (H, Sq, D)
    return jnp.sum(out, axis=0) + bo                            # sum over heads == concat@Wo


def _ffn(x_bf, w1, b1, w2, b2):
    """relu(x@W1+b1)@W2+b2 with bf16 MXU inputs and f32 accumulation."""
    h = jnp.dot(x_bf, w1, preferred_element_type=jnp.float32) + b1
    h = jnp.maximum(h, 0.0)
    return jnp.dot(h.astype(jnp.bfloat16), w2, preferred_element_type=jnp.float32) + b2


# ----------------------------------------------------------------------------- fused kernel

def _transformer_kernel(
        src_ref, tgt_ref, enc_bias_ref, self_bias_ref, cross_bias_ref,
        # encoder stack weights (leading axis = layer)
        e_wqkv, e_bqkv, e_wo, e_bo, e_ln1g, e_ln1b,
        e_w1, e_b1, e_w2, e_b2, e_ln2g, e_ln2b,
        # decoder stack weights (leading axis = layer)
        d_wqkv, d_bqkv, d_wo1, d_bo1, d_ln1g, d_ln1b,
        d_wq, d_bq, d_wkv, d_bkv, d_wo2, d_bo2, d_ln2g, d_ln2b,
        d_w1, d_b1, d_w2, d_b2, d_ln3g, d_ln3b,
        fc_w,
        logits_ref,
        *, num_heads, num_layers):
    H = num_heads
    D = src_ref.shape[-1]
    scale = 1.0 / math.sqrt(D // H)

    enc_bias = enc_bias_ref[0]        # (Ss, Ss) additive
    self_bias = self_bias_ref[0]      # (St, St) additive
    cross_bias = cross_bias_ref[0]    # (St, Ss) additive

    # -------------------------------------------------- encoder stack (in-VMEM layer loop)
    enc = src_ref[0]                  # (Ss, D) f32
    for l in range(num_layers):
        x_bf = enc.astype(jnp.bfloat16)                              # cast once per layer
        qkv = _heads_project(x_bf, e_wqkv[l], e_bqkv[l])             # (3H, Ss, Dh)
        attn = _mha(qkv[:H], qkv[H:2 * H], qkv[2 * H:],
                    enc_bias, e_wo[l], e_bo[l], scale)
        h1 = _layer_norm(enc + attn, e_ln1g[l], e_ln1b[l])
        ff = _ffn(h1.astype(jnp.bfloat16), e_w1[l], e_b1[l], e_w2[l], e_b2[l])
        enc = _layer_norm(h1 + ff, e_ln2g[l], e_ln2b[l])

    # -------------------------------------------------- decoder stack + final projection
    enc_bf = enc.astype(jnp.bfloat16)
    enc_kv = jnp.broadcast_to(enc_bf[None], (2 * H,) + enc_bf.shape)  # hoisted: reused by all layers
    dec = tgt_ref[0]                  # (St, D) f32
    for l in range(num_layers):
        x_bf = dec.astype(jnp.bfloat16)
        qkv = _heads_project(x_bf, d_wqkv[l], d_bqkv[l])             # (3H, St, Dh)
        attn = _mha(qkv[:H], qkv[H:2 * H], qkv[2 * H:],
                    self_bias, d_wo1[l], d_bo1[l], scale)
        h1 = _layer_norm(dec + attn, d_ln1g[l], d_ln1b[l])

        q = _heads_project(h1.astype(jnp.bfloat16), d_wq[l], d_bq[l])        # (H, St, Dh)
        kv = jnp.einsum('gsd,gdk->gsk', enc_kv, d_wkv[l],
                        preferred_element_type=jnp.float32) + d_bkv[l]       # (2H, Ss, Dh)
        cross = _mha(q, kv[:H], kv[H:], cross_bias, d_wo2[l], d_bo2[l], scale)
        h2 = _layer_norm(h1 + cross, d_ln2g[l], d_ln2b[l])

        ff = _ffn(h2.astype(jnp.bfloat16), d_w1[l], d_b1[l], d_w2[l], d_b2[l])
        dec = _layer_norm(h2 + ff, d_ln3g[l], d_ln3b[l])

    # final Linear (bias-free); vocab padded to 128 -> lane-dense store
    logits_ref[0] = jnp.dot(dec.astype(jnp.bfloat16), fc_w[...],
                            preferred_element_type=jnp.float32)


# ----------------------------------------------------------------------------- specs / wrapper

def _wspec(arr):
    """Whole-array BlockSpec with a constant block index (fetched once across the grid)."""
    nd = arr.ndim
    return pl.BlockSpec(tuple(arr.shape), lambda b, _nd=nd: (0,) * _nd)


def _bspec(full_shape):
    """Per-batch-element BlockSpec: block (1, ...) indexed by the grid coordinate."""
    nd = len(full_shape)
    return pl.BlockSpec((1,) + tuple(full_shape[1:]),
                        lambda b, _nd=nd: (b,) + (0,) * (_nd - 1))


def transformer_forward(params, inpt, tgt, num_heads, tgt_vocab, pad_inpt=0, pad_tgt=0):
    B, Ss = inpt.shape
    St = tgt.shape[1]
    D = params["pe"].shape[1]
    Vp = params["fc_w"].shape[1]

    # embeddings + positional encoding (tiny gathers: plain JAX; dropout = identity in eval)
    src = params["enc_emb"][inpt] + params["pe"][None, :Ss]
    tgt_e = params["dec_emb"][tgt] + params["pe"][None, :St]

    # additive attention biases (0 = attend, -1e9 = masked), built once per forward pass
    inpt_valid = inpt != pad_inpt
    tgt_valid = tgt != pad_tgt
    src_b = jnp.where(inpt_valid, 0.0, NEG_INF).astype(jnp.float32)          # (B, Ss)
    enc_bias = jnp.broadcast_to(src_b[:, None, :], (B, Ss, Ss))
    cross_bias = jnp.broadcast_to(src_b[:, None, :], (B, St, Ss))
    causal = jnp.tril(jnp.ones((St, St), dtype=bool))
    # Reference Transformer.generate_mask semantics: target mask = QUERY validity & causal.
    self_ok = tgt_valid[:, :, None] & causal[None]
    self_bias = jnp.where(self_ok, 0.0, NEG_INF).astype(jnp.float32)

    ep, dp = params["enc"], params["dec"]
    weights = (ep["wqkv"], ep["bqkv"], ep["wo"], ep["bo"], ep["ln1_g"], ep["ln1_b"],
               ep["w1"], ep["b1"], ep["w2"], ep["b2"], ep["ln2_g"], ep["ln2_b"],
               dp["wqkv"], dp["bqkv"], dp["wo1"], dp["bo1"], dp["ln1_g"], dp["ln1_b"],
               dp["wq_c"], dp["bq_c"], dp["wkv_c"], dp["bkv_c"], dp["wo2"], dp["bo2"],
               dp["ln2_g"], dp["ln2_b"],
               dp["w1"], dp["b1"], dp["w2"], dp["b2"], dp["ln3_g"], dp["ln3_b"],
               params["fc_w"])
    num_layers = ep["wqkv"].shape[0]

    logits_pad = pl.pallas_call(
        functools.partial(_transformer_kernel, num_heads=num_heads, num_layers=num_layers),
        out_shape=jax.ShapeDtypeStruct((B, St, Vp), jnp.float32),
        grid=(B,),
        in_specs=[_bspec((B, Ss, D)), _bspec((B, St, D)), _bspec((B, Ss, Ss)),
                  _bspec((B, St, St)), _bspec((B, St, Ss))]
                 + [_wspec(w) for w in weights],
        out_specs=_bspec((B, St, Vp)),
        compiler_params=pltpu.CompilerParams(dimension_semantics=("parallel",)),
    )(src, tgt_e, enc_bias, self_bias, cross_bias, *weights)

    return logits_pad[:, :, :tgt_vocab]


# ----------------------------------------------------------------------------- params

def positional_encoding(max_len, d):
    pos = jnp.arange(max_len, dtype=jnp.float32)[:, None]
    div = jnp.exp(jnp.arange(0, d, 2, dtype=jnp.float32) * (-math.log(10000.0) / d))
    pe = jnp.zeros((max_len, d), dtype=jnp.float32)
    pe = pe.at[:, 0::2].set(jnp.sin(pos * div))
    pe = pe.at[:, 1::2].set(jnp.cos(pos * div))
    return pe


def init_params(key, inpt_vocab, tgt_vocab, d, heads, layers, ff_dim, max_len):
    H, L = heads, layers
    dh = d // heads
    keys = iter(jax.random.split(key, 16))

    def nrm(shape, scale=0.02):
        return (scale * jax.random.normal(next(keys), shape)).astype(jnp.float32)

    def bf(x):
        return x.astype(jnp.bfloat16)        # weights cast once (bf16 MXU inputs)

    def zeros(*s):
        return jnp.zeros(s, jnp.float32)

    def ones(*s):
        return jnp.ones(s, jnp.float32)

    enc = {
        "wqkv": bf(nrm((L, 3 * H, d, dh))), "bqkv": zeros(L, 3 * H, 1, dh),
        "wo": bf(nrm((L, H, dh, d))), "bo": zeros(L, 1, d),
        "ln1_g": ones(L, 1, d), "ln1_b": zeros(L, 1, d),
        "w1": bf(nrm((L, d, ff_dim))), "b1": zeros(L, 1, ff_dim),
        "w2": bf(nrm((L, ff_dim, d))), "b2": zeros(L, 1, d),
        "ln2_g": ones(L, 1, d), "ln2_b": zeros(L, 1, d),
    }
    dec = {
        "wqkv": bf(nrm((L, 3 * H, d, dh))), "bqkv": zeros(L, 3 * H, 1, dh),
        "wo1": bf(nrm((L, H, dh, d))), "bo1": zeros(L, 1, d),
        "ln1_g": ones(L, 1, d), "ln1_b": zeros(L, 1, d),
        "wq_c": bf(nrm((L, H, d, dh))), "bq_c": zeros(L, H, 1, dh),
        "wkv_c": bf(nrm((L, 2 * H, d, dh))), "bkv_c": zeros(L, 2 * H, 1, dh),
        "wo2": bf(nrm((L, H, dh, d))), "bo2": zeros(L, 1, d),
        "ln2_g": ones(L, 1, d), "ln2_b": zeros(L, 1, d),
        "w1": bf(nrm((L, d, ff_dim))), "b1": zeros(L, 1, ff_dim),
        "w2": bf(nrm((L, ff_dim, d))), "b2": zeros(L, 1, d),
        "ln3_g": ones(L, 1, d), "ln3_b": zeros(L, 1, d),
    }
    # final projection weight, zero-padded to a lane-dense (128-multiple) vocab
    v_pad = ((tgt_vocab + 127) // 128) * 128
    fc = nrm((d, tgt_vocab))
    fc_pad = jnp.zeros((d, v_pad), jnp.float32).at[:, :tgt_vocab].set(fc)

    return {
        "enc_emb": nrm((inpt_vocab, d), 1.0),
        "dec_emb": nrm((tgt_vocab, d), 1.0),
        "pe": positional_encoding(max_len, d),
        "enc": enc, "dec": dec, "fc_w": bf(fc_pad),
    }


# ----------------------------------------------------------------------------- main

if __name__ == "__main__":
    # small config consistent with the module's __init__
    INPT_VOCAB = 50
    TGT_VOCAB = 60
    EMB_DIM = 32
    HEADS = 4
    LAYERS = 2
    FF_DIM = 64
    MAX_LEN = 16
    B, S_SRC, S_TGT = 2, 8, 8

    key = jax.random.PRNGKey(0)
    kp, ki, kt = jax.random.split(key, 3)

    params = init_params(kp, INPT_VOCAB, TGT_VOCAB, EMB_DIM, HEADS, LAYERS, FF_DIM, MAX_LEN)

    # token ids in [1, vocab) so pad_token (=0) does not appear
    inpt = jax.random.randint(ki, (B, S_SRC), 1, INPT_VOCAB, dtype=jnp.int32)
    tgt = jax.random.randint(kt, (B, S_TGT), 1, TGT_VOCAB, dtype=jnp.int32)

    fwd = jax.jit(lambda p, a, b: transformer_forward(p, a, b, HEADS, TGT_VOCAB))
    logits = fwd(params, inpt, tgt)
    jax.block_until_ready(logits)

    assert logits.shape == (B, S_TGT, TGT_VOCAB)
    assert bool(jnp.all(jnp.isfinite(logits)))
    print("KERNEL_OK")
</pallas_src>

<mosaic_0001>
module attributes {stable_mosaic.version = 11 : i64} {
  func.func @_transformer_kernel(%arg0: i32, %arg1: memref<1x8x32xf32, #tpu.memory_space<vmem>>, %arg2: memref<1x8x32xf32, #tpu.memory_space<vmem>>, %arg3: memref<1x8x8xf32, #tpu.memory_space<vmem>>, %arg4: memref<1x8x8xf32, #tpu.memory_space<vmem>>, %arg5: memref<1x8x8xf32, #tpu.memory_space<vmem>>, %arg6: memref<2x12x32x8xbf16, #tpu.memory_space<vmem>>, %arg7: memref<2x12x1x8xf32, #tpu.memory_space<vmem>>, %arg8: memref<2x4x8x32xbf16, #tpu.memory_space<vmem>>, %arg9: memref<2x1x32xf32, #tpu.memory_space<vmem>>, %arg10: memref<2x1x32xf32, #tpu.memory_space<vmem>>, %arg11: memref<2x1x32xf32, #tpu.memory_space<vmem>>, %arg12: memref<2x32x64xbf16, #tpu.memory_space<vmem>>, %arg13: memref<2x1x64xf32, #tpu.memory_space<vmem>>, %arg14: memref<2x64x32xbf16, #tpu.memory_space<vmem>>, %arg15: memref<2x1x32xf32, #tpu.memory_space<vmem>>, %arg16: memref<2x1x32xf32, #tpu.memory_space<vmem>>, %arg17: memref<2x1x32xf32, #tpu.memory_space<vmem>>, %arg18: memref<2x12x32x8xbf16, #tpu.memory_space<vmem>>, %arg19: memref<2x12x1x8xf32, #tpu.memory_space<vmem>>, %arg20: memref<2x4x8x32xbf16, #tpu.memory_space<vmem>>, %arg21: memref<2x1x32xf32, #tpu.memory_space<vmem>>, %arg22: memref<2x1x32xf32, #tpu.memory_space<vmem>>, %arg23: memref<2x1x32xf32, #tpu.memory_space<vmem>>, %arg24: memref<2x4x32x8xbf16, #tpu.memory_space<vmem>>, %arg25: memref<2x4x1x8xf32, #tpu.memory_space<vmem>>, %arg26: memref<2x8x32x8xbf16, #tpu.memory_space<vmem>>, %arg27: memref<2x8x1x8xf32, #tpu.memory_space<vmem>>, %arg28: memref<2x4x8x32xbf16, #tpu.memory_space<vmem>>, %arg29: memref<2x1x32xf32, #tpu.memory_space<vmem>>, %arg30: memref<2x1x32xf32, #tpu.memory_space<vmem>>, %arg31: memref<2x1x32xf32, #tpu.memory_space<vmem>>, %arg32: memref<2x32x64xbf16, #tpu.memory_space<vmem>>, %arg33: memref<2x1x64xf32, #tpu.memory_space<vmem>>, %arg34: memref<2x64x32xbf16, #tpu.memory_space<vmem>>, %arg35: memref<2x1x32xf32, #tpu.memory_space<vmem>>, %arg36: memref<2x1x32xf32, #tpu.memory_space<vmem>>, %arg37: memref<2x1x32xf32, #tpu.memory_space<vmem>>, %arg38: memref<32x128xbf16, #tpu.memory_space<vmem>>, %arg39: memref<1x8x128xf32, #tpu.memory_space<vmem>>) attributes {dimension_semantics = [#tpu.dimension_semantics<parallel>], iteration_bounds = array<i64: 2>, scalar_prefetch = 0 : i64, scratch_operands = 0 : i64, tpu.core_type = #tpu.core_type<tc>, window_params = [{transform_indices = @transform_0, window_bounds = array<i64: 1, 8, 32>}, {transform_indices = @transform_1, window_bounds = array<i64: 1, 8, 32>}, {transform_indices = @transform_2, window_bounds = array<i64: 1, 8, 8>}, {transform_indices = @transform_3, window_bounds = array<i64: 1, 8, 8>}, {transform_indices = @transform_4, window_bounds = array<i64: 1, 8, 8>}, {pipeline_mode = #tpu.pipeline_mode<synchronous>, transform_indices = @transform_5, window_bounds = array<i64: 2, 12, 32, 8>}, {pipeline_mode = #tpu.pipeline_mode<synchronous>, transform_indices = @transform_6, window_bounds = array<i64: 2, 12, 1, 8>}, {pipeline_mode = #tpu.pipeline_mode<synchronous>, transform_indices = @transform_7, window_bounds = array<i64: 2, 4, 8, 32>}, {pipeline_mode = #tpu.pipeline_mode<synchronous>, transform_indices = @transform_8, window_bounds = array<i64: 2, 1, 32>}, {pipeline_mode = #tpu.pipeline_mode<synchronous>, transform_indices = @transform_9, window_bounds = array<i64: 2, 1, 32>}, {pipeline_mode = #tpu.pipeline_mode<synchronous>, transform_indices = @transform_10, window_bounds = array<i64: 2, 1, 32>}, {pipeline_mode = #tpu.pipeline_mode<synchronous>, transform_indices = @transform_11, window_bounds = array<i64: 2, 32, 64>}, {pipeline_mode = #tpu.pipeline_mode<synchronous>, transform_indices = @transform_12, window_bounds = array<i64: 2, 1, 64>}, {pipeline_mode = #tpu.pipeline_mode<synchronous>, transform_indices = @transform_13, window_bounds = array<i64: 2, 64, 32>}, {pipeline_mode = #tpu.pipeline_mode<synchronous>, transform_indices = @transform_14, window_bounds = array<i64: 2, 1, 32>}, {pipeline_mode = #tpu.pipeline_mode<synchronous>, transform_indices = @transform_15, window_bounds = array<i64: 2, 1, 32>}, {pipeline_mode = #tpu.pipeline_mode<synchronous>, transform_indices = @transform_16, window_bounds = array<i64: 2, 1, 32>}, {pipeline_mode = #tpu.pipeline_mode<synchronous>, transform_indices = @transform_17, window_bounds = array<i64: 2, 12, 32, 8>}, {pipeline_mode = #tpu.pipeline_mode<synchronous>, transform_indices = @transform_18, window_bounds = array<i64: 2, 12, 1, 8>}, {pipeline_mode = #tpu.pipeline_mode<synchronous>, transform_indices = @transform_19, window_bounds = array<i64: 2, 4, 8, 32>}, {pipeline_mode = #tpu.pipeline_mode<synchronous>, transform_indices = @transform_20, window_bounds = array<i64: 2, 1, 32>}, {pipeline_mode = #tpu.pipeline_mode<synchronous>, transform_indices = @transform_21, window_bounds = array<i64: 2, 1, 32>}, {pipeline_mode = #tpu.pipeline_mode<synchronous>, transform_indices = @transform_22, window_bounds = array<i64: 2, 1, 32>}, {pipeline_mode = #tpu.pipeline_mode<synchronous>, transform_indices = @transform_23, window_bounds = array<i64: 2, 4, 32, 8>}, {pipeline_mode = #tpu.pipeline_mode<synchronous>, transform_indices = @transform_24, window_bounds = array<i64: 2, 4, 1, 8>}, {pipeline_mode = #tpu.pipeline_mode<synchronous>, transform_indices = @transform_25, window_bounds = array<i64: 2, 8, 32, 8>}, {pipeline_mode = #tpu.pipeline_mode<synchronous>, transform_indices = @transform_26, window_bounds = array<i64: 2, 8, 1, 8>}, {pipeline_mode = #tpu.pipeline_mode<synchronous>, transform_indices = @transform_27, window_bounds = array<i64: 2, 4, 8, 32>}, {pipeline_mode = #tpu.pipeline_mode<synchronous>, transform_indices = @transform_28, window_bounds = array<i64: 2, 1, 32>}, {pipeline_mode = #tpu.pipeline_mode<synchronous>, transform_indices = @transform_29, window_bounds = array<i64: 2, 1, 32>}, {pipeline_mode = #tpu.pipeline_mode<synchronous>, transform_indices = @transform_30, window_bounds = array<i64: 2, 1, 32>}, {pipeline_mode = #tpu.pipeline_mode<synchronous>, transform_indices = @transform_31, window_bounds = array<i64: 2, 32, 64>}, {pipeline_mode = #tpu.pipeline_mode<synchronous>, transform_indices = @transform_32, window_bounds = array<i64: 2, 1, 64>}, {pipeline_mode = #tpu.pipeline_mode<synchronous>, transform_indices = @transform_33, window_bounds = array<i64: 2, 64, 32>}, {pipeline_mode = #tpu.pipeline_mode<synchronous>, transform_indices = @transform_34, window_bounds = array<i64: 2, 1, 32>}, {pipeline_mode = #tpu.pipeline_mode<synchronous>, transform_indices = @transform_35, window_bounds = array<i64: 2, 1, 32>}, {pipeline_mode = #tpu.pipeline_mode<synchronous>, transform_indices = @transform_36, window_bounds = array<i64: 2, 1, 32>}, {pipeline_mode = #tpu.pipeline_mode<synchronous>, transform_indices = @transform_37, window_bounds = array<i64: 32, 128>}, {transform_indices = @transform_38, window_bounds = array<i64: 1, 8, 128>}]} {
    %c0 = arith.constant 0 : index
    %c0_0 = arith.constant 0 : index
    %c0_1 = arith.constant 0 : index
    %0 = vector.load %arg3[%c0, %c0_0, %c0_1] : memref<1x8x8xf32, #tpu.memory_space<vmem>>, vector<1x8x8xf32>
    %1 = vector.shape_cast %0 : vector<1x8x8xf32> to vector<8x8xf32>
    %c0_2 = arith.constant 0 : index
    %c0_3 = arith.constant 0 : index
    %c0_4 = arith.constant 0 : index
    %2 = vector.load %arg4[%c0_2, %c0_3, %c0_4] : memref<1x8x8xf32, #tpu.memory_space<vmem>>, vector<1x8x8xf32>
    %3 = vector.shape_cast %2 : vector<1x8x8xf32> to vector<8x8xf32>
    %c0_5 = arith.constant 0 : index
    %c0_6 = arith.constant 0 : index
    %c0_7 = arith.constant 0 : index
    %4 = vector.load %arg5[%c0_5, %c0_6, %c0_7] : memref<1x8x8xf32, #tpu.memory_space<vmem>>, vector<1x8x8xf32>
    %5 = vector.shape_cast %4 : vector<1x8x8xf32> to vector<8x8xf32>
    %c0_8 = arith.constant 0 : index
    %c0_9 = arith.constant 0 : index
    %c0_10 = arith.constant 0 : index
    %6 = vector.load %arg1[%c0_8, %c0_9, %c0_10] : memref<1x8x32xf32, #tpu.memory_space<vmem>>, vector<1x8x32xf32>
    %7 = vector.shape_cast %6 : vector<1x8x32xf32> to vector<8x32xf32>
    %8 = arith.truncf %7 : vector<8x32xf32> to vector<8x32xbf16>
    %c0_11 = arith.constant 0 : index
    %c0_12 = arith.constant 0 : index
    %c0_13 = arith.constant 0 : index
    %c0_14 = arith.constant 0 : index
    %9 = vector.load %arg6[%c0_11, %c0_12, %c0_13, %c0_14] : memref<2x12x32x8xbf16, #tpu.memory_space<vmem>>, vector<1x12x32x8xbf16>
    %10 = vector.shape_cast %9 : vector<1x12x32x8xbf16> to vector<12x32x8xbf16>
    %c0_15 = arith.constant 0 : index
    %c0_16 = arith.constant 0 : index
    %c0_17 = arith.constant 0 : index
    %c0_18 = arith.constant 0 : index
    %11 = vector.load %arg7[%c0_15, %c0_16, %c0_17, %c0_18] : memref<2x12x1x8xf32, #tpu.memory_space<vmem>>, vector<1x12x1x8xf32>
    %12 = vector.shape_cast %11 : vector<1x12x1x8xf32> to vector<12x1x8xf32>
    %13 = vector.shape_cast %8 : vector<8x32xbf16> to vector<1x8x32xbf16>
    %14 = vector.shape_cast %13 : vector<1x8x32xbf16> to vector<1x8x32xbf16>
    %15 = vector.broadcast %14 : vector<1x8x32xbf16> to vector<12x8x32xbf16>
    "tpu.trace_start"() <{level = 10 : i32, message = "gsd,gdk->gsk"}> : () -> ()
    %cst = arith.constant dense<0.000000e+00> : vector<12x8x8xf32>
    %16 = tpu.matmul %15, %10, %cst {dimension_numbers = #tpu.dot_dimension_numbers<[2], [1], [1], [2], [0, 0, 0, 1, 1, 2], [0], [0]>} : vector<12x8x32xbf16>, vector<12x32x8xbf16>, vector<12x8x8xf32> -> vector<12x8x8xf32>
    "tpu.trace_stop"() : () -> ()
    %17 = vector.broadcast %12 : vector<12x1x8xf32> to vector<12x8x8xf32>
    %18 = arith.addf %16, %17 : vector<12x8x8xf32>
    %19 = vector.extract_strided_slice %18 {offsets = [0, 0, 0], sizes = [4, 8, 8], strides = [1, 1, 1]} : vector<12x8x8xf32> to vector<4x8x8xf32>
    %20 = vector.extract_strided_slice %18 {offsets = [4, 0, 0], sizes = [4, 8, 8], strides = [1, 1, 1]} : vector<12x8x8xf32> to vector<4x8x8xf32>
    %21 = vector.extract_strided_slice %18 {offsets = [8, 0, 0], sizes = [4, 8, 8], strides = [1, 1, 1]} : vector<12x8x8xf32> to vector<4x8x8xf32>
    %c0_19 = arith.constant 0 : index
    %c0_20 = arith.constant 0 : index
    %c0_21 = arith.constant 0 : index
    %c0_22 = arith.constant 0 : index
    %22 = vector.load %arg8[%c0_19, %c0_20, %c0_21, %c0_22] : memref<2x4x8x32xbf16, #tpu.memory_space<vmem>>, vector<1x4x8x32xbf16>
    %23 = vector.shape_cast %22 : vector<1x4x8x32xbf16> to vector<4x8x32xbf16>
    %c0_23 = arith.constant 0 : index
    %c0_24 = arith.constant 0 : index
    %c0_25 = arith.constant 0 : index
    %24 = vector.load %arg9[%c0_23, %c0_24, %c0_25] : memref<2x1x32xf32, #tpu.memory_space<vmem>>, vector<1x1x32xf32>
    %25 = vector.shape_cast %24 : vector<1x1x32xf32> to vector<1x32xf32>
    %cst_26 = arith.constant 0.353553385 : f32
    %26 = vector.broadcast %cst_26 : f32 to vector<4x8x8xf32>
    %27 = arith.mulf %19, %26 : vector<4x8x8xf32>
    %28 = arith.truncf %27 : vector<4x8x8xf32> to vector<4x8x8xbf16>
    %29 = arith.truncf %20 : vector<4x8x8xf32> to vector<4x8x8xbf16>
    "tpu.trace_start"() <{level = 10 : i32, message = "hqd,hkd->hqk"}> : () -> ()
    %cst_27 = arith.constant dense<0.000000e+00> : vector<4x8x8xf32>
    %30 = tpu.matmul %28, %29, %cst_27 {dimension_numbers = #tpu.dot_dimension_numbers<[2], [2], [1], [1], [0, 0, 0, 1, 1, 1], [0], [0]>} : vector<4x8x8xbf16>, vector<4x8x8xbf16>, vector<4x8x8xf32> -> vector<4x8x8xf32>
    "tpu.trace_stop"() : () -> ()
    %31 = vector.shape_cast %1 : vector<8x8xf32> to vector<1x8x8xf32>
    %32 = vector.broadcast %31 : vector<1x8x8xf32> to vector<4x8x8xf32>
    %33 = arith.addf %30, %32 : vector<4x8x8xf32>
    %cst_28 = arith.constant dense<0xFF800000> : vector<4x8xf32>
    %34 = vector.multi_reduction <maximumf>, %33, %cst_28 [2] : vector<4x8x8xf32> to vector<4x8xf32>
    %35 = vector.shape_cast %34 : vector<4x8xf32> to vector<4x8x1xf32>
    %36 = vector.broadcast %35 : vector<4x8x1xf32> to vector<4x8x8xf32>
    %37 = arith.subf %33, %36 : vector<4x8x8xf32>
    %38 = math.exp %37 : vector<4x8x8xf32>
    %cst_29 = arith.constant dense<0.000000e+00> : vector<4x8xf32>
    %39 = vector.multi_reduction <add>, %38, %cst_29 [2] : vector<4x8x8xf32> to vector<4x8xf32>
    %40 = vector.shape_cast %39 : vector<4x8xf32> to vector<4x8x1xf32>
    %41 = tpu.reciprocal %40 {approx = true} : vector<4x8x1xf32> -> vector<4x8x1xf32>
    %42 = vector.broadcast %41 : vector<4x8x1xf32> to vector<4x8x8xf32>
    %43 = arith.mulf %38, %42 : vector<4x8x8xf32>
    %44 = arith.truncf %43 : vector<4x8x8xf32> to vector<4x8x8xbf16>
    %45 = arith.truncf %21 : vector<4x8x8xf32> to vector<4x8x8xbf16>
    "tpu.trace_start"() <{level = 10 : i32, message = "hqk,hkd->hqd"}> : () -> ()
    %cst_30 = arith.constant dense<0.000000e+00> : vector<4x8x8xf32>
    %46 = tpu.matmul %44, %45, %cst_30 {dimension_numbers = #tpu.dot_dimension_numbers<[2], [1], [1], [2], [0, 0, 0, 1, 1, 2], [0], [0]>} : vector<4x8x8xbf16>, vector<4x8x8xbf16>, vector<4x8x8xf32> -> vector<4x8x8xf32>
    "tpu.trace_stop"() : () -> ()
    %47 = arith.truncf %46 : vector<4x8x8xf32> to vector<4x8x8xbf16>
    "tpu.trace_start"() <{level = 10 : i32, message = "hqd,hde->hqe"}> : () -> ()
    %cst_31 = arith.constant dense<0.000000e+00> : vector<4x8x32xf32>
    %48 = tpu.matmul %47, %23, %cst_31 {dimension_numbers = #tpu.dot_dimension_numbers<[2], [1], [1], [2], [0, 0, 0, 1, 1, 2], [0], [0]>} : vector<4x8x8xbf16>, vector<4x8x32xbf16>, vector<4x8x32xf32> -> vector<4x8x32xf32>
    "tpu.trace_stop"() : () -> ()
    %cst_32 = arith.constant dense<0.000000e+00> : vector<8x32xf32>
    %49 = vector.multi_reduction <add>, %48, %cst_32 [0] : vector<4x8x32xf32> to vector<8x32xf32>
    %50 = vector.broadcast %25 : vector<1x32xf32> to vector<8x32xf32>
    %51 = arith.addf %49, %50 : vector<8x32xf32>
    %52 = arith.addf %7, %51 : vector<8x32xf32>
    %c0_33 = arith.constant 0 : index
    %c0_34 = arith.constant 0 : index
    %c0_35 = arith.constant 0 : index
    %53 = vector.load %arg10[%c0_33, %c0_34, %c0_35] : memref<2x1x32xf32, #tpu.memory_space<vmem>>, vector<1x1x32xf32>
    %54 = vector.shape_cast %53 : vector<1x1x32xf32> to vector<1x32xf32>
    %c0_36 = arith.constant 0 : index
    %c0_37 = arith.constant 0 : index
    %c0_38 = arith.constant 0 : index
    %55 = vector.load %arg11[%c0_36, %c0_37, %c0_38] : memref<2x1x32xf32, #tpu.memory_space<vmem>>, vector<1x1x32xf32>
    %56 = vector.shape_cast %55 : vector<1x1x32xf32> to vector<1x32xf32>
    %cst_39 = arith.constant dense<0.000000e+00> : vector<8xf32>
    %57 = vector.multi_reduction <add>, %52, %cst_39 [1] : vector<8x32xf32> to vector<8xf32>
    %58 = vector.shape_cast %57 : vector<8xf32> to vector<8x1xf32>
    %cst_40 = arith.constant 3.200000e+01 : f32
    %59 = vector.broadcast %cst_40 : f32 to vector<8x1xf32>
    %60 = arith.divf %58, %59 : vector<8x1xf32>
    %61 = vector.broadcast %60 : vector<8x1xf32> to vector<8x32xf32>
    %62 = arith.subf %52, %61 : vector<8x32xf32>
    %63 = arith.mulf %62, %62 : vector<8x32xf32>
    %cst_41 = arith.constant dense<0.000000e+00> : vector<8xf32>
    %64 = vector.multi_reduction <add>, %63, %cst_41 [1] : vector<8x32xf32> to vector<8xf32>
    %65 = vector.shape_cast %64 : vector<8xf32> to vector<8x1xf32>
    %cst_42 = arith.constant 3.200000e+01 : f32
    %66 = vector.broadcast %cst_42 : f32 to vector<8x1xf32>
    %67 = arith.divf %65, %66 : vector<8x1xf32>
    %68 = vector.broadcast %60 : vector<8x1xf32> to vector<8x32xf32>
    %69 = arith.subf %52, %68 : vector<8x32xf32>
    %cst_43 = arith.constant 9.99999974E-6 : f32
    %70 = vector.broadcast %cst_43 : f32 to vector<8x1xf32>
    %71 = arith.addf %67, %70 : vector<8x1xf32>
    %72 = math.rsqrt %71 : vector<8x1xf32>
    %73 = vector.broadcast %72 : vector<8x1xf32> to vector<8x32xf32>
    %74 = arith.mulf %69, %73 : vector<8x32xf32>
    %75 = vector.broadcast %54 : vector<1x32xf32> to vector<8x32xf32>
    %76 = arith.mulf %74, %75 : vector<8x32xf32>
    %77 = vector.broadcast %56 : vector<1x32xf32> to vector<8x32xf32>
    %78 = arith.addf %76, %77 : vector<8x32xf32>
    %79 = arith.truncf %78 : vector<8x32xf32> to vector<8x32xbf16>
    %c0_44 = arith.constant 0 : index
    %c0_45 = arith.constant 0 : index
    %c0_46 = arith.constant 0 : index
    %80 = vector.load %arg12[%c0_44, %c0_45, %c0_46] : memref<2x32x64xbf16, #tpu.memory_space<vmem>>, vector<1x32x64xbf16>
    %81 = vector.shape_cast %80 : vector<1x32x64xbf16> to vector<32x64xbf16>
    %c0_47 = arith.constant 0 : index
    %c0_48 = arith.constant 0 : index
    %c0_49 = arith.constant 0 : index
    %82 = vector.load %arg13[%c0_47, %c0_48, %c0_49] : memref<2x1x64xf32, #tpu.memory_space<vmem>>, vector<1x1x64xf32>
    %83 = vector.shape_cast %82 : vector<1x1x64xf32> to vector<1x64xf32>
    %c0_50 = arith.constant 0 : index
    %c0_51 = arith.constant 0 : index
    %c0_52 = arith.constant 0 : index
    %84 = vector.load %arg14[%c0_50, %c0_51, %c0_52] : memref<2x64x32xbf16, #tpu.memory_space<vmem>>, vector<1x64x32xbf16>
    %85 = vector.shape_cast %84 : vector<1x64x32xbf16> to vector<64x32xbf16>
    %c0_53 = arith.constant 0 : index
    %c0_54 = arith.constant 0 : index
    %c0_55 = arith.constant 0 : index
    %86 = vector.load %arg15[%c0_53, %c0_54, %c0_55] : memref<2x1x32xf32, #tpu.memory_space<vmem>>, vector<1x1x32xf32>
    %87 = vector.shape_cast %86 : vector<1x1x32xf32> to vector<1x32xf32>
    %cst_56 = arith.constant dense<0.000000e+00> : vector<8x64xf32>
    %88 = tpu.matmul %79, %81, %cst_56 {dimension_numbers = #tpu.dot_dimension_numbers<[1], [0], [0], [1], [0, 0, 1, 1], [], []>} : vector<8x32xbf16>, vector<32x64xbf16>, vector<8x64xf32> -> vector<8x64xf32>
    %89 = vector.broadcast %83 : vector<1x64xf32> to vector<8x64xf32>
    %90 = arith.addf %88, %89 : vector<8x64xf32>
    %cst_57 = arith.constant 0.000000e+00 : f32
    %91 = vector.broadcast %cst_57 : f32 to vector<8x64xf32>
    %92 = arith.maximumf %90, %91 : vector<8x64xf32>
    %93 = arith.truncf %92 : vector<8x64xf32> to vector<8x64xbf16>
    %cst_58 = arith.constant dense<0.000000e+00> : vector<8x32xf32>
    %94 = tpu.matmul %93, %85, %cst_58 {dimension_numbers = #tpu.dot_dimension_numbers<[1], [0], [0], [1], [0, 0, 1, 1], [], []>} : vector<8x64xbf16>, vector<64x32xbf16>, vector<8x32xf32> -> vector<8x32xf32>
    %95 = vector.broadcast %87 : vector<1x32xf32> to vector<8x32xf32>
    %96 = arith.addf %94, %95 : vector<8x32xf32>
    %97 = arith.addf %78, %96 : vector<8x32xf32>
    %c0_59 = arith.constant 0 : index
    %c0_60 = arith.constant 0 : index
    %c0_61 = arith.constant 0 : index
    %98 = vector.load %arg16[%c0_59, %c0_60, %c0_61] : memref<2x1x32xf32, #tpu.memory_space<vmem>>, vector<1x1x32xf32>
    %99 = vector.shape_cast %98 : vector<1x1x32xf32> to vector<1x32xf32>
    %c0_62 = arith.constant 0 : index
    %c0_63 = arith.constant 0 : index
    %c0_64 = arith.constant 0 : index
    %100 = vector.load %arg17[%c0_62, %c0_63, %c0_64] : memref<2x1x32xf32, #tpu.memory_space<vmem>>, vector<1x1x32xf32>
    %101 = vector.shape_cast %100 : vector<1x1x32xf32> to vector<1x32xf32>
    %cst_65 = arith.constant dense<0.000000e+00> : vector<8xf32>
    %102 = vector.multi_reduction <add>, %97, %cst_65 [1] : vector<8x32xf32> to vector<8xf32>
    %103 = vector.shape_cast %102 : vector<8xf32> to vector<8x1xf32>
    %cst_66 = arith.constant 3.200000e+01 : f32
    %104 = vector.broadcast %cst_66 : f32 to vector<8x1xf32>
    %105 = arith.divf %103, %104 : vector<8x1xf32>
    %106 = vector.broadcast %105 : vector<8x1xf32> to vector<8x32xf32>
    %107 = arith.subf %97, %106 : vector<8x32xf32>
    %108 = arith.mulf %107, %107 : vector<8x32xf32>
    %cst_67 = arith.constant dense<0.000000e+00> : vector<8xf32>
    %109 = vector.multi_reduction <add>, %108, %cst_67 [1] : vector<8x32xf32> to vector<8xf32>
    %110 = vector.shape_cast %109 : vector<8xf32> to vector<8x1xf32>
    %cst_68 = arith.constant 3.200000e+01 : f32
    %111 = vector.broadcast %cst_68 : f32 to vector<8x1xf32>
    %112 = arith.divf %110, %111 : vector<8x1xf32>
    %113 = vector.broadcast %105 : vector<8x1xf32> to vector<8x32xf32>
    %114 = arith.subf %97, %113 : vector<8x32xf32>
    %cst_69 = arith.constant 9.99999974E-6 : f32
    %115 = vector.broadcast %cst_69 : f32 to vector<8x1xf32>
    %116 = arith.addf %112, %115 : vector<8x1xf32>
    %117 = math.rsqrt %116 : vector<8x1xf32>
    %118 = vector.broadcast %117 : vector<8x1xf32> to vector<8x32xf32>
    %119 = arith.mulf %114, %118 : vector<8x32xf32>
    %120 = vector.broadcast %99 : vector<1x32xf32> to vector<8x32xf32>
    %121 = arith.mulf %119, %120 : vector<8x32xf32>
    %122 = vector.broadcast %101 : vector<1x32xf32> to vector<8x32xf32>
    %123 = arith.addf %121, %122 : vector<8x32xf32>
    %124 = arith.truncf %123 : vector<8x32xf32> to vector<8x32xbf16>
    %c1 = arith.constant 1 : index
    %c0_70 = arith.constant 0 : index
    %c0_71 = arith.constant 0 : index
    %c0_72 = arith.constant 0 : index
    %125 = vector.load %arg6[%c1, %c0_70, %c0_71, %c0_72] : memref<2x12x32x8xbf16, #tpu.memory_space<vmem>>, vector<1x12x32x8xbf16>
    %126 = vector.shape_cast %125 : vector<1x12x32x8xbf16> to vector<12x32x8xbf16>
    %c1_73 = arith.constant 1 : index
    %c0_74 = arith.constant 0 : index
    %c0_75 = arith.constant 0 : index
    %c0_76 = arith.constant 0 : index
    %127 = vector.load %arg7[%c1_73, %c0_74, %c0_75, %c0_76] : memref<2x12x1x8xf32, #tpu.memory_space<vmem>>, vector<1x12x1x8xf32>
    %128 = vector.shape_cast %127 : vector<1x12x1x8xf32> to vector<12x1x8xf32>
    %129 = vector.shape_cast %124 : vector<8x32xbf16> to vector<1x8x32xbf16>
    %130 = vector.shape_cast %129 : vector<1x8x32xbf16> to vector<1x8x32xbf16>
    %131 = vector.broadcast %130 : vector<1x8x32xbf16> to vector<12x8x32xbf16>
    "tpu.trace_start"() <{level = 10 : i32, message = "gsd,gdk->gsk"}> : () -> ()
    %cst_77 = arith.constant dense<0.000000e+00> : vector<12x8x8xf32>
    %132 = tpu.matmul %131, %126, %cst_77 {dimension_numbers = #tpu.dot_dimension_numbers<[2], [1], [1], [2], [0, 0, 0, 1, 1, 2], [0], [0]>} : vector<12x8x32xbf16>, vector<12x32x8xbf16>, vector<12x8x8xf32> -> vector<12x8x8xf32>
    "tpu.trace_stop"() : () -> ()
    %133 = vector.broadcast %128 : vector<12x1x8xf32> to vector<12x8x8xf32>
    %134 = arith.addf %132, %133 : vector<12x8x8xf32>
    %135 = vector.extract_strided_slice %134 {offsets = [0, 0, 0], sizes = [4, 8, 8], strides = [1, 1, 1]} : vector<12x8x8xf32> to vector<4x8x8xf32>
    %136 = vector.extract_strided_slice %134 {offsets = [4, 0, 0], sizes = [4, 8, 8], strides = [1, 1, 1]} : vector<12x8x8xf32> to vector<4x8x8xf32>
    %137 = vector.extract_strided_slice %134 {offsets = [8, 0, 0], sizes = [4, 8, 8], strides = [1, 1, 1]} : vector<12x8x8xf32> to vector<4x8x8xf32>
    %c1_78 = arith.constant 1 : index
    %c0_79 = arith.constant 0 : index
    %c0_80 = arith.constant 0 : index
    %c0_81 = arith.constant 0 : index
    %138 = vector.load %arg8[%c1_78, %c0_79, %c0_80, %c0_81] : memref<2x4x8x32xbf16, #tpu.memory_space<vmem>>, vector<1x4x8x32xbf16>
    %139 = vector.shape_cast %138 : vector<1x4x8x32xbf16> to vector<4x8x32xbf16>
    %c1_82 = arith.constant 1 : index
    %c0_83 = arith.constant 0 : index
    %c0_84 = arith.constant 0 : index
    %140 = vector.load %arg9[%c1_82, %c0_83, %c0_84] : memref<2x1x32xf32, #tpu.memory_space<vmem>>, vector<1x1x32xf32>
    %141 = vector.shape_cast %140 : vector<1x1x32xf32> to vector<1x32xf32>
    %cst_85 = arith.constant 0.353553385 : f32
    %142 = vector.broadcast %cst_85 : f32 to vector<4x8x8xf32>
    %143 = arith.mulf %135, %142 : vector<4x8x8xf32>
    %144 = arith.truncf %143 : vector<4x8x8xf32> to vector<4x8x8xbf16>
    %145 = arith.truncf %136 : vector<4x8x8xf32> to vector<4x8x8xbf16>
    "tpu.trace_start"() <{level = 10 : i32, message = "hqd,hkd->hqk"}> : () -> ()
    %cst_86 = arith.constant dense<0.000000e+00> : vector<4x8x8xf32>
    %146 = tpu.matmul %144, %145, %cst_86 {dimension_numbers = #tpu.dot_dimension_numbers<[2], [2], [1], [1], [0, 0, 0, 1, 1, 1], [0], [0]>} : vector<4x8x8xbf16>, vector<4x8x8xbf16>, vector<4x8x8xf32> -> vector<4x8x8xf32>
    "tpu.trace_stop"() : () -> ()
    %147 = vector.shape_cast %1 : vector<8x8xf32> to vector<1x8x8xf32>
    %148 = vector.broadcast %147 : vector<1x8x8xf32> to vector<4x8x8xf32>
    %149 = arith.addf %146, %148 : vector<4x8x8xf32>
    %cst_87 = arith.constant dense<0xFF800000> : vector<4x8xf32>
    %150 = vector.multi_reduction <maximumf>, %149, %cst_87 [2] : vector<4x8x8xf32> to vector<4x8xf32>
    %151 = vector.shape_cast %150 : vector<4x8xf32> to vector<4x8x1xf32>
    %152 = vector.broadcast %151 : vector<4x8x1xf32> to vector<4x8x8xf32>
    %153 = arith.subf %149, %152 : vector<4x8x8xf32>
    %154 = math.exp %153 : vector<4x8x8xf32>
    %cst_88 = arith.constant dense<0.000000e+00> : vector<4x8xf32>
    %155 = vector.multi_reduction <add>, %154, %cst_88 [2] : vector<4x8x8xf32> to vector<4x8xf32>
    %156 = vector.shape_cast %155 : vector<4x8xf32> to vector<4x8x1xf32>
    %157 = tpu.reciprocal %156 {approx = true} : vector<4x8x1xf32> -> vector<4x8x1xf32>
    %158 = vector.broadcast %157 : vector<4x8x1xf32> to vector<4x8x8xf32>
    %159 = arith.mulf %154, %158 : vector<4x8x8xf32>
    %160 = arith.truncf %159 : vector<4x8x8xf32> to vector<4x8x8xbf16>
    %161 = arith.truncf %137 : vector<4x8x8xf32> to vector<4x8x8xbf16>
    "tpu.trace_start"() <{level = 10 : i32, message = "hqk,hkd->hqd"}> : () -> ()
    %cst_89 = arith.constant dense<0.000000e+00> : vector<4x8x8xf32>
    %162 = tpu.matmul %160, %161, %cst_89 {dimension_numbers = #tpu.dot_dimension_numbers<[2], [1], [1], [2], [0, 0, 0, 1, 1, 2], [0], [0]>} : vector<4x8x8xbf16>, vector<4x8x8xbf16>, vector<4x8x8xf32> -> vector<4x8x8xf32>
    "tpu.trace_stop"() : () -> ()
    %163 = arith.truncf %162 : vector<4x8x8xf32> to vector<4x8x8xbf16>
    "tpu.trace_start"() <{level = 10 : i32, message = "hqd,hde->hqe"}> : () -> ()
    %cst_90 = arith.constant dense<0.000000e+00> : vector<4x8x32xf32>
    %164 = tpu.matmul %163, %139, %cst_90 {dimension_numbers = #tpu.dot_dimension_numbers<[2], [1], [1], [2], [0, 0, 0, 1, 1, 2], [0], [0]>} : vector<4x8x8xbf16>, vector<4x8x32xbf16>, vector<4x8x32xf32> -> vector<4x8x32xf32>
    "tpu.trace_stop"() : () -> ()
    %cst_91 = arith.constant dense<0.000000e+00> : vector<8x32xf32>
    %165 = vector.multi_reduction <add>, %164, %cst_91 [0] : vector<4x8x32xf32> to vector<8x32xf32>
    %166 = vector.broadcast %141 : vector<1x32xf32> to vector<8x32xf32>
    %167 = arith.addf %165, %166 : vector<8x32xf32>
    %168 = arith.addf %123, %167 : vector<8x32xf32>
    %c1_92 = arith.constant 1 : index
    %c0_93 = arith.constant 0 : index
    %c0_94 = arith.constant 0 : index
    %169 = vector.load %arg10[%c1_92, %c0_93, %c0_94] : memref<2x1x32xf32, #tpu.memory_space<vmem>>, vector<1x1x32xf32>
    %170 = vector.shape_cast %169 : vector<1x1x32xf32> to vector<1x32xf32>
    %c1_95 = arith.constant 1 : index
    %c0_96 = arith.constant 0 : index
    %c0_97 = arith.constant 0 : index
    %171 = vector.load %arg11[%c1_95, %c0_96, %c0_97] : memref<2x1x32xf32, #tpu.memory_space<vmem>>, vector<1x1x32xf32>
    %172 = vector.shape_cast %171 : vector<1x1x32xf32> to vector<1x32xf32>
    %cst_98 = arith.constant dense<0.000000e+00> : vector<8xf32>
    %173 = vector.multi_reduction <add>, %168, %cst_98 [1] : vector<8x32xf32> to vector<8xf32>
    %174 = vector.shape_cast %173 : vector<8xf32> to vector<8x1xf32>
    %cst_99 = arith.constant 3.200000e+01 : f32
    %175 = vector.broadcast %cst_99 : f32 to vector<8x1xf32>
    %176 = arith.divf %174, %175 : vector<8x1xf32>
    %177 = vector.broadcast %176 : vector<8x1xf32> to vector<8x32xf32>
    %178 = arith.subf %168, %177 : vector<8x32xf32>
    %179 = arith.mulf %178, %178 : vector<8x32xf32>
    %cst_100 = arith.constant dense<0.000000e+00> : vector<8xf32>
    %180 = vector.multi_reduction <add>, %179, %cst_100 [1] : vector<8x32xf32> to vector<8xf32>
    %181 = vector.shape_cast %180 : vector<8xf32> to vector<8x1xf32>
    %cst_101 = arith.constant 3.200000e+01 : f32
    %182 = vector.broadcast %cst_101 : f32 to vector<8x1xf32>
    %183 = arith.divf %181, %182 : vector<8x1xf32>
    %184 = vector.broadcast %176 : vector<8x1xf32> to vector<8x32xf32>
    %185 = arith.subf %168, %184 : vector<8x32xf32>
    %cst_102 = arith.constant 9.99999974E-6 : f32
    %186 = vector.broadcast %cst_102 : f32 to vector<8x1xf32>
    %187 = arith.addf %183, %186 : vector<8x1xf32>
    %188 = math.rsqrt %187 : vector<8x1xf32>
    %189 = vector.broadcast %188 : vector<8x1xf32> to vector<8x32xf32>
    %190 = arith.mulf %185, %189 : vector<8x32xf32>
    %191 = vector.broadcast %170 : vector<1x32xf32> to vector<8x32xf32>
    %192 = arith.mulf %190, %191 : vector<8x32xf32>
    %193 = vector.broadcast %172 : vector<1x32xf32> to vector<8x32xf32>
    %194 = arith.addf %192, %193 : vector<8x32xf32>
    %195 = arith.truncf %194 : vector<8x32xf32> to vector<8x32xbf16>
    %c1_103 = arith.constant 1 : index
    %c0_104 = arith.constant 0 : index
    %c0_105 = arith.constant 0 : index
    %196 = vector.load %arg12[%c1_103, %c0_104, %c0_105] : memref<2x32x64xbf16, #tpu.memory_space<vmem>>, vector<1x32x64xbf16>
    %197 = vector.shape_cast %196 : vector<1x32x64xbf16> to vector<32x64xbf16>
    %c1_106 = arith.constant 1 : index
    %c0_107 = arith.constant 0 : index
    %c0_108 = arith.constant 0 : index
    %198 = vector.load %arg13[%c1_106, %c0_107, %c0_108] : memref<2x1x64xf32, #tpu.memory_space<vmem>>, vector<1x1x64xf32>
    %199 = vector.shape_cast %198 : vector<1x1x64xf32> to vector<1x64xf32>
    %c1_109 = arith.constant 1 : index
    %c0_110 = arith.constant 0 : index
    %c0_111 = arith.constant 0 : index
    %200 = vector.load %arg14[%c1_109, %c0_110, %c0_111] : memref<2x64x32xbf16, #tpu.memory_space<vmem>>, vector<1x64x32xbf16>
    %201 = vector.shape_cast %200 : vector<1x64x32xbf16> to vector<64x32xbf16>
    %c1_112 = arith.constant 1 : index
    %c0_113 = arith.constant 0 : index
    %c0_114 = arith.constant 0 : index
    %202 = vector.load %arg15[%c1_112, %c0_113, %c0_114] : memref<2x1x32xf32, #tpu.memory_space<vmem>>, vector<1x1x32xf32>
    %203 = vector.shape_cast %202 : vector<1x1x32xf32> to vector<1x32xf32>
    %cst_115 = arith.constant dense<0.000000e+00> : vector<8x64xf32>
    %204 = tpu.matmul %195, %197, %cst_115 {dimension_numbers = #tpu.dot_dimension_numbers<[1], [0], [0], [1], [0, 0, 1, 1], [], []>} : vector<8x32xbf16>, vector<32x64xbf16>, vector<8x64xf32> -> vector<8x64xf32>
    %205 = vector.broadcast %199 : vector<1x64xf32> to vector<8x64xf32>
    %206 = arith.addf %204, %205 : vector<8x64xf32>
    %cst_116 = arith.constant 0.000000e+00 : f32
    %207 = vector.broadcast %cst_116 : f32 to vector<8x64xf32>
    %208 = arith.maximumf %206, %207 : vector<8x64xf32>
    %209 = arith.truncf %208 : vector<8x64xf32> to vector<8x64xbf16>
    %cst_117 = arith.constant dense<0.000000e+00> : vector<8x32xf32>
    %210 = tpu.matmul %209, %201, %cst_117 {dimension_numbers = #tpu.dot_dimension_numbers<[1], [0], [0], [1], [0, 0, 1, 1], [], []>} : vector<8x64xbf16>, vector<64x32xbf16>, vector<8x32xf32> -> vector<8x32xf32>
    %211 = vector.broadcast %203 : vector<1x32xf32> to vector<8x32xf32>
    %212 = arith.addf %210, %211 : vector<8x32xf32>
    %213 = arith.addf %194, %212 : vector<8x32xf32>
    %c1_118 = arith.constant 1 : index
    %c0_119 = arith.constant 0 : index
    %c0_120 = arith.constant 0 : index
    %214 = vector.load %arg16[%c1_118, %c0_119, %c0_120] : memref<2x1x32xf32, #tpu.memory_space<vmem>>, vector<1x1x32xf32>
    %215 = vector.shape_cast %214 : vector<1x1x32xf32> to vector<1x32xf32>
    %c1_121 = arith.constant 1 : index
    %c0_122 = arith.constant 0 : index
    %c0_123 = arith.constant 0 : index
    %216 = vector.load %arg17[%c1_121, %c0_122, %c0_123] : memref<2x1x32xf32, #tpu.memory_space<vmem>>, vector<1x1x32xf32>
    %217 = vector.shape_cast %216 : vector<1x1x32xf32> to vector<1x32xf32>
    %cst_124 = arith.constant dense<0.000000e+00> : vector<8xf32>
    %218 = vector.multi_reduction <add>, %213, %cst_124 [1] : vector<8x32xf32> to vector<8xf32>
    %219 = vector.shape_cast %218 : vector<8xf32> to vector<8x1xf32>
    %cst_125 = arith.constant 3.200000e+01 : f32
    %220 = vector.broadcast %cst_125 : f32 to vector<8x1xf32>
    %221 = arith.divf %219, %220 : vector<8x1xf32>
    %222 = vector.broadcast %221 : vector<8x1xf32> to vector<8x32xf32>
    %223 = arith.subf %213, %222 : vector<8x32xf32>
    %224 = arith.mulf %223, %223 : vector<8x32xf32>
    %cst_126 = arith.constant dense<0.000000e+00> : vector<8xf32>
    %225 = vector.multi_reduction <add>, %224, %cst_126 [1] : vector<8x32xf32> to vector<8xf32>
    %226 = vector.shape_cast %225 : vector<8xf32> to vector<8x1xf32>
    %cst_127 = arith.constant 3.200000e+01 : f32
    %227 = vector.broadcast %cst_127 : f32 to vector<8x1xf32>
    %228 = arith.divf %226, %227 : vector<8x1xf32>
    %229 = vector.broadcast %221 : vector<8x1xf32> to vector<8x32xf32>
    %230 = arith.subf %213, %229 : vector<8x32xf32>
    %cst_128 = arith.constant 9.99999974E-6 : f32
    %231 = vector.broadcast %cst_128 : f32 to vector<8x1xf32>
    %232 = arith.addf %228, %231 : vector<8x1xf32>
    %233 = math.rsqrt %232 : vector<8x1xf32>
    %234 = vector.broadcast %233 : vector<8x1xf32> to vector<8x32xf32>
    %235 = arith.mulf %230, %234 : vector<8x32xf32>
    %236 = vector.broadcast %215 : vector<1x32xf32> to vector<8x32xf32>
    %237 = arith.mulf %235, %236 : vector<8x32xf32>
    %238 = vector.broadcast %217 : vector<1x32xf32> to vector<8x32xf32>
    %239 = arith.addf %237, %238 : vector<8x32xf32>
    %240 = arith.truncf %239 : vector<8x32xf32> to vector<8x32xbf16>
    %241 = vector.shape_cast %240 : vector<8x32xbf16> to vector<1x8x32xbf16>
    %242 = vector.shape_cast %241 : vector<1x8x32xbf16> to vector<1x8x32xbf16>
    %243 = vector.broadcast %242 : vector<1x8x32xbf16> to vector<8x8x32xbf16>
    %c0_129 = arith.constant 0 : index
    %c0_130 = arith.constant 0 : index
    %c0_131 = arith.constant 0 : index
    %244 = vector.load %arg2[%c0_129, %c0_130, %c0_131] : memref<1x8x32xf32, #tpu.memory_space<vmem>>, vector<1x8x32xf32>
    %245 = vector.shape_cast %244 : vector<1x8x32xf32> to vector<8x32xf32>
    %246 = arith.truncf %245 : vector<8x32xf32> to vector<8x32xbf16>
    %c0_132 = arith.constant 0 : index
    %c0_133 = arith.constant 0 : index
    %c0_134 = arith.constant 0 : index
    %c0_135 = arith.constant 0 : index
    %247 = vector.load %arg18[%c0_132, %c0_133, %c0_134, %c0_135] : memref<2x12x32x8xbf16, #tpu.memory_space<vmem>>, vector<1x12x32x8xbf16>
    %248 = vector.shape_cast %247 : vector<1x12x32x8xbf16> to vector<12x32x8xbf16>
    %c0_136 = arith.constant 0 : index
    %c0_137 = arith.constant 0 : index
    %c0_138 = arith.constant 0 : index
    %c0_139 = arith.constant 0 : index
    %249 = vector.load %arg19[%c0_136, %c0_137, %c0_138, %c0_139] : memref<2x12x1x8xf32, #tpu.memory_space<vmem>>, vector<1x12x1x8xf32>
    %250 = vector.shape_cast %249 : vector<1x12x1x8xf32> to vector<12x1x8xf32>
    %251 = vector.shape_cast %246 : vector<8x32xbf16> to vector<1x8x32xbf16>
    %252 = vector.shape_cast %251 : vector<1x8x32xbf16> to vector<1x8x32xbf16>
    %253 = vector.broadcast %252 : vector<1x8x32xbf16> to vector<12x8x32xbf16>
    "tpu.trace_start"() <{level = 10 : i32, message = "gsd,gdk->gsk"}> : () -> ()
    %cst_140 = arith.constant dense<0.000000e+00> : vector<12x8x8xf32>
    %254 = tpu.matmul %253, %248, %cst_140 {dimension_numbers = #tpu.dot_dimension_numbers<[2], [1], [1], [2], [0, 0, 0, 1, 1, 2], [0], [0]>} : vector<12x8x32xbf16>, vector<12x32x8xbf16>, vector<12x8x8xf32> -> vector<12x8x8xf32>
    "tpu.trace_stop"() : () -> ()
    %255 = vector.broadcast %250 : vector<12x1x8xf32> to vector<12x8x8xf32>
    %256 = arith.addf %254, %255 : vector<12x8x8xf32>
    %257 = vector.extract_strided_slice %256 {offsets = [0, 0, 0], sizes = [4, 8, 8], strides = [1, 1, 1]} : vector<12x8x8xf32> to vector<4x8x8xf32>
    %258 = vector.extract_strided_slice %256 {offsets = [4, 0, 0], sizes = [4, 8, 8], strides = [1, 1, 1]} : vector<12x8x8xf32> to vector<4x8x8xf32>
    %259 = vector.extract_strided_slice %256 {offsets = [8, 0, 0], sizes = [4, 8, 8], strides = [1, 1, 1]} : vector<12x8x8xf32> to vector<4x8x8xf32>
    %c0_141 = arith.constant 0 : index
    %c0_142 = arith.constant 0 : index
    %c0_143 = arith.constant 0 : index
    %c0_144 = arith.constant 0 : index
    %260 = vector.load %arg20[%c0_141, %c0_142, %c0_143, %c0_144] : memref<2x4x8x32xbf16, #tpu.memory_space<vmem>>, vector<1x4x8x32xbf16>
    %261 = vector.shape_cast %260 : vector<1x4x8x32xbf16> to vector<4x8x32xbf16>
    %c0_145 = arith.constant 0 : index
    %c0_146 = arith.constant 0 : index
    %c0_147 = arith.constant 0 : index
    %262 = vector.load %arg21[%c0_145, %c0_146, %c0_147] : memref<2x1x32xf32, #tpu.memory_space<vmem>>, vector<1x1x32xf32>
    %263 = vector.shape_cast %262 : vector<1x1x32xf32> to vector<1x32xf32>
    %cst_148 = arith.constant 0.353553385 : f32
    %264 = vector.broadcast %cst_148 : f32 to vector<4x8x8xf32>
    %265 = arith.mulf %257, %264 : vector<4x8x8xf32>
    %266 = arith.truncf %265 : vector<4x8x8xf32> to vector<4x8x8xbf16>
    %267 = arith.truncf %258 : vector<4x8x8xf32> to vector<4x8x8xbf16>
    "tpu.trace_start"() <{level = 10 : i32, message = "hqd,hkd->hqk"}> : () -> ()
    %cst_149 = arith.constant dense<0.000000e+00> : vector<4x8x8xf32>
    %268 = tpu.matmul %266, %267, %cst_149 {dimension_numbers = #tpu.dot_dimension_numbers<[2], [2], [1], [1], [0, 0, 0, 1, 1, 1], [0], [0]>} : vector<4x8x8xbf16>, vector<4x8x8xbf16>, vector<4x8x8xf32> -> vector<4x8x8xf32>
    "tpu.trace_stop"() : () -> ()
    %269 = vector.shape_cast %3 : vector<8x8xf32> to vector<1x8x8xf32>
    %270 = vector.broadcast %269 : vector<1x8x8xf32> to vector<4x8x8xf32>
    %271 = arith.addf %268, %270 : vector<4x8x8xf32>
    %cst_150 = arith.constant dense<0xFF800000> : vector<4x8xf32>
    %272 = vector.multi_reduction <maximumf>, %271, %cst_150 [2] : vector<4x8x8xf32> to vector<4x8xf32>
    %273 = vector.shape_cast %272 : vector<4x8xf32> to vector<4x8x1xf32>
    %274 = vector.broadcast %273 : vector<4x8x1xf32> to vector<4x8x8xf32>
    %275 = arith.subf %271, %274 : vector<4x8x8xf32>
    %276 = math.exp %275 : vector<4x8x8xf32>
    %cst_151 = arith.constant dense<0.000000e+00> : vector<4x8xf32>
    %277 = vector.multi_reduction <add>, %276, %cst_151 [2] : vector<4x8x8xf32> to vector<4x8xf32>
    %278 = vector.shape_cast %277 : vector<4x8xf32> to vector<4x8x1xf32>
    %279 = tpu.reciprocal %278 {approx = true} : vector<4x8x1xf32> -> vector<4x8x1xf32>
    %280 = vector.broadcast %279 : vector<4x8x1xf32> to vector<4x8x8xf32>
    %281 = arith.mulf %276, %280 : vector<4x8x8xf32>
    %282 = arith.truncf %281 : vector<4x8x8xf32> to vector<4x8x8xbf16>
    %283 = arith.truncf %259 : vector<4x8x8xf32> to vector<4x8x8xbf16>
    "tpu.trace_start"() <{level = 10 : i32, message = "hqk,hkd->hqd"}> : () -> ()
    %cst_152 = arith.constant dense<0.000000e+00> : vector<4x8x8xf32>
    %284 = tpu.matmul %282, %283, %cst_152 {dimension_numbers = #tpu.dot_dimension_numbers<[2], [1], [1], [2], [0, 0, 0, 1, 1, 2], [0], [0]>} : vector<4x8x8xbf16>, vector<4x8x8xbf16>, vector<4x8x8xf32> -> vector<4x8x8xf32>
    "tpu.trace_stop"() : () -> ()
    %285 = arith.truncf %284 : vector<4x8x8xf32> to vector<4x8x8xbf16>
    "tpu.trace_start"() <{level = 10 : i32, message = "hqd,hde->hqe"}> : () -> ()
    %cst_153 = arith.constant dense<0.000000e+00> : vector<4x8x32xf32>
    %286 = tpu.matmul %285, %261, %cst_153 {dimension_numbers = #tpu.dot_dimension_numbers<[2], [1], [1], [2], [0, 0, 0, 1, 1, 2], [0], [0]>} : vector<4x8x8xbf16>, vector<4x8x32xbf16>, vector<4x8x32xf32> -> vector<4x8x32xf32>
    "tpu.trace_stop"() : () -> ()
    %cst_154 = arith.constant dense<0.000000e+00> : vector<8x32xf32>
    %287 = vector.multi_reduction <add>, %286, %cst_154 [0] : vector<4x8x32xf32> to vector<8x32xf32>
    %288 = vector.broadcast %263 : vector<1x32xf32> to vector<8x32xf32>
    %289 = arith.addf %287, %288 : vector<8x32xf32>
    %290 = arith.addf %245, %289 : vector<8x32xf32>
    %c0_155 = arith.constant 0 : index
    %c0_156 = arith.constant 0 : index
    %c0_157 = arith.constant 0 : index
    %291 = vector.load %arg22[%c0_155, %c0_156, %c0_157] : memref<2x1x32xf32, #tpu.memory_space<vmem>>, vector<1x1x32xf32>
    %292 = vector.shape_cast %291 : vector<1x1x32xf32> to vector<1x32xf32>
    %c0_158 = arith.constant 0 : index
    %c0_159 = arith.constant 0 : index
    %c0_160 = arith.constant 0 : index
    %293 = vector.load %arg23[%c0_158, %c0_159, %c0_160] : memref<2x1x32xf32, #tpu.memory_space<vmem>>, vector<1x1x32xf32>
    %294 = vector.shape_cast %293 : vector<1x1x32xf32> to vector<1x32xf32>
    %cst_161 = arith.constant dense<0.000000e+00> : vector<8xf32>
    %295 = vector.multi_reduction <add>, %290, %cst_161 [1] : vector<8x32xf32> to vector<8xf32>
    %296 = vector.shape_cast %295 : vector<8xf32> to vector<8x1xf32>
    %cst_162 = arith.constant 3.200000e+01 : f32
    %297 = vector.broadcast %cst_162 : f32 to vector<8x1xf32>
    %298 = arith.divf %296, %297 : vector<8x1xf32>
    %299 = vector.broadcast %298 : vector<8x1xf32> to vector<8x32xf32>
    %300 = arith.subf %290, %299 : vector<8x32xf32>
    %301 = arith.mulf %300, %300 : vector<8x32xf32>
    %cst_163 = arith.constant dense<0.000000e+00> : vector<8xf32>
    %302 = vector.multi_reduction <add>, %301, %cst_163 [1] : vector<8x32xf32> to vector<8xf32>
    %303 = vector.shape_cast %302 : vector<8xf32> to vector<8x1xf32>
    %cst_164 = arith.constant 3.200000e+01 : f32
    %304 = vector.broadcast %cst_164 : f32 to vector<8x1xf32>
    %305 = arith.divf %303, %304 : vector<8x1xf32>
    %306 = vector.broadcast %298 : vector<8x1xf32> to vector<8x32xf32>
    %307 = arith.subf %290, %306 : vector<8x32xf32>
    %cst_165 = arith.constant 9.99999974E-6 : f32
    %308 = vector.broadcast %cst_165 : f32 to vector<8x1xf32>
    %309 = arith.addf %305, %308 : vector<8x1xf32>
    %310 = math.rsqrt %309 : vector<8x1xf32>
    %311 = vector.broadcast %310 : vector<8x1xf32> to vector<8x32xf32>
    %312 = arith.mulf %307, %311 : vector<8x32xf32>
    %313 = vector.broadcast %292 : vector<1x32xf32> to vector<8x32xf32>
    %314 = arith.mulf %312, %313 : vector<8x32xf32>
    %315 = vector.broadcast %294 : vector<1x32xf32> to vector<8x32xf32>
    %316 = arith.addf %314, %315 : vector<8x32xf32>
    %317 = arith.truncf %316 : vector<8x32xf32> to vector<8x32xbf16>
    %c0_166 = arith.constant 0 : index
    %c0_167 = arith.constant 0 : index
    %c0_168 = arith.constant 0 : index
    %c0_169 = arith.constant 0 : index
    %318 = vector.load %arg24[%c0_166, %c0_167, %c0_168, %c0_169] : memref<2x4x32x8xbf16, #tpu.memory_space<vmem>>, vector<1x4x32x8xbf16>
    %319 = vector.shape_cast %318 : vector<1x4x32x8xbf16> to vector<4x32x8xbf16>
    %c0_170 = arith.constant 0 : index
    %c0_171 = arith.constant 0 : index
    %c0_172 = arith.constant 0 : index
    %c0_173 = arith.constant 0 : index
    %320 = vector.load %arg25[%c0_170, %c0_171, %c0_172, %c0_173] : memref<2x4x1x8xf32, #tpu.memory_space<vmem>>, vector<1x4x1x8xf32>
    %321 = vector.shape_cast %320 : vector<1x4x1x8xf32> to vector<4x1x8xf32>
    %322 = vector.shape_cast %317 : vector<8x32xbf16> to vector<1x8x32xbf16>
    %323 = vector.shape_cast %322 : vector<1x8x32xbf16> to vector<1x8x32xbf16>
    %324 = vector.broadcast %323 : vector<1x8x32xbf16> to vector<4x8x32xbf16>
    "tpu.trace_start"() <{level = 10 : i32, message = "gsd,gdk->gsk"}> : () -> ()
    %cst_174 = arith.constant dense<0.000000e+00> : vector<4x8x8xf32>
    %325 = tpu.matmul %324, %319, %cst_174 {dimension_numbers = #tpu.dot_dimension_numbers<[2], [1], [1], [2], [0, 0, 0, 1, 1, 2], [0], [0]>} : vector<4x8x32xbf16>, vector<4x32x8xbf16>, vector<4x8x8xf32> -> vector<4x8x8xf32>
    "tpu.trace_stop"() : () -> ()
    %326 = vector.broadcast %321 : vector<4x1x8xf32> to vector<4x8x8xf32>
    %327 = arith.addf %325, %326 : vector<4x8x8xf32>
    %c0_175 = arith.constant 0 : index
    %c0_176 = arith.constant 0 : index
    %c0_177 = arith.constant 0 : index
    %c0_178 = arith.constant 0 : index
    %328 = vector.load %arg26[%c0_175, %c0_176, %c0_177, %c0_178] : memref<2x8x32x8xbf16, #tpu.memory_space<vmem>>, vector<1x8x32x8xbf16>
    %329 = vector.shape_cast %328 : vector<1x8x32x8xbf16> to vector<8x32x8xbf16>
    "tpu.trace_start"() <{level = 10 : i32, message = "gsd,gdk->gsk"}> : () -> ()
    %cst_179 = arith.constant dense<0.000000e+00> : vector<8x8x8xf32>
    %330 = tpu.matmul %243, %329, %cst_179 {dimension_numbers = #tpu.dot_dimension_numbers<[2], [1], [1], [2], [0, 0, 0, 1, 1, 2], [0], [0]>} : vector<8x8x32xbf16>, vector<8x32x8xbf16>, vector<8x8x8xf32> -> vector<8x8x8xf32>
    "tpu.trace_stop"() : () -> ()
    %c0_180 = arith.constant 0 : index
    %c0_181 = arith.constant 0 : index
    %c0_182 = arith.constant 0 : index
    %c0_183 = arith.constant 0 : index
    %331 = vector.load %arg27[%c0_180, %c0_181, %c0_182, %c0_183] : memref<2x8x1x8xf32, #tpu.memory_space<vmem>>, vector<1x8x1x8xf32>
    %332 = vector.shape_cast %331 : vector<1x8x1x8xf32> to vector<8x1x8xf32>
    %333 = vector.broadcast %332 : vector<8x1x8xf32> to vector<8x8x8xf32>
    %334 = arith.addf %330, %333 : vector<8x8x8xf32>
    %335 = vector.extract_strided_slice %334 {offsets = [0, 0, 0], sizes = [4, 8, 8], strides = [1, 1, 1]} : vector<8x8x8xf32> to vector<4x8x8xf32>
    %336 = vector.extract_strided_slice %334 {offsets = [4, 0, 0], sizes = [4, 8, 8], strides = [1, 1, 1]} : vector<8x8x8xf32> to vector<4x8x8xf32>
    %c0_184 = arith.constant 0 : index
    %c0_185 = arith.constant 0 : index
    %c0_186 = arith.constant 0 : index
    %c0_187 = arith.constant 0 : index
    %337 = vector.load %arg28[%c0_184, %c0_185, %c0_186, %c0_187] : memref<2x4x8x32xbf16, #tpu.memory_space<vmem>>, vector<1x4x8x32xbf16>
    %338 = vector.shape_cast %337 : vector<1x4x8x32xbf16> to vector<4x8x32xbf16>
    %c0_188 = arith.constant 0 : index
    %c0_189 = arith.constant 0 : index
    %c0_190 = arith.constant 0 : index
    %339 = vector.load %arg29[%c0_188, %c0_189, %c0_190] : memref<2x1x32xf32, #tpu.memory_space<vmem>>, vector<1x1x32xf32>
    %340 = vector.shape_cast %339 : vector<1x1x32xf32> to vector<1x32xf32>
    %cst_191 = arith.constant 0.353553385 : f32
    %341 = vector.broadcast %cst_191 : f32 to vector<4x8x8xf32>
    %342 = arith.mulf %327, %341 : vector<4x8x8xf32>
    %343 = arith.truncf %342 : vector<4x8x8xf32> to vector<4x8x8xbf16>
    %344 = arith.truncf %335 : vector<4x8x8xf32> to vector<4x8x8xbf16>
    "tpu.trace_start"() <{level = 10 : i32, message = "hqd,hkd->hqk"}> : () -> ()
    %cst_192 = arith.constant dense<0.000000e+00> : vector<4x8x8xf32>
    %345 = tpu.matmul %343, %344, %cst_192 {dimension_numbers = #tpu.dot_dimension_numbers<[2], [2], [1], [1], [0, 0, 0, 1, 1, 1], [0], [0]>} : vector<4x8x8xbf16>, vector<4x8x8xbf16>, vector<4x8x8xf32> -> vector<4x8x8xf32>
    "tpu.trace_stop"() : () -> ()
    %346 = vector.shape_cast %5 : vector<8x8xf32> to vector<1x8x8xf32>
    %347 = vector.broadcast %346 : vector<1x8x8xf32> to vector<4x8x8xf32>
    %348 = arith.addf %345, %347 : vector<4x8x8xf32>
    %cst_193 = arith.constant dense<0xFF800000> : vector<4x8xf32>
    %349 = vector.multi_reduction <maximumf>, %348, %cst_193 [2] : vector<4x8x8xf32> to vector<4x8xf32>
    %350 = vector.shape_cast %349 : vector<4x8xf32> to vector<4x8x1xf32>
    %351 = vector.broadcast %350 : vector<4x8x1xf32> to vector<4x8x8xf32>
    %352 = arith.subf %348, %351 : vector<4x8x8xf32>
    %353 = math.exp %352 : vector<4x8x8xf32>
    %cst_194 = arith.constant dense<0.000000e+00> : vector<4x8xf32>
    %354 = vector.multi_reduction <add>, %353, %cst_194 [2] : vector<4x8x8xf32> to vector<4x8xf32>
    %355 = vector.shape_cast %354 : vector<4x8xf32> to vector<4x8x1xf32>
    %356 = tpu.reciprocal %355 {approx = true} : vector<4x8x1xf32> -> vector<4x8x1xf32>
    %357 = vector.broadcast %356 : vector<4x8x1xf32> to vector<4x8x8xf32>
    %358 = arith.mulf %353, %357 : vector<4x8x8xf32>
    %359 = arith.truncf %358 : vector<4x8x8xf32> to vector<4x8x8xbf16>
    %360 = arith.truncf %336 : vector<4x8x8xf32> to vector<4x8x8xbf16>
    "tpu.trace_start"() <{level = 10 : i32, message = "hqk,hkd->hqd"}> : () -> ()
    %cst_195 = arith.constant dense<0.000000e+00> : vector<4x8x8xf32>
    %361 = tpu.matmul %359, %360, %cst_195 {dimension_numbers = #tpu.dot_dimension_numbers<[2], [1], [1], [2], [0, 0, 0, 1, 1, 2], [0], [0]>} : vector<4x8x8xbf16>, vector<4x8x8xbf16>, vector<4x8x8xf32> -> vector<4x8x8xf32>
    "tpu.trace_stop"() : () -> ()
    %362 = arith.truncf %361 : vector<4x8x8xf32> to vector<4x8x8xbf16>
    "tpu.trace_start"() <{level = 10 : i32, message = "hqd,hde->hqe"}> : () -> ()
    %cst_196 = arith.constant dense<0.000000e+00> : vector<4x8x32xf32>
    %363 = tpu.matmul %362, %338, %cst_196 {dimension_numbers = #tpu.dot_dimension_numbers<[2], [1], [1], [2], [0, 0, 0, 1, 1, 2], [0], [0]>} : vector<4x8x8xbf16>, vector<4x8x32xbf16>, vector<4x8x32xf32> -> vector<4x8x32xf32>
    "tpu.trace_stop"() : () -> ()
    %cst_197 = arith.constant dense<0.000000e+00> : vector<8x32xf32>
    %364 = vector.multi_reduction <add>, %363, %cst_197 [0] : vector<4x8x32xf32> to vector<8x32xf32>
    %365 = vector.broadcast %340 : vector<1x32xf32> to vector<8x32xf32>
    %366 = arith.addf %364, %365 : vector<8x32xf32>
    %367 = arith.addf %316, %366 : vector<8x32xf32>
    %c0_198 = arith.constant 0 : index
    %c0_199 = arith.constant 0 : index
    %c0_200 = arith.constant 0 : index
    %368 = vector.load %arg30[%c0_198, %c0_199, %c0_200] : memref<2x1x32xf32, #tpu.memory_space<vmem>>, vector<1x1x32xf32>
    %369 = vector.shape_cast %368 : vector<1x1x32xf32> to vector<1x32xf32>
    %c0_201 = arith.constant 0 : index
    %c0_202 = arith.constant 0 : index
    %c0_203 = arith.constant 0 : index
    %370 = vector.load %arg31[%c0_201, %c0_202, %c0_203] : memref<2x1x32xf32, #tpu.memory_space<vmem>>, vector<1x1x32xf32>
    %371 = vector.shape_cast %370 : vector<1x1x32xf32> to vector<1x32xf32>
    %cst_204 = arith.constant dense<0.000000e+00> : vector<8xf32>
    %372 = vector.multi_reduction <add>, %367, %cst_204 [1] : vector<8x32xf32> to vector<8xf32>
    %373 = vector.shape_cast %372 : vector<8xf32> to vector<8x1xf32>
    %cst_205 = arith.constant 3.200000e+01 : f32
    %374 = vector.broadcast %cst_205 : f32 to vector<8x1xf32>
    %375 = arith.divf %373, %374 : vector<8x1xf32>
    %376 = vector.broadcast %375 : vector<8x1xf32> to vector<8x32xf32>
    %377 = arith.subf %367, %376 : vector<8x32xf32>
    %378 = arith.mulf %377, %377 : vector<8x32xf32>
    %cst_206 = arith.constant dense<0.000000e+00> : vector<8xf32>
    %379 = vector.multi_reduction <add>, %378, %cst_206 [1] : vector<8x32xf32> to vector<8xf32>
    %380 = vector.shape_cast %379 : vector<8xf32> to vector<8x1xf32>
    %cst_207 = arith.constant 3.200000e+01 : f32
    %381 = vector.broadcast %cst_207 : f32 to vector<8x1xf32>
    %382 = arith.divf %380, %381 : vector<8x1xf32>
    %383 = vector.broadcast %375 : vector<8x1xf32> to vector<8x32xf32>
    %384 = arith.subf %367, %383 : vector<8x32xf32>
    %cst_208 = arith.constant 9.99999974E-6 : f32
    %385 = vector.broadcast %cst_208 : f32 to vector<8x1xf32>
    %386 = arith.addf %382, %385 : vector<8x1xf32>
    %387 = math.rsqrt %386 : vector<8x1xf32>
    %388 = vector.broadcast %387 : vector<8x1xf32> to vector<8x32xf32>
    %389 = arith.mulf %384, %388 : vector<8x32xf32>
    %390 = vector.broadcast %369 : vector<1x32xf32> to vector<8x32xf32>
    %391 = arith.mulf %389, %390 : vector<8x32xf32>
    %392 = vector.broadcast %371 : vector<1x32xf32> to vector<8x32xf32>
    %393 = arith.addf %391, %392 : vector<8x32xf32>
    %394 = arith.truncf %393 : vector<8x32xf32> to vector<8x32xbf16>
    %c0_209 = arith.constant 0 : index
    %c0_210 = arith.constant 0 : index
    %c0_211 = arith.constant 0 : index
    %395 = vector.load %arg32[%c0_209, %c0_210, %c0_211] : memref<2x32x64xbf16, #tpu.memory_space<vmem>>, vector<1x32x64xbf16>
    %396 = vector.shape_cast %395 : vector<1x32x64xbf16> to vector<32x64xbf16>
    %c0_212 = arith.constant 0 : index
    %c0_213 = arith.constant 0 : index
    %c0_214 = arith.constant 0 : index
    %397 = vector.load %arg33[%c0_212, %c0_213, %c0_214] : memref<2x1x64xf32, #tpu.memory_space<vmem>>, vector<1x1x64xf32>
    %398 = vector.shape_cast %397 : vector<1x1x64xf32> to vector<1x64xf32>
    %c0_215 = arith.constant 0 : index
    %c0_216 = arith.constant 0 : index
    %c0_217 = arith.constant 0 : index
    %399 = vector.load %arg34[%c0_215, %c0_216, %c0_217] : memref<2x64x32xbf16, #tpu.memory_space<vmem>>, vector<1x64x32xbf16>
    %400 = vector.shape_cast %399 : vector<1x64x32xbf16> to vector<64x32xbf16>
    %c0_218 = arith.constant 0 : index
    %c0_219 = arith.constant 0 : index
    %c0_220 = arith.constant 0 : index
    %401 = vector.load %arg35[%c0_218, %c0_219, %c0_220] : memref<2x1x32xf32, #tpu.memory_space<vmem>>, vector<1x1x32xf32>
    %402 = vector.shape_cast %401 : vector<1x1x32xf32> to vector<1x32xf32>
    %cst_221 = arith.constant dense<0.000000e+00> : vector<8x64xf32>
    %403 = tpu.matmul %394, %396, %cst_221 {dimension_numbers = #tpu.dot_dimension_numbers<[1], [0], [0], [1], [0, 0, 1, 1], [], []>} : vector<8x32xbf16>, vector<32x64xbf16>, vector<8x64xf32> -> vector<8x64xf32>
    %404 = vector.broadcast %398 : vector<1x64xf32> to vector<8x64xf32>
    %405 = arith.addf %403, %404 : vector<8x64xf32>
    %cst_222 = arith.constant 0.000000e+00 : f32
    %406 = vector.broadcast %cst_222 : f32 to vector<8x64xf32>
    %407 = arith.maximumf %405, %406 : vector<8x64xf32>
    %408 = arith.truncf %407 : vector<8x64xf32> to vector<8x64xbf16>
    %cst_223 = arith.constant dense<0.000000e+00> : vector<8x32xf32>
    %409 = tpu.matmul %408, %400, %cst_223 {dimension_numbers = #tpu.dot_dimension_numbers<[1], [0], [0], [1], [0, 0, 1, 1], [], []>} : vector<8x64xbf16>, vector<64x32xbf16>, vector<8x32xf32> -> vector<8x32xf32>
    %410 = vector.broadcast %402 : vector<1x32xf32> to vector<8x32xf32>
    %411 = arith.addf %409, %410 : vector<8x32xf32>
    %412 = arith.addf %393, %411 : vector<8x32xf32>
    %c0_224 = arith.constant 0 : index
    %c0_225 = arith.constant 0 : index
    %c0_226 = arith.constant 0 : index
    %413 = vector.load %arg36[%c0_224, %c0_225, %c0_226] : memref<2x1x32xf32, #tpu.memory_space<vmem>>, vector<1x1x32xf32>
    %414 = vector.shape_cast %413 : vector<1x1x32xf32> to vector<1x32xf32>
    %c0_227 = arith.constant 0 : index
    %c0_228 = arith.constant 0 : index
    %c0_229 = arith.constant 0 : index
    %415 = vector.load %arg37[%c0_227, %c0_228, %c0_229] : memref<2x1x32xf32, #tpu.memory_space<vmem>>, vector<1x1x32xf32>
    %416 = vector.shape_cast %415 : vector<1x1x32xf32> to vector<1x32xf32>
    %cst_230 = arith.constant dense<0.000000e+00> : vector<8xf32>
    %417 = vector.multi_reduction <add>, %412, %cst_230 [1] : vector<8x32xf32> to vector<8xf32>
    %418 = vector.shape_cast %417 : vector<8xf32> to vector<8x1xf32>
    %cst_231 = arith.constant 3.200000e+01 : f32
    %419 = vector.broadcast %cst_231 : f32 to vector<8x1xf32>
    %420 = arith.divf %418, %419 : vector<8x1xf32>
    %421 = vector.broadcast %420 : vector<8x1xf32> to vector<8x32xf32>
    %422 = arith.subf %412, %421 : vector<8x32xf32>
    %423 = arith.mulf %422, %422 : vector<8x32xf32>
    %cst_232 = arith.constant dense<0.000000e+00> : vector<8xf32>
    %424 = vector.multi_reduction <add>, %423, %cst_232 [1] : vector<8x32xf32> to vector<8xf32>
    %425 = vector.shape_cast %424 : vector<8xf32> to vector<8x1xf32>
    %cst_233 = arith.constant 3.200000e+01 : f32
    %426 = vector.broadcast %cst_233 : f32 to vector<8x1xf32>
    %427 = arith.divf %425, %426 : vector<8x1xf32>
    %428 = vector.broadcast %420 : vector<8x1xf32> to vector<8x32xf32>
    %429 = arith.subf %412, %428 : vector<8x32xf32>
    %cst_234 = arith.constant 9.99999974E-6 : f32
    %430 = vector.broadcast %cst_234 : f32 to vector<8x1xf32>
    %431 = arith.addf %427, %430 : vector<8x1xf32>
    %432 = math.rsqrt %431 : vector<8x1xf32>
    %433 = vector.broadcast %432 : vector<8x1xf32> to vector<8x32xf32>
    %434 = arith.mulf %429, %433 : vector<8x32xf32>
    %435 = vector.broadcast %414 : vector<1x32xf32> to vector<8x32xf32>
    %436 = arith.mulf %434, %435 : vector<8x32xf32>
    %437 = vector.broadcast %416 : vector<1x32xf32> to vector<8x32xf32>
    %438 = arith.addf %436, %437 : vector<8x32xf32>
    %439 = arith.truncf %438 : vector<8x32xf32> to vector<8x32xbf16>
    %c1_235 = arith.constant 1 : index
    %c0_236 = arith.constant 0 : index
    %c0_237 = arith.constant 0 : index
    %c0_238 = arith.constant 0 : index
    %440 = vector.load %arg18[%c1_235, %c0_236, %c0_237, %c0_238] : memref<2x12x32x8xbf16, #tpu.memory_space<vmem>>, vector<1x12x32x8xbf16>
    %441 = vector.shape_cast %440 : vector<1x12x32x8xbf16> to vector<12x32x8xbf16>
    %c1_239 = arith.constant 1 : index
    %c0_240 = arith.constant 0 : index
    %c0_241 = arith.constant 0 : index
    %c0_242 = arith.constant 0 : index
    %442 = vector.load %arg19[%c1_239, %c0_240, %c0_241, %c0_242] : memref<2x12x1x8xf32, #tpu.memory_space<vmem>>, vector<1x12x1x8xf32>
    %443 = vector.shape_cast %442 : vector<1x12x1x8xf32> to vector<12x1x8xf32>
    %444 = vector.shape_cast %439 : vector<8x32xbf16> to vector<1x8x32xbf16>
    %445 = vector.shape_cast %444 : vector<1x8x32xbf16> to vector<1x8x32xbf16>
    %446 = vector.broadcast %445 : vector<1x8x32xbf16> to vector<12x8x32xbf16>
    "tpu.trace_start"() <{level = 10 : i32, message = "gsd,gdk->gsk"}> : () -> ()
    %cst_243 = arith.constant dense<0.000000e+00> : vector<12x8x8xf32>
    %447 = tpu.matmul %446, %441, %cst_243 {dimension_numbers = #tpu.dot_dimension_numbers<[2], [1], [1], [2], [0, 0, 0, 1, 1, 2], [0], [0]>} : vector<12x8x32xbf16>, vector<12x32x8xbf16>, vector<12x8x8xf32> -> vector<12x8x8xf32>
    "tpu.trace_stop"() : () -> ()
    %448 = vector.broadcast %443 : vector<12x1x8xf32> to vector<12x8x8xf32>
    %449 = arith.addf %447, %448 : vector<12x8x8xf32>
    %450 = vector.extract_strided_slice %449 {offsets = [0, 0, 0], sizes = [4, 8, 8], strides = [1, 1, 1]} : vector<12x8x8xf32> to vector<4x8x8xf32>
    %451 = vector.extract_strided_slice %449 {offsets = [4, 0, 0], sizes = [4, 8, 8], strides = [1, 1, 1]} : vector<12x8x8xf32> to vector<4x8x8xf32>
    %452 = vector.extract_strided_slice %449 {offsets = [8, 0, 0], sizes = [4, 8, 8], strides = [1, 1, 1]} : vector<12x8x8xf32> to vector<4x8x8xf32>
    %c1_244 = arith.constant 1 : index
    %c0_245 = arith.constant 0 : index
    %c0_246 = arith.constant 0 : index
    %c0_247 = arith.constant 0 : index
    %453 = vector.load %arg20[%c1_244, %c0_245, %c0_246, %c0_247] : memref<2x4x8x32xbf16, #tpu.memory_space<vmem>>, vector<1x4x8x32xbf16>
    %454 = vector.shape_cast %453 : vector<1x4x8x32xbf16> to vector<4x8x32xbf16>
    %c1_248 = arith.constant 1 : index
    %c0_249 = arith.constant 0 : index
    %c0_250 = arith.constant 0 : index
    %455 = vector.load %arg21[%c1_248, %c0_249, %c0_250] : memref<2x1x32xf32, #tpu.memory_space<vmem>>, vector<1x1x32xf32>
    %456 = vector.shape_cast %455 : vector<1x1x32xf32> to vector<1x32xf32>
    %cst_251 = arith.constant 0.353553385 : f32
    %457 = vector.broadcast %cst_251 : f32 to vector<4x8x8xf32>
    %458 = arith.mulf %450, %457 : vector<4x8x8xf32>
    %459 = arith.truncf %458 : vector<4x8x8xf32> to vector<4x8x8xbf16>
    %460 = arith.truncf %451 : vector<4x8x8xf32> to vector<4x8x8xbf16>
    "tpu.trace_start"() <{level = 10 : i32, message = "hqd,hkd->hqk"}> : () -> ()
    %cst_252 = arith.constant dense<0.000000e+00> : vector<4x8x8xf32>
    %461 = tpu.matmul %459, %460, %cst_252 {dimension_numbers = #tpu.dot_dimension_numbers<[2], [2], [1], [1], [0, 0, 0, 1, 1, 1], [0], [0]>} : vector<4x8x8xbf16>, vector<4x8x8xbf16>, vector<4x8x8xf32> -> vector<4x8x8xf32>
    "tpu.trace_stop"() : () -> ()
    %462 = vector.shape_cast %3 : vector<8x8xf32> to vector<1x8x8xf32>
    %463 = vector.broadcast %462 : vector<1x8x8xf32> to vector<4x8x8xf32>
    %464 = arith.addf %461, %463 : vector<4x8x8xf32>
    %cst_253 = arith.constant dense<0xFF800000> : vector<4x8xf32>
    %465 = vector.multi_reduction <maximumf>, %464, %cst_253 [2] : vector<4x8x8xf32> to vector<4x8xf32>
    %466 = vector.shape_cast %465 : vector<4x8xf32> to vector<4x8x1xf32>
    %467 = vector.broadcast %466 : vector<4x8x1xf32> to vector<4x8x8xf32>
    %468 = arith.subf %464, %467 : vector<4x8x8xf32>
    %469 = math.exp %468 : vector<4x8x8xf32>
    %cst_254 = arith.constant dense<0.000000e+00> : vector<4x8xf32>
    %470 = vector.multi_reduction <add>, %469, %cst_254 [2] : vector<4x8x8xf32> to vector<4x8xf32>
    %471 = vector.shape_cast %470 : vector<4x8xf32> to vector<4x8x1xf32>
    %472 = tpu.reciprocal %471 {approx = true} : vector<4x8x1xf32> -> vector<4x8x1xf32>
    %473 = vector.broadcast %472 : vector<4x8x1xf32> to vector<4x8x8xf32>
    %474 = arith.mulf %469, %473 : vector<4x8x8xf32>
    %475 = arith.truncf %474 : vector<4x8x8xf32> to vector<4x8x8xbf16>
    %476 = arith.truncf %452 : vector<4x8x8xf32> to vector<4x8x8xbf16>
    "tpu.trace_start"() <{level = 10 : i32, message = "hqk,hkd->hqd"}> : () -> ()
    %cst_255 = arith.constant dense<0.000000e+00> : vector<4x8x8xf32>
    %477 = tpu.matmul %475, %476, %cst_255 {dimension_numbers = #tpu.dot_dimension_numbers<[2], [1], [1], [2], [0, 0, 0, 1, 1, 2], [0], [0]>} : vector<4x8x8xbf16>, vector<4x8x8xbf16>, vector<4x8x8xf32> -> vector<4x8x8xf32>
    "tpu.trace_stop"() : () -> ()
    %478 = arith.truncf %477 : vector<4x8x8xf32> to vector<4x8x8xbf16>
    "tpu.trace_start"() <{level = 10 : i32, message = "hqd,hde->hqe"}> : () -> ()
    %cst_256 = arith.constant dense<0.000000e+00> : vector<4x8x32xf32>
    %479 = tpu.matmul %478, %454, %cst_256 {dimension_numbers = #tpu.dot_dimension_numbers<[2], [1], [1], [2], [0, 0, 0, 1, 1, 2], [0], [0]>} : vector<4x8x8xbf16>, vector<4x8x32xbf16>, vector<4x8x32xf32> -> vector<4x8x32xf32>
    "tpu.trace_stop"() : () -> ()
    %cst_257 = arith.constant dense<0.000000e+00> : vector<8x32xf32>
    %480 = vector.multi_reduction <add>, %479, %cst_257 [0] : vector<4x8x32xf32> to vector<8x32xf32>
    %481 = vector.broadcast %456 : vector<1x32xf32> to vector<8x32xf32>
    %482 = arith.addf %480, %481 : vector<8x32xf32>
    %483 = arith.addf %438, %482 : vector<8x32xf32>
    %c1_258 = arith.constant 1 : index
    %c0_259 = arith.constant 0 : index
    %c0_260 = arith.constant 0 : index
    %484 = vector.load %arg22[%c1_258, %c0_259, %c0_260] : memref<2x1x32xf32, #tpu.memory_space<vmem>>, vector<1x1x32xf32>
    %485 = vector.shape_cast %484 : vector<1x1x32xf32> to vector<1x32xf32>
    %c1_261 = arith.constant 1 : index
    %c0_262 = arith.constant 0 : index
    %c0_263 = arith.constant 0 : index
    %486 = vector.load %arg23[%c1_261, %c0_262, %c0_263] : memref<2x1x32xf32, #tpu.memory_space<vmem>>, vector<1x1x32xf32>
    %487 = vector.shape_cast %486 : vector<1x1x32xf32> to vector<1x32xf32>
    %cst_264 = arith.constant dense<0.000000e+00> : vector<8xf32>
    %488 = vector.multi_reduction <add>, %483, %cst_264 [1] : vector<8x32xf32> to vector<8xf32>
    %489 = vector.shape_cast %488 : vector<8xf32> to vector<8x1xf32>
    %cst_265 = arith.constant 3.200000e+01 : f32
    %490 = vector.broadcast %cst_265 : f32 to vector<8x1xf32>
    %491 = arith.divf %489, %490 : vector<8x1xf32>
    %492 = vector.broadcast %491 : vector<8x1xf32> to vector<8x32xf32>
    %493 = arith.subf %483, %492 : vector<8x32xf32>
    %494 = arith.mulf %493, %493 : vector<8x32xf32>
    %cst_266 = arith.constant dense<0.000000e+00> : vector<8xf32>
    %495 = vector.multi_reduction <add>, %494, %cst_266 [1] : vector<8x32xf32> to vector<8xf32>
    %496 = vector.shape_cast %495 : vector<8xf32> to vector<8x1xf32>
    %cst_267 = arith.constant 3.200000e+01 : f32
    %497 = vector.broadcast %cst_267 : f32 to vector<8x1xf32>
    %498 = arith.divf %496, %497 : vector<8x1xf32>
    %499 = vector.broadcast %491 : vector<8x1xf32> to vector<8x32xf32>
    %500 = arith.subf %483, %499 : vector<8x32xf32>
    %cst_268 = arith.constant 9.99999974E-6 : f32
    %501 = vector.broadcast %cst_268 : f32 to vector<8x1xf32>
    %502 = arith.addf %498, %501 : vector<8x1xf32>
    %503 = math.rsqrt %502 : vector<8x1xf32>
    %504 = vector.broadcast %503 : vector<8x1xf32> to vector<8x32xf32>
    %505 = arith.mulf %500, %504 : vector<8x32xf32>
    %506 = vector.broadcast %485 : vector<1x32xf32> to vector<8x32xf32>
    %507 = arith.mulf %505, %506 : vector<8x32xf32>
    %508 = vector.broadcast %487 : vector<1x32xf32> to vector<8x32xf32>
    %509 = arith.addf %507, %508 : vector<8x32xf32>
    %510 = arith.truncf %509 : vector<8x32xf32> to vector<8x32xbf16>
    %c1_269 = arith.constant 1 : index
    %c0_270 = arith.constant 0 : index
    %c0_271 = arith.constant 0 : index
    %c0_272 = arith.constant 0 : index
    %511 = vector.load %arg24[%c1_269, %c0_270, %c0_271, %c0_272] : memref<2x4x32x8xbf16, #tpu.memory_space<vmem>>, vector<1x4x32x8xbf16>
    %512 = vector.shape_cast %511 : vector<1x4x32x8xbf16> to vector<4x32x8xbf16>
    %c1_273 = arith.constant 1 : index
    %c0_274 = arith.constant 0 : index
    %c0_275 = arith.constant 0 : index
    %c0_276 = arith.constant 0 : index
    %513 = vector.load %arg25[%c1_273, %c0_274, %c0_275, %c0_276] : memref<2x4x1x8xf32, #tpu.memory_space<vmem>>, vector<1x4x1x8xf32>
    %514 = vector.shape_cast %513 : vector<1x4x1x8xf32> to vector<4x1x8xf32>
    %515 = vector.shape_cast %510 : vector<8x32xbf16> to vector<1x8x32xbf16>
    %516 = vector.shape_cast %515 : vector<1x8x32xbf16> to vector<1x8x32xbf16>
    %517 = vector.broadcast %516 : vector<1x8x32xbf16> to vector<4x8x32xbf16>
    "tpu.trace_start"() <{level = 10 : i32, message = "gsd,gdk->gsk"}> : () -> ()
    %cst_277 = arith.constant dense<0.000000e+00> : vector<4x8x8xf32>
    %518 = tpu.matmul %517, %512, %cst_277 {dimension_numbers = #tpu.dot_dimension_numbers<[2], [1], [1], [2], [0, 0, 0, 1, 1, 2], [0], [0]>} : vector<4x8x32xbf16>, vector<4x32x8xbf16>, vector<4x8x8xf32> -> vector<4x8x8xf32>
    "tpu.trace_stop"() : () -> ()
    %519 = vector.broadcast %514 : vector<4x1x8xf32> to vector<4x8x8xf32>
    %520 = arith.addf %518, %519 : vector<4x8x8xf32>
    %c1_278 = arith.constant 1 : index
    %c0_279 = arith.constant 0 : index
    %c0_280 = arith.constant 0 : index
    %c0_281 = arith.constant 0 : index
    %521 = vector.load %arg26[%c1_278, %c0_279, %c0_280, %c0_281] : memref<2x8x32x8xbf16, #tpu.memory_space<vmem>>, vector<1x8x32x8xbf16>
    %522 = vector.shape_cast %521 : vector<1x8x32x8xbf16> to vector<8x32x8xbf16>
    "tpu.trace_start"() <{level = 10 : i32, message = "gsd,gdk->gsk"}> : () -> ()
    %cst_282 = arith.constant dense<0.000000e+00> : vector<8x8x8xf32>
    %523 = tpu.matmul %243, %522, %cst_282 {dimension_numbers = #tpu.dot_dimension_numbers<[2], [1], [1], [2], [0, 0, 0, 1, 1, 2], [0], [0]>} : vector<8x8x32xbf16>, vector<8x32x8xbf16>, vector<8x8x8xf32> -> vector<8x8x8xf32>
    "tpu.trace_stop"() : () -> ()
    %c1_283 = arith.constant 1 : index
    %c0_284 = arith.constant 0 : index
    %c0_285 = arith.constant 0 : index
    %c0_286 = arith.constant 0 : index
    %524 = vector.load %arg27[%c1_283, %c0_284, %c0_285, %c0_286] : memref<2x8x1x8xf32, #tpu.memory_space<vmem>>, vector<1x8x1x8xf32>
    %525 = vector.shape_cast %524 : vector<1x8x1x8xf32> to vector<8x1x8xf32>
    %526 = vector.broadcast %525 : vector<8x1x8xf32> to vector<8x8x8xf32>
    %527 = arith.addf %523, %526 : vector<8x8x8xf32>
    %528 = vector.extract_strided_slice %527 {offsets = [0, 0, 0], sizes = [4, 8, 8], strides = [1, 1, 1]} : vector<8x8x8xf32> to vector<4x8x8xf32>
    %529 = vector.extract_strided_slice %527 {offsets = [4, 0, 0], sizes = [4, 8, 8], strides = [1, 1, 1]} : vector<8x8x8xf32> to vector<4x8x8xf32>
    %c1_287 = arith.constant 1 : index
    %c0_288 = arith.constant 0 : index
    %c0_289 = arith.constant 0 : index
    %c0_290 = arith.constant 0 : index
    %530 = vector.load %arg28[%c1_287, %c0_288, %c0_289, %c0_290] : memref<2x4x8x32xbf16, #tpu.memory_space<vmem>>, vector<1x4x8x32xbf16>
    %531 = vector.shape_cast %530 : vector<1x4x8x32xbf16> to vector<4x8x32xbf16>
    %c1_291 = arith.constant 1 : index
    %c0_292 = arith.constant 0 : index
    %c0_293 = arith.constant 0 : index
    %532 = vector.load %arg29[%c1_291, %c0_292, %c0_293] : memref<2x1x32xf32, #tpu.memory_space<vmem>>, vector<1x1x32xf32>
    %533 = vector.shape_cast %532 : vector<1x1x32xf32> to vector<1x32xf32>
    %cst_294 = arith.constant 0.353553385 : f32
    %534 = vector.broadcast %cst_294 : f32 to vector<4x8x8xf32>
    %535 = arith.mulf %520, %534 : vector<4x8x8xf32>
    %536 = arith.truncf %535 : vector<4x8x8xf32> to vector<4x8x8xbf16>
    %537 = arith.truncf %528 : vector<4x8x8xf32> to vector<4x8x8xbf16>
    "tpu.trace_start"() <{level = 10 : i32, message = "hqd,hkd->hqk"}> : () -> ()
    %cst_295 = arith.constant dense<0.000000e+00> : vector<4x8x8xf32>
    %538 = tpu.matmul %536, %537, %cst_295 {dimension_numbers = #tpu.dot_dimension_numbers<[2], [2], [1], [1], [0, 0, 0, 1, 1, 1], [0], [0]>} : vector<4x8x8xbf16>, vector<4x8x8xbf16>, vector<4x8x8xf32> -> vector<4x8x8xf32>
    "tpu.trace_stop"() : () -> ()
    %539 = vector.shape_cast %5 : vector<8x8xf32> to vector<1x8x8xf32>
    %540 = vector.broadcast %539 : vector<1x8x8xf32> to vector<4x8x8xf32>
    %541 = arith.addf %538, %540 : vector<4x8x8xf32>
    %cst_296 = arith.constant dense<0xFF800000> : vector<4x8xf32>
    %542 = vector.multi_reduction <maximumf>, %541, %cst_296 [2] : vector<4x8x8xf32> to vector<4x8xf32>
    %543 = vector.shape_cast %542 : vector<4x8xf32> to vector<4x8x1xf32>
    %544 = vector.broadcast %543 : vector<4x8x1xf32> to vector<4x8x8xf32>
    %545 = arith.subf %541, %544 : vector<4x8x8xf32>
    %546 = math.exp %545 : vector<4x8x8xf32>
    %cst_297 = arith.constant dense<0.000000e+00> : vector<4x8xf32>
    %547 = vector.multi_reduction <add>, %546, %cst_297 [2] : vector<4x8x8xf32> to vector<4x8xf32>
    %548 = vector.shape_cast %547 : vector<4x8xf32> to vector<4x8x1xf32>
    %549 = tpu.reciprocal %548 {approx = true} : vector<4x8x1xf32> -> vector<4x8x1xf32>
    %550 = vector.broadcast %549 : vector<4x8x1xf32> to vector<4x8x8xf32>
    %551 = arith.mulf %546, %550 : vector<4x8x8xf32>
    %552 = arith.truncf %551 : vector<4x8x8xf32> to vector<4x8x8xbf16>
    %553 = arith.truncf %529 : vector<4x8x8xf32> to vector<4x8x8xbf16>
    "tpu.trace_start"() <{level = 10 : i32, message = "hqk,hkd->hqd"}> : () -> ()
    %cst_298 = arith.constant dense<0.000000e+00> : vector<4x8x8xf32>
    %554 = tpu.matmul %552, %553, %cst_298 {dimension_numbers = #tpu.dot_dimension_numbers<[2], [1], [1], [2], [0, 0, 0, 1, 1, 2], [0], [0]>} : vector<4x8x8xbf16>, vector<4x8x8xbf16>, vector<4x8x8xf32> -> vector<4x8x8xf32>
    "tpu.trace_stop"() : () -> ()
    %555 = arith.truncf %554 : vector<4x8x8xf32> to vector<4x8x8xbf16>
    "tpu.trace_start"() <{level = 10 : i32, message = "hqd,hde->hqe"}> : () -> ()
    %cst_299 = arith.constant dense<0.000000e+00> : vector<4x8x32xf32>
    %556 = tpu.matmul %555, %531, %cst_299 {dimension_numbers = #tpu.dot_dimension_numbers<[2], [1], [1], [2], [0, 0, 0, 1, 1, 2], [0], [0]>} : vector<4x8x8xbf16>, vector<4x8x32xbf16>, vector<4x8x32xf32> -> vector<4x8x32xf32>
    "tpu.trace_stop"() : () -> ()
    %cst_300 = arith.constant dense<0.000000e+00> : vector<8x32xf32>
    %557 = vector.multi_reduction <add>, %556, %cst_300 [0] : vector<4x8x32xf32> to vector<8x32xf32>
    %558 = vector.broadcast %533 : vector<1x32xf32> to vector<8x32xf32>
    %559 = arith.addf %557, %558 : vector<8x32xf32>
    %560 = arith.addf %509, %559 : vector<8x32xf32>
    %c1_301 = arith.constant 1 : index
    %c0_302 = arith.constant 0 : index
    %c0_303 = arith.constant 0 : index
    %561 = vector.load %arg30[%c1_301, %c0_302, %c0_303] : memref<2x1x32xf32, #tpu.memory_space<vmem>>, vector<1x1x32xf32>
    %562 = vector.shape_cast %561 : vector<1x1x32xf32> to vector<1x32xf32>
    %c1_304 = arith.constant 1 : index
    %c0_305 = arith.constant 0 : index
    %c0_306 = arith.constant 0 : index
    %563 = vector.load %arg31[%c1_304, %c0_305, %c0_306] : memref<2x1x32xf32, #tpu.memory_space<vmem>>, vector<1x1x32xf32>
    %564 = vector.shape_cast %563 : vector<1x1x32xf32> to vector<1x32xf32>
    %cst_307 = arith.constant dense<0.000000e+00> : vector<8xf32>
    %565 = vector.multi_reduction <add>, %560, %cst_307 [1] : vector<8x32xf32> to vector<8xf32>
    %566 = vector.shape_cast %565 : vector<8xf32> to vector<8x1xf32>
    %cst_308 = arith.constant 3.200000e+01 : f32
    %567 = vector.broadcast %cst_308 : f32 to vector<8x1xf32>
    %568 = arith.divf %566, %567 : vector<8x1xf32>
    %569 = vector.broadcast %568 : vector<8x1xf32> to vector<8x32xf32>
    %570 = arith.subf %560, %569 : vector<8x32xf32>
    %571 = arith.mulf %570, %570 : vector<8x32xf32>
    %cst_309 = arith.constant dense<0.000000e+00> : vector<8xf32>
    %572 = vector.multi_reduction <add>, %571, %cst_309 [1] : vector<8x32xf32> to vector<8xf32>
    %573 = vector.shape_cast %572 : vector<8xf32> to vector<8x1xf32>
    %cst_310 = arith.constant 3.200000e+01 : f32
    %574 = vector.broadcast %cst_310 : f32 to vector<8x1xf32>
    %575 = arith.divf %573, %574 : vector<8x1xf32>
    %576 = vector.broadcast %568 : vector<8x1xf32> to vector<8x32xf32>
    %577 = arith.subf %560, %576 : vector<8x32xf32>
    %cst_311 = arith.constant 9.99999974E-6 : f32
    %578 = vector.broadcast %cst_311 : f32 to vector<8x1xf32>
    %579 = arith.addf %575, %578 : vector<8x1xf32>
    %580 = math.rsqrt %579 : vector<8x1xf32>
    %581 = vector.broadcast %580 : vector<8x1xf32> to vector<8x32xf32>
    %582 = arith.mulf %577, %581 : vector<8x32xf32>
    %583 = vector.broadcast %562 : vector<1x32xf32> to vector<8x32xf32>
    %584 = arith.mulf %582, %583 : vector<8x32xf32>
    %585 = vector.broadcast %564 : vector<1x32xf32> to vector<8x32xf32>
    %586 = arith.addf %584, %585 : vector<8x32xf32>
    %587 = arith.truncf %586 : vector<8x32xf32> to vector<8x32xbf16>
    %c1_312 = arith.constant 1 : index
    %c0_313 = arith.constant 0 : index
    %c0_314 = arith.constant 0 : index
    %588 = vector.load %arg32[%c1_312, %c0_313, %c0_314] : memref<2x32x64xbf16, #tpu.memory_space<vmem>>, vector<1x32x64xbf16>
    %589 = vector.shape_cast %588 : vector<1x32x64xbf16> to vector<32x64xbf16>
    %c1_315 = arith.constant 1 : index
    %c0_316 = arith.constant 0 : index
    %c0_317 = arith.constant 0 : index
    %590 = vector.load %arg33[%c1_315, %c0_316, %c0_317] : memref<2x1x64xf32, #tpu.memory_space<vmem>>, vector<1x1x64xf32>
    %591 = vector.shape_cast %590 : vector<1x1x64xf32> to vector<1x64xf32>
    %c1_318 = arith.constant 1 : index
    %c0_319 = arith.constant 0 : index
    %c0_320 = arith.constant 0 : index
    %592 = vector.load %arg34[%c1_318, %c0_319, %c0_320] : memref<2x64x32xbf16, #tpu.memory_space<vmem>>, vector<1x64x32xbf16>
    %593 = vector.shape_cast %592 : vector<1x64x32xbf16> to vector<64x32xbf16>
    %c1_321 = arith.constant 1 : index
    %c0_322 = arith.constant 0 : index
    %c0_323 = arith.constant 0 : index
    %594 = vector.load %arg35[%c1_321, %c0_322, %c0_323] : memref<2x1x32xf32, #tpu.memory_space<vmem>>, vector<1x1x32xf32>
    %595 = vector.shape_cast %594 : vector<1x1x32xf32> to vector<1x32xf32>
    %cst_324 = arith.constant dense<0.000000e+00> : vector<8x64xf32>
    %596 = tpu.matmul %587, %589, %cst_324 {dimension_numbers = #tpu.dot_dimension_numbers<[1], [0], [0], [1], [0, 0, 1, 1], [], []>} : vector<8x32xbf16>, vector<32x64xbf16>, vector<8x64xf32> -> vector<8x64xf32>
    %597 = vector.broadcast %591 : vector<1x64xf32> to vector<8x64xf32>
    %598 = arith.addf %596, %597 : vector<8x64xf32>
    %cst_325 = arith.constant 0.000000e+00 : f32
    %599 = vector.broadcast %cst_325 : f32 to vector<8x64xf32>
    %600 = arith.maximumf %598, %599 : vector<8x64xf32>
    %601 = arith.truncf %600 : vector<8x64xf32> to vector<8x64xbf16>
    %cst_326 = arith.constant dense<0.000000e+00> : vector<8x32xf32>
    %602 = tpu.matmul %601, %593, %cst_326 {dimension_numbers = #tpu.dot_dimension_numbers<[1], [0], [0], [1], [0, 0, 1, 1], [], []>} : vector<8x64xbf16>, vector<64x32xbf16>, vector<8x32xf32> -> vector<8x32xf32>
    %603 = vector.broadcast %595 : vector<1x32xf32> to vector<8x32xf32>
    %604 = arith.addf %602, %603 : vector<8x32xf32>
    %605 = arith.addf %586, %604 : vector<8x32xf32>
    %c1_327 = arith.constant 1 : index
    %c0_328 = arith.constant 0 : index
    %c0_329 = arith.constant 0 : index
    %606 = vector.load %arg36[%c1_327, %c0_328, %c0_329] : memref<2x1x32xf32, #tpu.memory_space<vmem>>, vector<1x1x32xf32>
    %607 = vector.shape_cast %606 : vector<1x1x32xf32> to vector<1x32xf32>
    %c1_330 = arith.constant 1 : index
    %c0_331 = arith.constant 0 : index
    %c0_332 = arith.constant 0 : index
    %608 = vector.load %arg37[%c1_330, %c0_331, %c0_332] : memref<2x1x32xf32, #tpu.memory_space<vmem>>, vector<1x1x32xf32>
    %609 = vector.shape_cast %608 : vector<1x1x32xf32> to vector<1x32xf32>
    %cst_333 = arith.constant dense<0.000000e+00> : vector<8xf32>
    %610 = vector.multi_reduction <add>, %605, %cst_333 [1] : vector<8x32xf32> to vector<8xf32>
    %611 = vector.shape_cast %610 : vector<8xf32> to vector<8x1xf32>
    %cst_334 = arith.constant 3.200000e+01 : f32
    %612 = vector.broadcast %cst_334 : f32 to vector<8x1xf32>
    %613 = arith.divf %611, %612 : vector<8x1xf32>
    %614 = vector.broadcast %613 : vector<8x1xf32> to vector<8x32xf32>
    %615 = arith.subf %605, %614 : vector<8x32xf32>
    %616 = arith.mulf %615, %615 : vector<8x32xf32>
    %cst_335 = arith.constant dense<0.000000e+00> : vector<8xf32>
    %617 = vector.multi_reduction <add>, %616, %cst_335 [1] : vector<8x32xf32> to vector<8xf32>
    %618 = vector.shape_cast %617 : vector<8xf32> to vector<8x1xf32>
    %cst_336 = arith.constant 3.200000e+01 : f32
    %619 = vector.broadcast %cst_336 : f32 to vector<8x1xf32>
    %620 = arith.divf %618, %619 : vector<8x1xf32>
    %621 = vector.broadcast %613 : vector<8x1xf32> to vector<8x32xf32>
    %622 = arith.subf %605, %621 : vector<8x32xf32>
    %cst_337 = arith.constant 9.99999974E-6 : f32
    %623 = vector.broadcast %cst_337 : f32 to vector<8x1xf32>
    %624 = arith.addf %620, %623 : vector<8x1xf32>
    %625 = math.rsqrt %624 : vector<8x1xf32>
    %626 = vector.broadcast %625 : vector<8x1xf32> to vector<8x32xf32>
    %627 = arith.mulf %622, %626 : vector<8x32xf32>
    %628 = vector.broadcast %607 : vector<1x32xf32> to vector<8x32xf32>
    %629 = arith.mulf %627, %628 : vector<8x32xf32>
    %630 = vector.broadcast %609 : vector<1x32xf32> to vector<8x32xf32>
    %631 = arith.addf %629, %630 : vector<8x32xf32>
    %632 = arith.truncf %631 : vector<8x32xf32> to vector<8x32xbf16>
    %c0_338 = arith.constant 0 : index
    %c0_339 = arith.constant 0 : index
    %633 = vector.load %arg38[%c0_338, %c0_339] : memref<32x128xbf16, #tpu.memory_space<vmem>>, vector<32x128xbf16>
    %cst_340 = arith.constant dense<0.000000e+00> : vector<8x128xf32>
    %634 = tpu.matmul %632, %633, %cst_340 {dimension_numbers = #tpu.dot_dimension_numbers<[1], [0], [0], [1], [0, 0, 1, 1], [], []>} : vector<8x32xbf16>, vector<32x128xbf16>, vector<8x128xf32> -> vector<8x128xf32>
    %c0_341 = arith.constant 0 : index
    %c0_342 = arith.constant 0 : index
    %c0_343 = arith.constant 0 : index
    %635 = vector.load %arg39[%c0_341, %c0_342, %c0_343] : memref<1x8x128xf32, #tpu.memory_space<vmem>>, vector<1x8x128xf32>
    %636 = vector.shape_cast %635 : vector<1x8x128xf32> to vector<8x128xf32>
    %637 = vector.shape_cast %634 : vector<8x128xf32> to vector<1x8x128xf32>
    tpu.vector_store %arg39[%c0_341, %c0_342, %c0_343], %637 {strides = array<i32>} : memref<1x8x128xf32, #tpu.memory_space<vmem>>, vector<1x8x128xf32>,
    return
  }
  func.func @transform_0(%arg0: i32) -> (i32, i32, i32) {
    %c0_i32 = arith.constant 0 : i32
    %c0_i32_0 = arith.constant 0 : i32
    %c0_i32_1 = arith.constant 0 : i32
    return %arg0, %c0_i32, %c0_i32_0 : i32, i32, i32
  }
  func.func @transform_1(%arg0: i32) -> (i32, i32, i32) {
    %c0_i32 = arith.constant 0 : i32
    %c0_i32_0 = arith.constant 0 : i32
    %c0_i32_1 = arith.constant 0 : i32
    return %arg0, %c0_i32, %c0_i32_0 : i32, i32, i32
  }
  func.func @transform_2(%arg0: i32) -> (i32, i32, i32) {
    %c0_i32 = arith.constant 0 : i32
    %c0_i32_0 = arith.constant 0 : i32
    %c0_i32_1 = arith.constant 0 : i32
    return %arg0, %c0_i32, %c0_i32_0 : i32, i32, i32
  }
  func.func @transform_3(%arg0: i32) -> (i32, i32, i32) {
    %c0_i32 = arith.constant 0 : i32
    %c0_i32_0 = arith.constant 0 : i32
    %c0_i32_1 = arith.constant 0 : i32
    return %arg0, %c0_i32, %c0_i32_0 : i32, i32, i32
  }
  func.func @transform_4(%arg0: i32) -> (i32, i32, i32) {
    %c0_i32 = arith.constant 0 : i32
    %c0_i32_0 = arith.constant 0 : i32
    %c0_i32_1 = arith.constant 0 : i32
    return %arg0, %c0_i32, %c0_i32_0 : i32, i32, i32
  }
  func.func @transform_5(%arg0: i32) -> (i32, i32, i32, i32) {
    %c0_i32 = arith.constant 0 : i32
    %c0_i32_0 = arith.constant 0 : i32
    %c0_i32_1 = arith.constant 0 : i32
    %c0_i32_2 = arith.constant 0 : i32
    %c0_i32_3 = arith.constant 0 : i32
    return %c0_i32, %c0_i32_0, %c0_i32_1, %c0_i32_2 : i32, i32, i32, i32
  }
  func.func @transform_6(%arg0: i32) -> (i32, i32, i32, i32) {
    %c0_i32 = arith.constant 0 : i32
    %c0_i32_0 = arith.constant 0 : i32
    %c0_i32_1 = arith.constant 0 : i32
    %c0_i32_2 = arith.constant 0 : i32
    %c0_i32_3 = arith.constant 0 : i32
    return %c0_i32, %c0_i32_0, %c0_i32_1, %c0_i32_2 : i32, i32, i32, i32
  }
  func.func @transform_7(%arg0: i32) -> (i32, i32, i32, i32) {
    %c0_i32 = arith.constant 0 : i32
    %c0_i32_0 = arith.constant 0 : i32
    %c0_i32_1 = arith.constant 0 : i32
    %c0_i32_2 = arith.constant 0 : i32
    %c0_i32_3 = arith.constant 0 : i32
    return %c0_i32, %c0_i32_0, %c0_i32_1, %c0_i32_2 : i32, i32, i32, i32
  }
  func.func @transform_8(%arg0: i32) -> (i32, i32, i32) {
    %c0_i32 = arith.constant 0 : i32
    %c0_i32_0 = arith.constant 0 : i32
    %c0_i32_1 = arith.constant 0 : i32
    %c0_i32_2 = arith.constant 0 : i32
    return %c0_i32, %c0_i32_0, %c0_i32_1 : i32, i32, i32
  }
  func.func @transform_9(%arg0: i32) -> (i32, i32, i32) {
    %c0_i32 = arith.constant 0 : i32
    %c0_i32_0 = arith.constant 0 : i32
    %c0_i32_1 = arith.constant 0 : i32
    %c0_i32_2 = arith.constant 0 : i32
    return %c0_i32, %c0_i32_0, %c0_i32_1 : i32, i32, i32
  }
  func.func @transform_10(%arg0: i32) -> (i32, i32, i32) {
    %c0_i32 = arith.constant 0 : i32
    %c0_i32_0 = arith.constant 0 : i32
    %c0_i32_1 = arith.constant 0 : i32
    %c0_i32_2 = arith.constant 0 : i32
    return %c0_i32, %c0_i32_0, %c0_i32_1 : i32, i32, i32
  }
  func.func @transform_11(%arg0: i32) -> (i32, i32, i32) {
    %c0_i32 = arith.constant 0 : i32
    %c0_i32_0 = arith.constant 0 : i32
    %c0_i32_1 = arith.constant 0 : i32
    %c0_i32_2 = arith.constant 0 : i32
    return %c0_i32, %c0_i32_0, %c0_i32_1 : i32, i32, i32
  }
  func.func @transform_12(%arg0: i32) -> (i32, i32, i32) {
    %c0_i32 = arith.constant 0 : i32
    %c0_i32_0 = arith.constant 0 : i32
    %c0_i32_1 = arith.constant 0 : i32
    %c0_i32_2 = arith.constant 0 : i32
    return %c0_i32, %c0_i32_0, %c0_i32_1 : i32, i32, i32
  }
  func.func @transform_13(%arg0: i32) -> (i32, i32, i32) {
    %c0_i32 = arith.constant 0 : i32
    %c0_i32_0 = arith.constant 0 : i32
    %c0_i32_1 = arith.constant 0 : i32
    %c0_i32_2 = arith.constant 0 : i32
    return %c0_i32, %c0_i32_0, %c0_i32_1 : i32, i32, i32
  }
  func.func @transform_14(%arg0: i32) -> (i32, i32, i32) {
    %c0_i32 = arith.constant 0 : i32
    %c0_i32_0 = arith.constant 0 : i32
    %c0_i32_1 = arith.constant 0 : i32
    %c0_i32_2 = arith.constant 0 : i32
    return %c0_i32, %c0_i32_0, %c0_i32_1 : i32, i32, i32
  }
  func.func @transform_15(%arg0: i32) -> (i32, i32, i32) {
    %c0_i32 = arith.constant 0 : i32
    %c0_i32_0 = arith.constant 0 : i32
    %c0_i32_1 = arith.constant 0 : i32
    %c0_i32_2 = arith.constant 0 : i32
    return %c0_i32, %c0_i32_0, %c0_i32_1 : i32, i32, i32
  }
  func.func @transform_16(%arg0: i32) -> (i32, i32, i32) {
    %c0_i32 = arith.constant 0 : i32
    %c0_i32_0 = arith.constant 0 : i32
    %c0_i32_1 = arith.constant 0 : i32
    %c0_i32_2 = arith.constant 0 : i32
    return %c0_i32, %c0_i32_0, %c0_i32_1 : i32, i32, i32
  }
  func.func @transform_17(%arg0: i32) -> (i32, i32, i32, i32) {
    %c0_i32 = arith.constant 0 : i32
    %c0_i32_0 = arith.constant 0 : i32
    %c0_i32_1 = arith.constant 0 : i32
    %c0_i32_2 = arith.constant 0 : i32
    %c0_i32_3 = arith.constant 0 : i32
    return %c0_i32, %c0_i32_0, %c0_i32_1, %c0_i32_2 : i32, i32, i32, i32
  }
  func.func @transform_18(%arg0: i32) -> (i32, i32, i32, i32) {
    %c0_i32 = arith.constant 0 : i32
    %c0_i32_0 = arith.constant 0 : i32
    %c0_i32_1 = arith.constant 0 : i32
    %c0_i32_2 = arith.constant 0 : i32
    %c0_i32_3 = arith.constant 0 : i32
    return %c0_i32, %c0_i32_0, %c0_i32_1, %c0_i32_2 : i32, i32, i32, i32
  }
  func.func @transform_19(%arg0: i32) -> (i32, i32, i32, i32) {
    %c0_i32 = arith.constant 0 : i32
    %c0_i32_0 = arith.constant 0 : i32
    %c0_i32_1 = arith.constant 0 : i32
    %c0_i32_2 = arith.constant 0 : i32
    %c0_i32_3 = arith.constant 0 : i32
    return %c0_i32, %c0_i32_0, %c0_i32_1, %c0_i32_2 : i32, i32, i32, i32
  }
  func.func @transform_20(%arg0: i32) -> (i32, i32, i32) {
    %c0_i32 = arith.constant 0 : i32
    %c0_i32_0 = arith.constant 0 : i32
    %c0_i32_1 = arith.constant 0 : i32
    %c0_i32_2 = arith.constant 0 : i32
    return %c0_i32, %c0_i32_0, %c0_i32_1 : i32, i32, i32
  }
  func.func @transform_21(%arg0: i32) -> (i32, i32, i32) {
    %c0_i32 = arith.constant 0 : i32
    %c0_i32_0 = arith.constant 0 : i32
    %c0_i32_1 = arith.constant 0 : i32
    %c0_i32_2 = arith.constant 0 : i32
    return %c0_i32, %c0_i32_0, %c0_i32_1 : i32, i32, i32
  }
  func.func @transform_22(%arg0: i32) -> (i32, i32, i32) {
    %c0_i32 = arith.constant 0 : i32
    %c0_i32_0 = arith.constant 0 : i32
    %c0_i32_1 = arith.constant 0 : i32
    %c0_i32_2 = arith.constant 0 : i32
    return %c0_i32, %c0_i32_0, %c0_i32_1 : i32, i32, i32
  }
  func.func @transform_23(%arg0: i32) -> (i32, i32, i32, i32) {
    %c0_i32 = arith.constant 0 : i32
    %c0_i32_0 = arith.constant 0 : i32
    %c0_i32_1 = arith.constant 0 : i32
    %c0_i32_2 = arith.constant 0 : i32
    %c0_i32_3 = arith.constant 0 : i32
    return %c0_i32, %c0_i32_0, %c0_i32_1, %c0_i32_2 : i32, i32, i32, i32
  }
  func.func @transform_24(%arg0: i32) -> (i32, i32, i32, i32) {
    %c0_i32 = arith.constant 0 : i32
    %c0_i32_0 = arith.constant 0 : i32
    %c0_i32_1 = arith.constant 0 : i32
    %c0_i32_2 = arith.constant 0 : i32
    %c0_i32_3 = arith.constant 0 : i32
    return %c0_i32, %c0_i32_0, %c0_i32_1, %c0_i32_2 : i32, i32, i32, i32
  }
  func.func @transform_25(%arg0: i32) -> (i32, i32, i32, i32) {
    %c0_i32 = arith.constant 0 : i32
    %c0_i32_0 = arith.constant 0 : i32
    %c0_i32_1 = arith.constant 0 : i32
    %c0_i32_2 = arith.constant 0 : i32
    %c0_i32_3 = arith.constant 0 : i32
    return %c0_i32, %c0_i32_0, %c0_i32_1, %c0_i32_2 : i32, i32, i32, i32
  }
  func.func @transform_26(%arg0: i32) -> (i32, i32, i32, i32) {
    %c0_i32 = arith.constant 0 : i32
    %c0_i32_0 = arith.constant 0 : i32
    %c0_i32_1 = arith.constant 0 : i32
    %c0_i32_2 = arith.constant 0 : i32
    %c0_i32_3 = arith.constant 0 : i32
    return %c0_i32, %c0_i32_0, %c0_i32_1, %c0_i32_2 : i32, i32, i32, i32
  }
  func.func @transform_27(%arg0: i32) -> (i32, i32, i32, i32) {
    %c0_i32 = arith.constant 0 : i32
    %c0_i32_0 = arith.constant 0 : i32
    %c0_i32_1 = arith.constant 0 : i32
    %c0_i32_2 = arith.constant 0 : i32
    %c0_i32_3 = arith.constant 0 : i32
    return %c0_i32, %c0_i32_0, %c0_i32_1, %c0_i32_2 : i32, i32, i32, i32
  }
  func.func @transform_28(%arg0: i32) -> (i32, i32, i32) {
    %c0_i32 = arith.constant 0 : i32
    %c0_i32_0 = arith.constant 0 : i32
    %c0_i32_1 = arith.constant 0 : i32
    %c0_i32_2 = arith.constant 0 : i32
    return %c0_i32, %c0_i32_0, %c0_i32_1 : i32, i32, i32
  }
  func.func @transform_29(%arg0: i32) -> (i32, i32, i32) {
    %c0_i32 = arith.constant 0 : i32
    %c0_i32_0 = arith.constant 0 : i32
    %c0_i32_1 = arith.constant 0 : i32
    %c0_i32_2 = arith.constant 0 : i32
    return %c0_i32, %c0_i32_0, %c0_i32_1 : i32, i32, i32
  }
  func.func @transform_30(%arg0: i32) -> (i32, i32, i32) {
    %c0_i32 = arith.constant 0 : i32
    %c0_i32_0 = arith.constant 0 : i32
    %c0_i32_1 = arith.constant 0 : i32
    %c0_i32_2 = arith.constant 0 : i32
    return %c0_i32, %c0_i32_0, %c0_i32_1 : i32, i32, i32
  }
  func.func @transform_31(%arg0: i32) -> (i32, i32, i32) {
    %c0_i32 = arith.constant 0 : i32
    %c0_i32_0 = arith.constant 0 : i32
    %c0_i32_1 = arith.constant 0 : i32
    %c0_i32_2 = arith.constant 0 : i32
    return %c0_i32, %c0_i32_0, %c0_i32_1 : i32, i32, i32
  }
  func.func @transform_32(%arg0: i32) -> (i32, i32, i32) {
    %c0_i32 = arith.constant 0 : i32
    %c0_i32_0 = arith.constant 0 : i32
    %c0_i32_1 = arith.constant 0 : i32
    %c0_i32_2 = arith.constant 0 : i32
    return %c0_i32, %c0_i32_0, %c0_i32_1 : i32, i32, i32
  }
  func.func @transform_33(%arg0: i32) -> (i32, i32, i32) {
    %c0_i32 = arith.constant 0 : i32
    %c0_i32_0 = arith.constant 0 : i32
    %c0_i32_1 = arith.constant 0 : i32
    %c0_i32_2 = arith.constant 0 : i32
    return %c0_i32, %c0_i32_0, %c0_i32_1 : i32, i32, i32
  }
  func.func @transform_34(%arg0: i32) -> (i32, i32, i32) {
    %c0_i32 = arith.constant 0 : i32
    %c0_i32_0 = arith.constant 0 : i32
    %c0_i32_1 = arith.constant 0 : i32
    %c0_i32_2 = arith.constant 0 : i32
    return %c0_i32, %c0_i32_0, %c0_i32_1 : i32, i32, i32
  }
  func.func @transform_35(%arg0: i32) -> (i32, i32, i32) {
    %c0_i32 = arith.constant 0 : i32
    %c0_i32_0 = arith.constant 0 : i32
    %c0_i32_1 = arith.constant 0 : i32
    %c0_i32_2 = arith.constant 0 : i32
    return %c0_i32, %c0_i32_0, %c0_i32_1 : i32, i32, i32
  }
  func.func @transform_36(%arg0: i32) -> (i32, i32, i32) {
    %c0_i32 = arith.constant 0 : i32
    %c0_i32_0 = arith.constant 0 : i32
    %c0_i32_1 = arith.constant 0 : i32
    %c0_i32_2 = arith.constant 0 : i32
    return %c0_i32, %c0_i32_0, %c0_i32_1 : i32, i32, i32
  }
  func.func @transform_37(%arg0: i32) -> (i32, i32) {
    %c0_i32 = arith.constant 0 : i32
    %c0_i32_0 = arith.constant 0 : i32
    %c0_i32_1 = arith.constant 0 : i32
    return %c0_i32, %c0_i32_0 : i32, i32
  }
  func.func @transform_38(%arg0: i32) -> (i32, i32, i32) {
    %c0_i32 = arith.constant 0 : i32
    %c0_i32_0 = arith.constant 0 : i32
    %c0_i32_1 = arith.constant 0 : i32
    return %arg0, %c0_i32, %c0_i32_0 : i32, i32, i32
  }
}

</mosaic_0001>

<bundles_post_ra>
// kernel: _lambda_.1
= control target key start
LH: loop header
LB: loop body
LE: loop exit
PB: predicated region body
PF: predicated region fallthrough
CT: control target
= control target key end

     0   :  { %s8050_s6 = smov 1   ;;  %s8051_s10 = smov 2   ;;  %s9116_s0 = inlined_call_operand.smem [shape: u32[39], index: -1, kind: input, shape index: {}] }
   0x1   :  { %s8097_s5 = sld [smem:[%s9116_s0]]   ;;  %s8052_s14 = smov 3  }
   0x2   :  { %s8102_s9 = sld [smem:[%s9116_s0 + %s8050_s6]]   ;;  %s8053_s18 = smov 4  }
   0x3   :  { %s8107_s13 = sld [smem:[%s9116_s0 + %s8051_s10]]   ;;  %s8054_s22 = smov 5  }
   0x4   :  { %s8112_s17 = sld [smem:[%s9116_s0 + %s8052_s14]]   ;;  %s8055_s26 = smov 6  }
   0x5   :  { %s8117_s21 = sld [smem:[%s9116_s0 + %s8053_s18]]   ;;  %s8056_s30 = smov 7  }
   0x6   :  { %s8122_s25 = sld [smem:[%s9116_s0 + %s8054_s22]]   ;;  %s8057_s4 = smov 8  }
   0x7   :  { %9157 = sst [smem:[#allocation5_spill]] %s8097_s5  ;;  %s8058_s10 = smov 9  }
   0x8   :  { %9158 = sst [smem:[#allocation6_spill]] %s8102_s9  ;;  %s8059_s15 = smov 10  }
   0x9   :  { %9159 = sst [smem:[#allocation7_spill]] %s8107_s13  ;;  %s8060_s20 = smov 11  }
   0xa   :  { %9160 = sst [smem:[#allocation8_spill]] %s8112_s17  ;;  %s8062_s1 = smov 13  }
   0xb   :  { %9161 = sst [smem:[#allocation9_spill]] %s8117_s21  ;;  %s8063_s7 = smov 14  }
   0xc   :  { %9162 = sst [smem:[#allocation10_spill]] %s8122_s25  ;;  %s8065_s22 = smov 16  }
   0xd   :  { %s8127_s29 = sld [smem:[%s9116_s0 + %s8055_s26]]   ;;  %s8061_s26 = smov 12  }
   0xe   :  { %s8132_s3 = sld [smem:[%s9116_s0 + %s8056_s30]]   ;;  %s8066_s28 = smov 17  }
   0xf   :  { %s8137_s8 = sld [smem:[%s9116_s0 + %s8057_s4]]  }
  0x10   :  { %s8142_s14 = sld [smem:[%s9116_s0 + %s8058_s10]]  }
  0x11   :  { %s8147_s19 = sld [smem:[%s9116_s0 + %s8059_s15]]   ;;  %s8064_s15 = smov 15  }
  0x12   :  { %s8152_s24 = sld [smem:[%s9116_s0 + %s8060_s20]]  }
  0x13   :  { %9163 = sst [smem:[#allocation11_spill]] %s8127_s29 }
  0x14   :  { %9164 = sst [smem:[#allocation12_spill]] %s8132_s3 }
  0x15   :  { %9165 = sst [smem:[#allocation13_spill]] %s8137_s8 }
  0x16   :  { %9166 = sst [smem:[#allocation14_spill]] %s8142_s14 }
  0x17   :  { %9167 = sst [smem:[#allocation15_spill]] %s8147_s19 }
  0x18   :  { %9168 = sst [smem:[#allocation16_spill]] %s8152_s24 }
  0x19   :  { %s8157_s30 = sld [smem:[%s9116_s0 + %s8061_s26]]  }
  0x1a   :  { %s8162_s6 = sld [smem:[%s9116_s0 + %s8062_s1]]  }
  0x1b   :  { %s8167_s12 = sld [smem:[%s9116_s0 + %s8063_s7]]   ;;  %s8067_s7 = smov 18  }
  0x1c   :  { %s8172_s20 = sld [smem:[%s9116_s0 + %s8064_s15]]   ;;  %s8068_s15 = smov 19  }
  0x1d   :  { %s8177_s27 = sld [smem:[%s9116_s0 + %s8065_s22]]   ;;  %s8069_s22 = smov 20  }
  0x1e   :  { %s8182_s4 = sld [smem:[%s9116_s0 + %s8066_s28]]   ;;  %s8070_s28 = smov 21  }
  0x1f   :  { %9169 = sst [smem:[#allocation17_spill]] %s8157_s30 }
  0x20   :  { %9170 = sst [smem:[#allocation18_spill]] %s8162_s6 }
  0x21   :  { %9171 = sst [smem:[#allocation19_spill]] %s8167_s12 }
  0x22   :  { %9172 = sst [smem:[#allocation20_spill]] %s8172_s20 }
  0x23   :  { %9173 = sst [smem:[#allocation21_spill]] %s8177_s27 }
  0x24   :  { %9174 = sst [smem:[#allocation22_spill]] %s8182_s4 }
  0x25   :  { %s8187_s21 = sld [smem:[%s9116_s0 + %s8067_s7]]   ;;  %s8071_s7 = smov 22  }
  0x26   :  { %s8192_s17 = sld [smem:[%s9116_s0 + %s8068_s15]]   ;;  %s8072_s15 = smov 23  }
  0x27   :  { %s8197_s9 = sld [smem:[%s9116_s0 + %s8069_s22]]   ;;  %s8073_s22 = smov 24  }
  0x28   :  { %s8202_s4 = sld [smem:[%s9116_s0 + %s8070_s28]]   ;;  %s8074_s28 = smov 25  }
  0x2b   :  { %9175 = sst [smem:[#allocation23_spill]] %s8187_s21 }
  0x2c   :  { %9176 = sst [smem:[#allocation24_spill]] %s8192_s17 }
  0x2d   :  { %9177 = sst [smem:[#allocation25_spill]] %s8197_s9 }
  0x2e   :  { %9178 = sst [smem:[#allocation26_spill]] %s8202_s4 }
  0x2f   :  { %s8207_s21 = sld [smem:[%s9116_s0 + %s8071_s7]]   ;;  %s8075_s7 = smov 26  }
  0x30   :  { %s8212_s17 = sld [smem:[%s9116_s0 + %s8072_s15]]   ;;  %s8076_s15 = smov 27  }
  0x31   :  { %s8217_s9 = sld [smem:[%s9116_s0 + %s8073_s22]]   ;;  %s8077_s22 = smov 28  }
  0x32   :  { %s8222_s4 = sld [smem:[%s9116_s0 + %s8074_s28]]   ;;  %s8078_s28 = smov 29  }
  0x35   :  { %9179 = sst [smem:[#allocation27_spill]] %s8207_s21 }
  0x36   :  { %9180 = sst [smem:[#allocation28_spill]] %s8212_s17 }
  0x37   :  { %9181 = sst [smem:[#allocation29_spill]] %s8217_s9 }
  0x38   :  { %9182 = sst [smem:[#allocation30_spill]] %s8222_s4 }
  0x39   :  { %s8227_s21 = sld [smem:[%s9116_s0 + %s8075_s7]]   ;;  %s8079_s7 = smov 30  }
  0x3a   :  { %s8232_s17 = sld [smem:[%s9116_s0 + %s8076_s15]]   ;;  %s8080_s15 = smov 31  }
  0x3b   :  { %s8237_s9 = sld [smem:[%s9116_s0 + %s8077_s22]]   ;;  %s8081_s22 = smov 32  }
  0x3c   :  { %s8242_s4 = sld [smem:[%s9116_s0 + %s8078_s28]]   ;;  %s8082_s28 = smov 33  }
  0x3f   :  { %9183 = sst [smem:[#allocation31_spill]] %s8227_s21 }
  0x40   :  { %9184 = sst [smem:[#allocation32_spill]] %s8232_s17 }
  0x41   :  { %9185 = sst [smem:[#allocation33_spill]] %s8237_s9 }
  0x42   :  { %9186 = sst [smem:[#allocation34_spill]] %s8242_s4 }
  0x43   :  { %s8247_s21 = sld [smem:[%s9116_s0 + %s8079_s7]]   ;;  %s8083_s7 = smov 34  }
  0x44   :  { %s8252_s17 = sld [smem:[%s9116_s0 + %s8080_s15]]   ;;  %s8084_s15 = smov 35  }
  0x45   :  { %s8257_s9 = sld [smem:[%s9116_s0 + %s8081_s22]]   ;;  %s8085_s22 = smov 36  }
  0x46   :  { %s8262_s4 = sld [smem:[%s9116_s0 + %s8082_s28]]   ;;  %s8086_s28 = smov 37  }
  0x49   :  { %9187 = sst [smem:[#allocation35_spill]] %s8247_s21 }
  0x4a   :  { %9188 = sst [smem:[#allocation36_spill]] %s8252_s17 }
  0x4b   :  { %9189 = sst [smem:[#allocation37_spill]] %s8257_s9 }
  0x4c   :  { %9190 = sst [smem:[#allocation38_spill]] %s8262_s4 }
  0x4d   :  { %s8267_s21 = sld [smem:[%s9116_s0 + %s8083_s7]]   ;;  %s8087_s7 = smov 38  }
  0x4e   :  { %s8272_s17 = sld [smem:[%s9116_s0 + %s8084_s15]]  }
  0x4f   :  { %s8277_s9 = sld [smem:[%s9116_s0 + %s8085_s22]]  }
  0x50   :  { %s8282_s4 = sld [smem:[%s9116_s0 + %s8086_s28]]  }
  0x53   :  { %9191 = sst [smem:[#allocation39_spill]] %s8267_s21 }
  0x54   :  { %s8287_s21 = sld [smem:[%s9116_s0 + %s8087_s7]]  }
  0x55   :  { %9192 = sst [smem:[#allocation40_spill]] %s8277_s9 }
  0x56   :  { %9193 = sst [smem:[#allocation41_spill]] %s8282_s4 }
  0x57   :  { %82 = vsyncpa [#allocation3], 0 }
  0x58   :  { %84 = vsyncpa [#allocation3 + $0x1], 0  ;;  %s8289_s15 = smov 0   ;;  %s8291_s16 = smov 0  }
  0x59   :  { %s8293_s18 = smov 0   ;;  %s8295_s22 = smov 0  }
  0x5a LB: > { %s9194_s9 = sld [smem:[#allocation40_spill]]  ;;  %s8310_s0 = sadd.s32 4294967295, %s8048_s22   ;;  %s8040_s16 = sphi %s8291_s16, %s9241_s16   ;;  %s8036_s15 = sphi %s8289_s15, %s9240_s15   ;;  %s8048_s22 = sphi %s8295_s22, %s9237_s22   ;;  %s8044_s18 = sphi %s8293_s18, %s9239_s18  }
  0x5b   : > { %s9195_s4 = sld [smem:[#allocation41_spill]]  ;;  %s6432_s23 = sadd.s32 4294967294, %s8048_s22  }
  0x5c   : > { %s9196_s30 = sld [smem:[#allocation17_spill]]  ;;  %s8314_s26 = sadd.s32 1, %s8048_s22  }
  0x5d   : > { %s9197_s29 = sld [smem:[#allocation11_spill]]  ;;  %s920_s28 = sadd.s32 1, %s8044_s18 }
  0x5e   : > { %s9198_s27 = sld [smem:[#allocation21_spill]]  ;;  %s917_s1 = ssub.s32 %s8048_s22, %s8314_s26 }
  0x5f   : > { %s9199_s25 = sld [smem:[#allocation10_spill]]  ;;  %p930_p0 = scmp.ne.s32.totalorder %s8044_s18, %s8040_s16 }
  0x60   : > { %s9200_s24 = sld [smem:[#allocation16_spill]]  ;;  %p918_p1 = scmp.eq.s32.totalorder %s917_s1, 0 }
  0x61   : > { %s9201_s20 = sld [smem:[#allocation20_spill]]  ;;  %p931_p2 = scmp.eq.s32.totalorder %s8310_s0, 1 }
  0x62   : > { %s9202_s19 = sld [smem:[#allocation15_spill]]  ;;  %p936_p3 = scmp.ne.s32.totalorder %s8040_s16, %s8036_s15 }
  0x63   : > { %s9203_s14 = sld [smem:[#allocation14_spill]]  ;;  %p937_p4 = scmp.eq.s32.totalorder %s6432_s23, 1 }
  0x64   : > { %s9204_s12 = sld [smem:[#allocation19_spill]]  ;;  %p8327_p5 = por %p931_p2, %p930_p0 }
  0x65   : > { %s9205_s8 = sld [smem:[#allocation13_spill]]  ;;  %p8331_p6 = por %p937_p4, %p936_p3 }
  0x66   : > { %s9206_s6 = sld [smem:[#allocation18_spill]]  ;;  %p6435_p7 = scmp.ge.s32.totalorder %s8048_s22, 1 }
  0x67   : > { %s9207_s3 = sld [smem:[#allocation12_spill]]  ;;  %p1089_p8 = scmp.lt.s32.totalorder %s8048_s22, 3 }
  0x68   : > { %9208 = sst [smem:[#allocation42_spill]] %s8044_s18 }
  0x69   : > { %9209 = sst [smem:[#allocation43_spill]] %s8314_s26  ;;  %p1090_p9 = pnand %p6435_p7, %p1089_p8 }
  0x6a   : > { %s8325_s2 = scalar_select %p918_p1, %s8044_s18, %s920_s28  }
  0x6b   : > { %1093 = sbr.rel (%p1090_p9) target bundleno = 8602 (0x219a), region = 172  ;;  %s9213_s5 = sld [smem:[#allocation5_spill]] (!%p1090_p9) }
  0x6c   : > { %9210 = sst [smem:[#allocation44_spill]] %s8325_s2  ;;  %p1198_p10 = scmp.lt.s32.totalorder (!%p1090_p9), %s8310_s0, 1 }
  0x6d   : > { %s9214_s13 = sld [smem:[#allocation7_spill]] (!%p1090_p9) }
  0x6e   : > { %s9234_s2 = sld [smem:[#allocation37_spill]] (!%p1090_p9) }
  0x6f   : > { %s9235_s18 = sld [smem:[#allocation39_spill]] (!%p1090_p9) }
  0x70   : > { %v7513_v0 = vld [vmem:[%s9199_s25 + $0x8] sm:$0xff]  ;;  %v7515_v1 = vld [vmem:[%s9199_s25 + $0x18] sm:$0xff]  ;;  %v7512_v4 = vld [vmem:[%s9199_s25] sm:$0xff]  ;;  %s1199_s11 = scalar_select %p1198_p10, %s8310_s0, 1  ;;  %vm1332_vm0 = vcmask 261120   ;;  %vm1641_vm1 = vcmask 64512  }
  0x71   : > { %v7517_v2 = vld [vmem:[%s9199_s25 + $0x28] sm:$0xff]  ;;  %v7519_v3 = vld [vmem:[%s9199_s25 + $0x38] sm:$0xff]  ;;  %1342 = vmatpush.bf16.msra.mxu0 %v7513_v0  ;;  %1367 = vmatpush.bf16.msra.mxu1 %v7515_v1  ;;  %v7514_v5 = vld [vmem:[%s9199_s25 + $0x10] sm:$0xff]  ;;  %vm1773_vm2 = vcmask 1043456   ;;  %vm2053_vm7 = vcmask 523264  }
  0x72   : > { %1392 = vmatpush.bf16.msra.mxu2 %v7517_v2  ;;  %1417 = vmatpush.bf16.msra.mxu3 %v7519_v3  ;;  %v7516_v6 = vld [vmem:[%s9199_s25 + $0x20] sm:$0xff]  ;;  %v7518_v7 = vld [vmem:[%s9199_s25 + $0x30] sm:$0xff]  ;;  %s8347_s23 = sshll.u32 %s1199_s11, 3  ;;  %v7521_v8 = vld [vmem:[%s9199_s25 + $0x48] sm:$0xff]  ;;  %s9215_s11 = sld [smem:[#allocation6_spill]] }
  0x73   : > { %v7523_v9 = vld [vmem:[%s9199_s25 + $0x58] sm:$0xff]  ;;  %s1201_s28 = scalar_lea.vmem %s9213_s5, %s8347_s23  ;;  %v7525_v10 = vld [vmem:[%s9199_s25 + $0x68] sm:$0xff]  ;;  %v7520_v13 = vld [vmem:[%s9199_s25 + $0x40] sm:$0xff]  ;;  %s1209_s1 = scalar_lea.vmem %s9214_s13, %s8347_s23 }
  0x74   : > { %v7527_v11 = vld [vmem:[%s9199_s25 + $0x78] sm:$0xff]  ;;  %v8355_v12 = vld [vmem:[%s1201_s28] sm:$0xff]  ;;  %v7522_v14 = vld [vmem:[%s9199_s25 + $0x50] sm:$0xff]  ;;  %s9216_s28 = sld [smem:[#allocation22_spill]] }
  0x75   : > { %1343 = vmatpush.bf16.msra.mxu0 %v7512_v4  ;;  %1368 = vmatpush.bf16.msra.mxu1 %v7514_v5  ;;  %v1223_v15 = vpack.c.bf16 %v8355_v12, %v8355_v12  ;;  %v7524_v16 = vld [vmem:[%s9199_s25 + $0x60] sm:$0xff]  ;;  %v7526_v17 = vld [vmem:[%s9199_s25 + $0x70] sm:$0xff]  ;;  %v7533_v18 = vld [vmem:[%s9199_s25 + $0xa8] sm:$0xff]  ;;  %s9220_s5 = sld [smem:[#allocation25_spill]]  ;;  %s9236_s26 = smov %s9235_s18 }
  0x76   : > { %1393 = vmatpush.bf16.msra.mxu2 %v7516_v6  ;;  %1418 = vmatpush.bf16.msra.mxu3 %v7518_v7  ;;  %v7529_v19 = vld [vmem:[%s9199_s25 + $0x88] sm:$0xff]  ;;  %v7531_v20 = vld [vmem:[%s9199_s25 + $0x98] sm:$0xff]  ;;  %v7532_v21 = vld [vmem:[%s9199_s25 + $0xa0] sm:$0xff]  ;;  %s9224_s13 = sld [smem:[#allocation27_spill]] }
  0x77   : > { %v7528_v22 = vld [vmem:[%s9199_s25 + $0x80] sm:$0xff]  ;;  %v7530_v23 = vld [vmem:[%s9199_s25 + $0x90] sm:$0xff]  ;;  %v7535_v24 = vld [vmem:[%s9199_s25 + $0xb8] sm:$0xff] }
  0x78   : > { %6450 = vmatmul.msk.bf16.vlgmr.msra.gmra.mxu0 %vm1332_vm0, %v1223_v15  ;;  %6459 = vmatmul.msk.bf16.vlgmr.msra.gmra.mxu1 %vm1332_vm0, %v1223_v15  ;;  %v7534_v25 = vld [vmem:[%s9199_s25 + $0xb0] sm:$0xff]  ;;  %v7761_v32 = vld [vmem:[%s9197_s29 + $0x1] ss:$0 sm:$0xff]  ;;  %v7764_v33 = vld [vmem:[%s9197_s29 + $0x4] ss:$0 sm:$0xff] }
  0x79   : > { %1442 = vmatpush.bf16.msrb.mxu0 %v7521_v8  ;;  %1467 = vmatpush.bf16.msrb.mxu1 %v7523_v9  ;;  %v7765_v34 = vld [vmem:[%s9197_s29 + $0x5] ss:$0 sm:$0xff]  ;;  %v7760_v37 = vld [vmem:[%s9197_s29] ss:$0 sm:$0xff]  ;;  %v7766_v46 = vld [vmem:[%s9197_s29 + $0x6] ss:$0 sm:$0xff] }
  0x7a   : > { %6468 = vmatmul.msk.bf16.vlgmr.msra.gmra.mxu2 %vm1332_vm0, %v1223_v15  ;;  %6477 = vmatmul.msk.bf16.vlgmr.msra.gmra.mxu3 %vm1332_vm0, %v1223_v15  ;;  %v7767_v47 = vld [vmem:[%s9197_s29 + $0x7] ss:$0 sm:$0xff]  ;;  %v7762_v51 = vld [vmem:[%s9197_s29 + $0x2] ss:$0 sm:$0xff]  ;;  %v7763_v52 = vld [vmem:[%s9197_s29 + $0x3] ss:$0 sm:$0xff] }
  0x7b   : > { %1492 = vmatpush.bf16.msrb.mxu2 %v7525_v10  ;;  %1517 = vmatpush.bf16.msrb.mxu3 %v7527_v11  ;;  %v7768_v10 = vld [vmem:[%s9197_s29 + $0x8] ss:$0 sm:$0xff]  ;;  %v7769_v11 = vld [vmem:[%s9197_s29 + $0x9] ss:$0 sm:$0xff] }
  0x7d   : > { %1443 = vmatpush.bf16.msrb.mxu0 %v7520_v13  ;;  %1468 = vmatpush.bf16.msrb.mxu1 %v7522_v14 }
  0x7f   : > { %1493 = vmatpush.bf16.msrb.mxu2 %v7524_v16  ;;  %1518 = vmatpush.bf16.msrb.mxu3 %v7526_v17  ;;  %v7770_v16 = vld [vmem:[%s9197_s29 + $0xa] ss:$0 sm:$0xff] }
  0x81   : > { %1542 = vmatpush.bf16.msra.mxu0 %v7529_v19  ;;  %1567 = vmatpush.bf16.msra.mxu1 %v7531_v20 }
  0x83   : > { %1592 = vmatpush.bf16.msra.mxu2 %v7533_v18  ;;  %1617 = vmatpush.bf16.msra.mxu3 %v7535_v24 }
  0x85   : > { %1543 = vmatpush.bf16.msra.mxu0 %v7528_v22  ;;  %1568 = vmatpush.bf16.msra.mxu1 %v7530_v23 }
  0x87   : > { %1593 = vmatpush.bf16.msra.mxu2 %v7532_v21  ;;  %1618 = vmatpush.bf16.msra.mxu3 %v7534_v25 }
  0x88   : > { %6486 = vmatmul.msk.bf16.vlgmr.msrb.gmra.mxu0 %vm1332_vm0, %v1223_v15  ;;  %6495 = vmatmul.msk.bf16.vlgmr.msrb.gmra.mxu1 %vm1332_vm0, %v1223_v15 }
  0x8a   : > { %6504 = vmatmul.msk.bf16.vlgmr.msrb.gmra.mxu2 %vm1332_vm0, %v1223_v15  ;;  %6513 = vmatmul.msk.bf16.vlgmr.msrb.gmra.mxu3 %vm1332_vm0, %v1223_v15 }
  0x98   : > { %6522 = vmatmul.msk.bf16.vlgmr.msra.gmra.mxu0 %vm1332_vm0, %v1223_v15  ;;  %6531 = vmatmul.msk.bf16.vlgmr.msra.gmra.mxu1 %vm1332_vm0, %v1223_v15 }
  0x9a   : > { %6540 = vmatmul.msk.bf16.vlgmr.msra.gmra.mxu2 %vm1332_vm0, %v1223_v15  ;;  %6549 = vmatmul.msk.bf16.vlgmr.msra.gmra.mxu3 %vm1332_vm0, %v1223_v15 }
  0xf5   : > { %v1345_v26 = vpop.f32.mrf.mxu0  ;;  %v1370_v27 = vpop.f32.mrf.mxu1 }
  0xf6   : > { %v1371_v40 = vadd.f32 %v7761_v32, %v1370_v27  ;;  %v1346_v45 = vadd.f32 %v7760_v37, %v1345_v26 }
  0xf8   : > { %v1630_v48 = vmul.f32 0.35355338, %v1371_v40  ;;  %v1629_v55 = vmul.f32 0.35355338, %v1346_v45 }
  0xfa   : > { %v1634_v60 = vpack.c.bf16 %v1630_v48, %v1630_v48  ;;  %v1633_v1 = vpack.c.bf16 %v1629_v55, %v1629_v55 }
  0xfd   : > { %v1395_v28 = vpop.f32.mrf.mxu2  ;;  %v1420_v29 = vpop.f32.mrf.mxu3 }
  0xfe   : > { %v1347_v30 = vpop.f32.mrf.mxu0  ;;  %v1372_v31 = vpop.f32.mrf.mxu1  ;;  %v1396_v61 = vadd.f32 %v7762_v51, %v1395_v28  ;;  %v1421_v62 = vadd.f32 %v7763_v52, %v1420_v29  ;;  %v7771_v28 = vld [vmem:[%s9197_s29 + $0xb] ss:$0 sm:$0xff] }
 0x100   : > { %v1631_v4 = vmul.f32 0.35355338, %v1396_v61  ;;  %v1632_v5 = vmul.f32 0.35355338, %v1421_v62 }
 0x102   : > { %v1635_v8 = vpack.c.bf16 %v1631_v4, %v1631_v4  ;;  %v1636_v9 = vpack.c.bf16 %v1632_v5, %v1632_v5 }
 0x105   : > { %v1397_v35 = vpop.f32.mrf.mxu2  ;;  %v1422_v36 = vpop.f32.mrf.mxu3 }
 0x106   : > { %v1445_v38 = vpop.f32.mrf.mxu0  ;;  %v1470_v39 = vpop.f32.mrf.mxu1  ;;  %v8409_v35 = vld [vmem:[%s1209_s1] sm:$0xff]  ;;  %s1205_s1 = scalar_lea.vmem %s9215_s11, %s8347_s23  ;;  %s9217_s11 = sld [smem:[#allocation23_spill]] }
 0x107   : > { %v1446_v41 = vadd.f32 %v7764_v33, %v1445_v38  ;;  %v1471_v42 = vadd.f32 %v7765_v34, %v1470_v39 }
 0x109   : > { %v1637_v43 = vpack.c.bf16 %v1446_v41, %v1446_v41  ;;  %v1638_v44 = vpack.c.bf16 %v1471_v42, %v1471_v42 }
 0x10b   : > { %v1646_v49 = vsel %vm1641_vm1, %v1637_v43, 0  ;;  %v1665_v50 = vsel %vm1641_vm1, %v1638_v44, 0 }
 0x10c   : > { %1655 = vmatpush.bf16.xpose.msrb.mxu0 %v1646_v49  ;;  %1674 = vmatpush.bf16.xpose.msrb.mxu1 %v1665_v50 }
 0x10d   : > { %v1495_v53 = vpop.f32.mrf.mxu2  ;;  %v1520_v54 = vpop.f32.mrf.mxu3 }
 0x10e   : > { %v1496_v56 = vadd.f32 %v7766_v46, %v1495_v53  ;;  %v1521_v57 = vadd.f32 %v7767_v47, %v1520_v54  ;;  %v1447_v58 = vpop.f32.mrf.mxu0  ;;  %v1472_v59 = vpop.f32.mrf.mxu1 }
 0x110   : > { %v1639_v63 = vpack.c.bf16 %v1496_v56, %v1496_v56  ;;  %v1640_v0 = vpack.c.bf16 %v1521_v57, %v1521_v57 }
 0x112   : > { %v1684_v2 = vsel %vm1641_vm1, %v1639_v63, 0  ;;  %v1703_v3 = vsel %vm1641_vm1, %v1640_v0, 0 }
 0x113   : > { %1693 = vmatpush.bf16.xpose.msrb.mxu2 %v1684_v2  ;;  %1712 = vmatpush.bf16.xpose.msrb.mxu3 %v1703_v3 }
 0x114   : > { %6550 = vmatmul.msk.bf16.vlgmr.msrb.gmra.mxu0 %vm1641_vm1, %v1633_v1  ;;  %6551 = vmatmul.msk.bf16.vlgmr.msrb.gmra.mxu1 %vm1641_vm1, %v1634_v60 }
 0x115   : > { %v1497_v6 = vpop.f32.mrf.mxu2  ;;  %v1522_v7 = vpop.f32.mrf.mxu3 }
 0x116   : > { %v1545_v13 = vpop.f32.mrf.mxu0  ;;  %v1570_v15 = vpop.f32.mrf.mxu1 }
 0x117   : > { %v1546_v14 = vadd.f32 %v7768_v10, %v1545_v13  ;;  %v1571_v17 = vadd.f32 %v7769_v11, %v1570_v15 }
 0x119   : > { %v1766_v18 = vpack.c.bf16 %v1546_v14, %v1546_v14  ;;  %v1767_v19 = vpack.c.bf16 %v1571_v17, %v1571_v17 }
 0x11a   : > { %6552 = vmatmul.msk.bf16.vlgmr.msrb.gmra.mxu2 %vm1641_vm1, %v1635_v8  ;;  %6553 = vmatmul.msk.bf16.vlgmr.msrb.gmra.mxu3 %vm1641_vm1, %v1636_v9 }
 0x11b   : > { %v1775_v21 = vsel %vm1773_vm2, %v1766_v18, 0  ;;  %v1794_v23 = vsel %vm1773_vm2, %v1767_v19, 0 }
 0x11c   : > { %1784 = vmatpush.bf16.msra.mxu0 %v1775_v21  ;;  %1803 = vmatpush.bf16.msra.mxu1 %v1794_v23 }
 0x11d   : > { %v1595_v20 = vpop.f32.mrf.mxu2  ;;  %v1620_v30 = vpop.f32.mrf.mxu3 }
 0x11e   : > { %v1596_v22 = vadd.f32 %v7770_v16, %v1595_v20  ;;  %v1547_v25 = vpop.f32.mrf.mxu0  ;;  %v1572_v27 = vpop.f32.mrf.mxu1  ;;  %v1621_v31 = vadd.f32 %v7771_v28, %v1620_v30 }
 0x11f   : > { %v1624_v25 = vld [vmem:[%s9207_s3] sm:$0xf]  ;;  %v1625_v27 = vld [vmem:[%s9207_s3 + $0x4] sm:$0xf] }
 0x120   : > { %v1768_v24 = vpack.c.bf16 %v1596_v22, %v1596_v22  ;;  %v1769_v32 = vpack.c.bf16 %v1621_v31, %v1621_v31  ;;  %v1874_v28 = vsel %vm1773_vm2, %v1625_v27, 0  ;;  %v1627_v31 = vld [vmem:[%s9207_s3 + $0xc] sm:$0xf] }
 0x121   : > { %1883 = vmatpush.bf16.msrb.mxu1 %v1874_v28  ;;  %v7774_v28 = vld [vmem:[%s9202_s19] ss:$0 sm:$0xff] }
 0x122   : > { %v1813_v26 = vsel %vm1773_vm2, %v1768_v24, 0  ;;  %v1832_v33 = vsel %vm1773_vm2, %v1769_v32, 0  ;;  %v1912_v32 = vsel %vm1773_vm2, %v1627_v31, 0 }
 0x123   : > { %1822 = vmatpush.bf16.msra.mxu2 %v1813_v26  ;;  %1841 = vmatpush.bf16.msra.mxu3 %v1832_v33  ;;  %v1855_v26 = vsel %vm1773_vm2, %v1624_v25, 0 }
 0x124   : > { %1864 = vmatpush.bf16.msrb.mxu0 %v1855_v26  ;;  %v7773_v26 = vld [vmem:[%s9203_s14] ss:$0 sm:$0xff] }
 0x125   : > { %v1597_v29 = vpop.f32.mrf.mxu2  ;;  %v1622_v34 = vpop.f32.mrf.mxu3 }
 0x126   : > { %v1626_v29 = vld [vmem:[%s9207_s3 + $0x8] sm:$0xf] }
 0x127   : > { %v1893_v30 = vsel %vm1773_vm2, %v1626_v29, 0  ;;  %1921 = vmatpush.bf16.msrb.mxu3 %v1912_v32 }
 0x128   : > { %1902 = vmatpush.bf16.msrb.mxu2 %v1893_v30 }
 0x191   : > { %v1657_v36 = vpop.f32.mrf.mxu0  ;;  %v1676_v37 = vpop.f32.mrf.mxu1 }
 0x192   : > { %v1658_v38 = vadd.f32 %v1657_v36, %v8409_v35  ;;  %v1677_v40 = vadd.f32 %v1676_v37, %v8409_v35 }
 0x194   : > { %v1718_v39 = vsel %vm1641_vm1, %v1658_v38, -inf  ;;  %v1721_v43 = vsel %vm1641_vm1, %v1677_v40, -inf }
 0x195   : > { %1719 = vmax.xlane.f32.xlu1 %v1718_v39 }
 0x199   : > { %v1659_v41 = vpop.f32.mrf.mxu0  ;;  %v1678_v42 = vpop.f32.mrf.mxu1 }
 0x19d   : > { %v1695_v44 = vpop.f32.mrf.mxu2  ;;  %v1714_v45 = vpop.f32.mrf.mxu3  ;;  %1722 = vmax.xlane.f32.xlu1 %v1721_v43 }
 0x19e   : > { %v1696_v46 = vadd.f32 %v1695_v44, %v8409_v35  ;;  %v1715_v48 = vadd.f32 %v1714_v45, %v8409_v35 }
 0x1a0   : > { %v1724_v47 = vsel %vm1641_vm1, %v1696_v46, -inf  ;;  %v1727_v51 = vsel %vm1641_vm1, %v1715_v48, -inf }
 0x1a1   : > { %1725 = vmax.xlane.f32.xlu0 %v1724_v47 }
 0x1a5   : > { %v1697_v49 = vpop.f32.mrf.mxu2  ;;  %v1716_v50 = vpop.f32.mrf.mxu3 }
 0x1a9   : > { %1728 = vmax.xlane.f32.xlu0 %v1727_v51 }
 0x208   : > { %v1720_v52 = vpop.xlane.xlu1 %1719 }
 0x209   : > { %v1730_v53 = vsub.f32 %v1658_v38, %v1720_v52 }
 0x20b   : > { %v1734_v54 = vmul.f32 1.442695, %v1730_v53 }
 0x20d   : > { %7866 = vpow2.f32 %v1734_v54 }
 0x210   : > { %v1723_v55 = vpop.xlane.xlu1 %1722 }
 0x211   : > { %v1731_v56 = vsub.f32 %v1677_v40, %v1723_v55 }
 0x213   : > { %v7867_v57 = vpop.eup %7866  ;;  %v1736_v58 = vmul.f32 1.442695, %v1731_v56 }
 0x214   : > { %v1726_v59 = vpop.xlane.xlu0 %1725  ;;  %v1742_v60 = vsel %vm1641_vm1, %v7867_v57, 0.0 }
 0x215   : > { %7868 = vpow2.f32 %v1736_v58  ;;  %v1732_v61 = vsub.f32 %v1696_v46, %v1726_v59  ;;  %1743 = vadd.xlane.f32.xlu0 %v1742_v60  ;;  %v7772_v58 = vld [vmem:[%s9205_s8] ss:$0 sm:$0xff] }
 0x217   : > { %v1738_v62 = vmul.f32 1.442695, %v1732_v61 }
 0x219   : > { %7870 = vpow2.f32 %v1738_v62 }
 0x21b   : > { %v7869_v63 = vpop.eup %7868 }
 0x21c   : > { %v1729_v0 = vpop.xlane.xlu0 %1728  ;;  %v1745_v1 = vsel %vm1641_vm1, %v7869_v63, 0.0 }
 0x21d   : > { %v1733_v2 = vsub.f32 %v1715_v48, %v1729_v0  ;;  %1746 = vadd.xlane.f32.xlu1 %v1745_v1  ;;  %v8088_v1 = vmov 32.0  }
 0x21f   : > { %v7871_v3 = vpop.eup %7870  ;;  %v1740_v4 = vmul.f32 1.442695, %v1733_v2 }
 0x220   : > { %v1748_v5 = vsel %vm1641_vm1, %v7871_v3, 0.0 }
 0x221   : > { %7872 = vpow2.f32 %v1740_v4  ;;  %1749 = vadd.xlane.f32.xlu2 %v1748_v5 }
 0x227   : > { %v7873_v6 = vpop.eup %7872 }
 0x228   : > { %v1751_v7 = vsel %vm1641_vm1, %v7873_v6, 0.0 }
 0x229   : > { %1752 = vadd.xlane.f32.xlu2 %v1751_v7 }
 0x288   : > { %v1744_v8 = vpop.xlane.xlu0 %1743 }
 0x289   : > { %7874 = vrcp.f32 %v1744_v8 }
 0x28f   : > { %v7875_v9 = vpop.eup %7874 }
 0x290   : > { %v1758_v10 = vmul.f32 %v7875_v9, %v7867_v57  ;;  %v1747_v11 = vpop.xlane.xlu1 %1746 }
 0x291   : > { %7876 = vrcp.f32 %v1747_v11 }
 0x292   : > { %v1762_v13 = vpack.c.bf16 %v1758_v10, %v1758_v10 }
 0x294   : > { %v1750_v14 = vpop.xlane.xlu2 %1749  ;;  %6554 = vmatmul.msk.bf16.vlgmr.msra.gmra.mxu0 %vm1641_vm1, %v1762_v13  ;;  %v7537_v13 = vld [vmem:[%s9200_s24 + $0x8] sm:$0xff] }
 0x295   : > { %7878 = vrcp.f32 %v1750_v14  ;;  %2017 = vmatpush.bf16.msra.mxu0 %v7537_v13  ;;  %v7536_v14 = vld [vmem:[%s9200_s24] sm:$0xff] }
 0x297   : > { %v7877_v15 = vpop.eup %7876 }
 0x298   : > { %v1759_v16 = vmul.f32 %v7877_v15, %v7869_v63  ;;  %v7541_v15 = vld [vmem:[%s9206_s6 + $0x18] sm:$0xff] }
 0x299   : > { %2018 = vmatpush.bf16.msra.mxu0 %v7536_v14 }
 0x29a   : > { %v1763_v17 = vpack.c.bf16 %v1759_v16, %v1759_v16 }
 0x29b   : > { %v7879_v18 = vpop.eup %7878 }
 0x29c   : > { %v1760_v19 = vmul.f32 %v7879_v18, %v7871_v3  ;;  %v1753_v20 = vpop.xlane.xlu2 %1752  ;;  %6555 = vmatmul.msk.bf16.vlgmr.msra.gmra.mxu1 %vm1641_vm1, %v1763_v17  ;;  %v7540_v18 = vld [vmem:[%s9206_s6 + $0x10] sm:$0xff] }
 0x29d   : > { %7880 = vrcp.f32 %v1753_v20  ;;  %2061 = vmatpush.bf16.msra.mxu1 %v7541_v15  ;;  %v7777_v15 = vld [vmem:[%s9201_s20] ss:$0 sm:$0xff] }
 0x29e   : > { %v1764_v21 = vpack.c.bf16 %v1760_v19, %v1760_v19  ;;  %7882 = vrcp.f32 %v8088_v1 }
 0x2a0   : > { %6556 = vmatmul.msk.bf16.vlgmr.msra.gmra.mxu2 %vm1641_vm1, %v1764_v21 }
 0x2a1   : > { %2062 = vmatpush.bf16.msra.mxu1 %v7540_v18 }
 0x2a3   : > { %v7881_v22 = vpop.eup %7880 }
 0x2a4   : > { %v1761_v23 = vmul.f32 %v7881_v22, %v7873_v6  ;;  %v7883_v2 = vpop.eup %7882 }
 0x2a5   : > { %v1945_v3 = vmul.f32 32.0, %v7883_v2  ;;  %vm1949_vm3 = vweird.f32 %v7883_v2 }
 0x2a6   : > { %v1765_v24 = vpack.c.bf16 %v1761_v23, %v1761_v23 }
 0x2a7   : > { %v1946_v4 = vsub.f32 1.0, %v1945_v3  ;;  %v7550_v3 = vld [vmem:[%s9199_s25 + $0x100] sm:$0xff] }
 0x2a8   : > { %6557 = vmatmul.msk.bf16.vlgmr.msra.gmra.mxu3 %vm1641_vm1, %v1765_v24 }
 0x2a9   : > { %v1947_v5 = vmul.f32 %v7883_v2, %v1946_v4  ;;  %v7552_v4 = vld [vmem:[%s9199_s25 + $0x110] sm:$0xff] }
 0x2ab   : > { %v1948_v6 = vadd.f32 %v7883_v2, %v1947_v5 }
 0x2ad   : > { %v8446_v7 = vsel %vm1949_vm3, %v7883_v2, %v1948_v6  ;;  %v7557_v2 = vld [vmem:[%s9199_s25 + $0x138] sm:$0xff]  ;;  %v7554_v6 = vld [vmem:[%s9199_s25 + $0x120] sm:$0xff] }
 0x311   : > { %v1786_v33 = vpop.f32.mrf.mxu0 }
 0x312   : > { %v1847_v34 = vpack.c.bf16 %v1786_v33, %v1786_v33  ;;  %v7539_v33 = vld [vmem:[%s9206_s6 + $0x8] sm:$0xff] }
 0x313   : > { %2063 = vmatpush.bf16.msra.mxu1 %v7539_v33 }
 0x314   : > { %6558 = vmatmul.msk.bf16.vlgmr.msrb.gmra.mxu0 %vm1641_vm1, %v1847_v34  ;;  %v7538_v34 = vld [vmem:[%s9206_s6] sm:$0xff] }
 0x317   : > { %2064 = vmatpush.bf16.msra.mxu1 %v7538_v34 }
 0x319   : > { %v1788_v36 = vpop.f32.mrf.mxu0  ;;  %v1805_v37 = vpop.f32.mrf.mxu1 }
 0x31a   : > { %v1848_v38 = vpack.c.bf16 %v1805_v37, %v1805_v37  ;;  %v7775_v36 = vld [vmem:[%s9196_s30] ss:$0 sm:$0xff] }
 0x31c   : > { %6559 = vmatmul.msk.bf16.vlgmr.msrb.gmra.mxu1 %vm1641_vm1, %v1848_v38 }
 0x321   : > { %v1807_v39 = vpop.f32.mrf.mxu1 }
 0x323   : > { %v1824_v40 = vpop.f32.mrf.mxu2 }
 0x324   : > { %v1849_v41 = vpack.c.bf16 %v1824_v40, %v1824_v40 }
 0x326   : > { %6560 = vmatmul.msk.bf16.vlgmr.msrb.gmra.mxu2 %vm1641_vm1, %v1849_v41 }
 0x32b   : > { %v1826_v42 = vpop.f32.mrf.mxu2  ;;  %v1843_v43 = vpop.f32.mrf.mxu3 }
 0x32c   : > { %v1850_v44 = vpack.c.bf16 %v1843_v43, %v1843_v43  ;;  %v7776_v42 = vld [vmem:[%s9204_s12] ss:$0 sm:$0xff] }
 0x32e   : > { %6561 = vmatmul.msk.bf16.vlgmr.msrb.gmra.mxu3 %vm1641_vm1, %v1850_v44 }
 0x333   : > { %v1845_v45 = vpop.f32.mrf.mxu3 }
 0x391   : > { %v1866_v46 = vpop.f32.mrf.mxu0 }
 0x392   : > { %v1927_v52 = vsel %vm1332_vm0, %v1866_v46, 0.0 }
 0x399   : > { %v1868_v47 = vpop.f32.mrf.mxu0  ;;  %v1885_v48 = vpop.f32.mrf.mxu1 }
 0x39a   : > { %v1928_v51 = vsel %vm1332_vm0, %v1885_v48, 0.0 }
 0x39b   : > { %v1929_v54 = vadd.f32 %v1928_v51, %v1927_v52 }
 0x3a1   : > { %v1887_v49 = vpop.f32.mrf.mxu1 }
 0x3a9   : > { %v1904_v50 = vpop.f32.mrf.mxu2 }
 0x3aa   : > { %v1930_v53 = vsel %vm1332_vm0, %v1904_v50, 0.0 }
 0x3ab   : > { %v1931_v55 = vadd.f32 %v1930_v53, %v1929_v54  ;;  %v7543_v53 = vld [vmem:[%s9199_s25 + $0xc8] sm:$0xff]  ;;  %v7545_v54 = vld [vmem:[%s9199_s25 + $0xd8] sm:$0xff] }
 0x3ac   : > { %2223 = vmatpush.bf16.msra.mxu2 %v7543_v53  ;;  %2248 = vmatpush.bf16.msra.mxu3 %v7545_v54  ;;  %v7781_v53 = vld [vmem:[%s9197_s29 + $0xc] ss:$0 sm:$0xff]  ;;  %v7782_v54 = vld [vmem:[%s9197_s29 + $0xd] ss:$0 sm:$0xff] }
 0x3b1   : > { %v1906_v56 = vpop.f32.mrf.mxu2  ;;  %v1923_v57 = vpop.f32.mrf.mxu3 }
 0x3b2   : > { %v1932_v59 = vsel %vm1332_vm0, %v1923_v57, 0.0  ;;  %v7549_v56 = vld [vmem:[%s9199_s25 + $0xf8] sm:$0xff]  ;;  %v7542_v57 = vld [vmem:[%s9199_s25 + $0xc0] sm:$0xff] }
 0x3b3   : > { %v1933_v60 = vadd.f32 %v1932_v59, %v1931_v55  ;;  %v7547_v55 = vld [vmem:[%s9199_s25 + $0xe8] sm:$0xff]  ;;  %2298 = vmatpush.bf16.msrb.mxu1 %v7549_v56  ;;  %v7546_v59 = vld [vmem:[%s9199_s25 + $0xe0] sm:$0xff]  ;;  %2224 = vmatpush.bf16.msra.mxu2 %v7542_v57 }
 0x3b4   : > { %2273 = vmatpush.bf16.msrb.mxu0 %v7547_v55 }
 0x3b5   : > { %v1937_v61 = vadd.f32 %v7772_v58, %v1933_v60  ;;  %v7544_v58 = vld [vmem:[%s9199_s25 + $0xd0] sm:$0xff] }
 0x3b6   : > { %v7548_v60 = vld [vmem:[%s9199_s25 + $0xf0] sm:$0xff]  ;;  %2249 = vmatpush.bf16.msra.mxu3 %v7544_v58 }
 0x3b7   : > { %v1938_v62 = vadd.f32 %v1937_v61, %v8355_v12  ;;  %2299 = vmatpush.bf16.msrb.mxu1 %v7548_v60 }
 0x3b8   : > { %2274 = vmatpush.bf16.msrb.mxu0 %v7546_v59 }
 0x3b9   : > { %v1925_v63 = vpop.f32.mrf.mxu3  ;;  %v1941_v0 = vsel %vm1332_vm0, %v1938_v62, 0.0 }
 0x3ba   : > { %1942 = vadd.xlane.f32.xlu2 %v1941_v0  ;;  %v7553_v63 = vld [vmem:[%s9199_s25 + $0x118] sm:$0xff]  ;;  %v7555_v0 = vld [vmem:[%s9199_s25 + $0x128] sm:$0xff] }
 0x3bb   : > { %2348 = vmatpush.bf16.msrb.mxu3 %v7553_v63 }
 0x3bf   : > { %2349 = vmatpush.bf16.msrb.mxu3 %v7552_v4 }
 0x42d   : > { %v1943_v8 = vpop.xlane.xlu2 %1942 }
 0x42e   : > { %v1951_v12 = vmul.f32 %v8446_v7, %v1943_v8  ;;  %v7556_v8 = vld [vmem:[%s9199_s25 + $0x130] sm:$0xff] }
 0x430   : > { %v1952_v9 = vsub.f32 %v1938_v62, %v1951_v12  ;;  %v7551_v62 = vld [vmem:[%s9199_s25 + $0x108] sm:$0xff] }
 0x431   : > { %2323 = vmatpush.bf16.msrb.mxu2 %v7551_v62 }
 0x432   : > { %v1953_v10 = vmul.f32 %v1952_v9, %v1952_v9 }
 0x434   : > { %v1954_v11 = vsel %vm1332_vm0, %v1953_v10, 0.0 }
 0x435   : > { %1955 = vadd.xlane.f32.xlu0 %v1954_v11  ;;  %2324 = vmatpush.bf16.msrb.mxu2 %v7550_v3 }
 0x4a8   : > { %v1956_v16 = vpop.xlane.xlu0 %1955 }
 0x4a9   : > { %v1957_v17 = vmul.f32 %v1956_v16, %v8446_v7 }
 0x4ab   : > { %v1958_v19 = vadd.f32 1e-05, %v1957_v17  ;;  %v7778_v17 = vld [vmem:[%s9198_s27] ss:$0 sm:$0xff] }
 0x4ad   : > { %7884 = vrsqrt.f32 %v1958_v19  ;;  %vm1965_vm5 = vweird.f32 %v1958_v19 }
 0x4b3   : > { %v7885_v20 = vpop.eup %7884 }
 0x4b4   : > { %v1960_v21 = vmul.f32 %v7885_v20, %v1958_v19  ;;  %vm1966_vm4 = vweird.f32 %v7885_v20 }
 0x4b5   : > { %vm1967_vm6 = vmor %vm1965_vm5, %vm1966_vm4 }
 0x4b6   : > { %v1961_v22 = vmul.f32 %v7885_v20, %v1960_v21 }
 0x4b8   : > { %v1962_v23 = vmul.f32 0.5, %v1961_v22  ;;  %v7559_v22 = vld [vmem:[%s9199_s25 + $0x148] sm:$0xff] }
 0x4ba   : > { %v1963_v24 = vsub.f32 1.5, %v1962_v23  ;;  %v7561_v23 = vld [vmem:[%s9199_s25 + $0x158] sm:$0xff] }
 0x4bc   : > { %v1964_v25 = vmul.f32 %v7885_v20, %v1963_v24  ;;  %v7563_v24 = vld [vmem:[%s9199_s25 + $0x168] sm:$0xff] }
 0x4be   : > { %v1968_v27 = vsel %vm1967_vm6, %v7885_v20, %v1964_v25  ;;  %v7565_v25 = vld [vmem:[%s9199_s25 + $0x178] sm:$0xff] }
 0x4bf   : > { %v1969_v29 = vmul.f32 %v1968_v27, %v1952_v9  ;;  %v7560_v27 = vld [vmem:[%s9199_s25 + $0x150] sm:$0xff] }
 0x4c1   : > { %v1973_v30 = vmul.f32 %v7773_v26, %v1969_v29  ;;  %v7558_v26 = vld [vmem:[%s9199_s25 + $0x140] sm:$0xff]  ;;  %v7564_v29 = vld [vmem:[%s9199_s25 + $0x170] sm:$0xff] }
 0x4c3   : > { %v1977_v31 = vadd.f32 %v7774_v28, %v1973_v30  ;;  %v7562_v28 = vld [vmem:[%s9199_s25 + $0x160] sm:$0xff]  ;;  %s9230_s25 = sld [smem:[#allocation36_spill]] }
 0x4c5   : > { %v1978_v32 = vpack.c.bf16 %v1977_v31, %v1977_v31 }
 0x4c7   : > { %6570 = vmatmul.msk.bf16.vlgmr.msra.gmra.mxu0 %vm1332_vm0, %v1978_v32 }
 0x4c8   : > { %2373 = vmatpush.bf16.msra.mxu0 %v7555_v0 }
 0x4cc   : > { %2374 = vmatpush.bf16.msra.mxu0 %v7554_v6 }
 0x544   : > { %v2020_v37 = vpop.f32.mrf.mxu0 }
 0x545   : > { %v2021_v38 = vadd.f32 %v7775_v36, %v2020_v37 }
 0x547   : > { %v2024_v39 = vmax.f32 %v2021_v38, 0.0 }
 0x549   : > { %v2025_v40 = vpack.c.bf16 %v2024_v39, %v2024_v39  ;;  %v7783_v39 = vld [vmem:[%s9197_s29 + $0x12] ss:$0 sm:$0xff] }
 0x54b   : > { %6587 = vmatmul.msk.bf16.vlgmr.msra.gmra.mxu1 %vm2053_vm7, %v2025_v40  ;;  %v7784_v40 = vld [vmem:[%s9197_s29 + $0x13] ss:$0 sm:$0xff] }
 0x54c   : > { %v2022_v41 = vpop.f32.mrf.mxu0  ;;  %2398 = vmatpush.bf16.msra.mxu1 %v7557_v2 }
 0x54d   : > { %v7779_v41 = vld [vmem:[%s9197_s29 + $0xe] ss:$0 sm:$0xff] }
 0x550   : > { %2399 = vmatpush.bf16.msra.mxu1 %v7556_v8 }
 0x5c8   : > { %v2066_v43 = vpop.f32.mrf.mxu1 }
 0x5c9   : > { %v2067_v44 = vadd.f32 %v7776_v42, %v2066_v43  ;;  %v7780_v42 = vld [vmem:[%s9197_s29 + $0xf] ss:$0 sm:$0xff] }
 0x5cb   : > { %v2070_v45 = vadd.f32 %v2067_v44, %v1977_v31 }
 0x5cd   : > { %v2073_v46 = vsel %vm1332_vm0, %v2070_v45, 0.0 }
 0x5ce   : > { %2074 = vadd.xlane.f32.xlu1 %v2073_v46 }
 0x5d0   : > { %v2068_v47 = vpop.f32.mrf.mxu1 }
 0x5d1   : > { %v7785_v47 = vld [vmem:[%s9197_s29 + $0x10] ss:$0 sm:$0xff] }
 0x641   : > { %v2075_v48 = vpop.xlane.xlu1 %2074 }
 0x642   : > { %v2076_v49 = vmul.f32 %v2075_v48, %v8446_v7  ;;  %v7786_v48 = vld [vmem:[%s9197_s29 + $0x11] ss:$0 sm:$0xff] }
 0x644   : > { %v2077_v50 = vsub.f32 %v2070_v45, %v2076_v49 }
 0x646   : > { %v2078_v51 = vmul.f32 %v2077_v50, %v2077_v50 }
 0x648   : > { %v2079_v52 = vsel %vm1332_vm0, %v2078_v51, 0.0 }
 0x649   : > { %2080 = vadd.xlane.f32.xlu2 %v2079_v52 }
 0x6bc   : > { %v2081_v61 = vpop.xlane.xlu2 %2080 }
 0x6bd   : > { %v2082_v1 = vmul.f32 %v2081_v61, %v8446_v7 }
 0x6bf   : > { %v2083_v5 = vadd.f32 1e-05, %v2082_v1 }
 0x6c1   : > { %7886 = vrsqrt.f32 %v2083_v5  ;;  %vm2090_vm9 = vweird.f32 %v2083_v5 }
 0x6c7   : > { %v7887_v12 = vpop.eup %7886 }
 0x6c8   : > { %v2085_v9 = vmul.f32 %v7887_v12, %v2083_v5  ;;  %vm2091_vm8 = vweird.f32 %v7887_v12 }
 0x6c9   : > { %vm2092_vm10 = vmor %vm2090_vm9, %vm2091_vm8 }
 0x6ca   : > { %v2086_v10 = vmul.f32 %v7887_v12, %v2085_v9 }
 0x6cc   : > { %v2087_v11 = vmul.f32 0.5, %v2086_v10 }
 0x6ce   : > { %v2088_v13 = vsub.f32 1.5, %v2087_v11 }
 0x6d0   : > { %v2089_v14 = vmul.f32 %v7887_v12, %v2088_v13 }
 0x6d2   : > { %v2093_v16 = vsel %vm2092_vm10, %v7887_v12, %v2089_v14  ;;  %v7787_v14 = vld [vmem:[%s9197_s29 + $0x16] ss:$0 sm:$0xff] }
 0x6d3   : > { %v2094_v18 = vmul.f32 %v2093_v16, %v2077_v50 }
 0x6d5   : > { %v2098_v19 = vmul.f32 %v7777_v15, %v2094_v18  ;;  %v7788_v15 = vld [vmem:[%s9197_s29 + $0x17] ss:$0 sm:$0xff] }
 0x6d7   : > { %v8485_v20 = vadd.f32 %v7778_v17, %v2098_v19 }
 0x6d9   : > { %v2103_v21 = vpack.c.bf16 %v8485_v20, %v8485_v20 }
 0x6db   : > { %6656 = vmatmul.msk.bf16.vlgmr.msra.gmra.mxu2 %vm1332_vm0, %v2103_v21  ;;  %6665 = vmatmul.msk.bf16.vlgmr.msra.gmra.mxu3 %vm1332_vm0, %v2103_v21 }
 0x6dc   : > { %6674 = vmatmul.msk.bf16.vlgmr.msrb.gmra.mxu0 %vm1332_vm0, %v2103_v21  ;;  %6683 = vmatmul.msk.bf16.vlgmr.msrb.gmra.mxu1 %vm1332_vm0, %v2103_v21 }
 0x6dd   : > { %2423 = vmatpush.bf16.msra.mxu2 %v7559_v22  ;;  %2448 = vmatpush.bf16.msra.mxu3 %v7561_v23  ;;  %v7789_v23 = vld [vmem:[%s9197_s29 + $0x14] ss:$0 sm:$0xff] }
 0x6de   : > { %2473 = vmatpush.bf16.msrb.mxu0 %v7563_v24  ;;  %2498 = vmatpush.bf16.msrb.mxu1 %v7565_v25  ;;  %v7790_v24 = vld [vmem:[%s9197_s29 + $0x15] ss:$0 sm:$0xff]  ;;  %s9232_s29 = sld [smem:[#allocation34_spill]] }
 0x6e1   : > { %2424 = vmatpush.bf16.msra.mxu2 %v7558_v26  ;;  %2449 = vmatpush.bf16.msra.mxu3 %v7560_v27 }
 0x6e2   : > { %2474 = vmatpush.bf16.msrb.mxu0 %v7562_v28  ;;  %2499 = vmatpush.bf16.msrb.mxu1 %v7564_v29 }
 0x6eb   : > { %6692 = vmatmul.msk.bf16.vlgmr.msrb.gmra.mxu2 %vm1332_vm0, %v2103_v21  ;;  %6701 = vmatmul.msk.bf16.vlgmr.msrb.gmra.mxu3 %vm1332_vm0, %v2103_v21 }
 0x6ec   : > { %6710 = vmatmul.msk.bf16.vlgmr.msra.gmra.mxu0 %vm1332_vm0, %v2103_v21  ;;  %6719 = vmatmul.msk.bf16.vlgmr.msra.gmra.mxu1 %vm1332_vm0, %v2103_v21 }
 0x6fb   : > { %6728 = vmatmul.msk.bf16.vlgmr.msra.gmra.mxu2 %vm1332_vm0, %v2103_v21  ;;  %6737 = vmatmul.msk.bf16.vlgmr.msra.gmra.mxu3 %vm1332_vm0, %v2103_v21 }
 0x6fc   : > { %6746 = vmatmul.msk.bf16.vlgmr.msrb.gmra.mxu0 %vm1332_vm0, %v2103_v21  ;;  %6755 = vmatmul.msk.bf16.vlgmr.msrb.gmra.mxu1 %vm1332_vm0, %v2103_v21 }
 0x759   : > { %v2276_v30 = vpop.f32.mrf.mxu0  ;;  %v2301_v31 = vpop.f32.mrf.mxu1 }
 0x75a   : > { %v2277_v49 = vadd.f32 %v7779_v41, %v2276_v30  ;;  %v2302_v50 = vadd.f32 %v7780_v42, %v2301_v31 }
 0x75c   : > { %v2514_v61 = vmul.f32 0.35355338, %v2277_v49  ;;  %v2515_v62 = vmul.f32 0.35355338, %v2302_v50 }
 0x75e   : > { %v2226_v32 = vpop.f32.mrf.mxu2  ;;  %v2251_v33 = vpop.f32.mrf.mxu3  ;;  %v2518_v8 = vpack.c.bf16 %v2514_v61, %v2514_v61  ;;  %v2519_v12 = vpack.c.bf16 %v2515_v62, %v2515_v62 }
 0x75f   : > { %v2227_v63 = vadd.f32 %v7781_v53, %v2226_v32  ;;  %v2252_v0 = vadd.f32 %v7782_v54, %v2251_v33 }
 0x761   : > { %v2278_v34 = vpop.f32.mrf.mxu0  ;;  %v2303_v36 = vpop.f32.mrf.mxu1  ;;  %v2512_v9 = vmul.f32 0.35355338, %v2227_v63  ;;  %v2513_v10 = vmul.f32 0.35355338, %v2252_v0 }
 0x763   : > { %v2516_v16 = vpack.c.bf16 %v2512_v9, %v2512_v9  ;;  %v2517_v17 = vpack.c.bf16 %v2513_v10, %v2513_v10 }
 0x766   : > { %v2228_v37 = vpop.f32.mrf.mxu2  ;;  %v2253_v38 = vpop.f32.mrf.mxu3 }
 0x769   : > { %v2376_v43 = vpop.f32.mrf.mxu0  ;;  %v2401_v44 = vpop.f32.mrf.mxu1 }
 0x76a   : > { %v2377_v45 = vadd.f32 %v7783_v39, %v2376_v43  ;;  %v2402_v46 = vadd.f32 %v7784_v40, %v2401_v44 }
 0x76c   : > { %v2522_v51 = vpack.c.bf16 %v2377_v45, %v2377_v45  ;;  %v2523_v52 = vpack.c.bf16 %v2402_v46, %v2402_v46 }
 0x76e   : > { %v2566_v55 = vsel %vm1641_vm1, %v2522_v51, 0  ;;  %v2585_v56 = vsel %vm1641_vm1, %v2523_v52, 0  ;;  %v2326_v57 = vpop.f32.mrf.mxu2  ;;  %v2351_v58 = vpop.f32.mrf.mxu3 }
 0x76f   : > { %v2327_v59 = vadd.f32 %v7785_v47, %v2326_v57  ;;  %v2352_v60 = vadd.f32 %v7786_v48, %v2351_v58  ;;  %2575 = vmatpush.bf16.xpose.msra.mxu0 %v2566_v55  ;;  %2594 = vmatpush.bf16.xpose.msra.mxu1 %v2585_v56 }
 0x771   : > { %v2520_v1 = vpack.c.bf16 %v2327_v59, %v2327_v59  ;;  %v2521_v2 = vpack.c.bf16 %v2352_v60, %v2352_v60  ;;  %v2378_v3 = vpop.f32.mrf.mxu0  ;;  %v2403_v4 = vpop.f32.mrf.mxu1 }
 0x773   : > { %v2528_v5 = vsel %vm1641_vm1, %v2520_v1, 0  ;;  %v2547_v6 = vsel %vm1641_vm1, %v2521_v2, 0 }
 0x774   : > { %2537 = vmatpush.bf16.xpose.msrb.mxu2 %v2528_v5  ;;  %2556 = vmatpush.bf16.xpose.msrb.mxu3 %v2547_v6 }
 0x776   : > { %6763 = vmatmul.msk.bf16.vlgmr.msra.gmra.mxu0 %vm1641_vm1, %v2518_v8  ;;  %6764 = vmatmul.msk.bf16.vlgmr.msra.gmra.mxu1 %vm1641_vm1, %v2519_v12  ;;  %v2328_v11 = vpop.f32.mrf.mxu2  ;;  %v2353_v13 = vpop.f32.mrf.mxu3 }
 0x779   : > { %v2476_v18 = vpop.f32.mrf.mxu0  ;;  %v2501_v19 = vpop.f32.mrf.mxu1 }
 0x77a   : > { %v2477_v21 = vadd.f32 %v7787_v14, %v2476_v18  ;;  %v2502_v22 = vadd.f32 %v7788_v15, %v2501_v19 }
 0x77b   : > { %6761 = vmatmul.msk.bf16.vlgmr.msrb.gmra.mxu2 %vm1641_vm1, %v2516_v16  ;;  %6762 = vmatmul.msk.bf16.vlgmr.msrb.gmra.mxu3 %vm1641_vm1, %v2517_v17 }
 0x77c   : > { %v2650_v25 = vpack.c.bf16 %v2477_v21, %v2477_v21  ;;  %v2651_v26 = vpack.c.bf16 %v2502_v22, %v2502_v22 }
 0x77e   : > { %v2694_v27 = vsel %vm1773_vm2, %v2650_v25, 0  ;;  %v2713_v28 = vsel %vm1773_vm2, %v2651_v26, 0  ;;  %v2426_v29 = vpop.f32.mrf.mxu2  ;;  %v2451_v30 = vpop.f32.mrf.mxu3 }
 0x77f   : > { %v2427_v31 = vadd.f32 %v7789_v23, %v2426_v29  ;;  %v2452_v32 = vadd.f32 %v7790_v24, %v2451_v30  ;;  %2703 = vmatpush.bf16.msrb.mxu0 %v2694_v27  ;;  %2722 = vmatpush.bf16.msrb.mxu1 %v2713_v28 }
 0x781   : > { %v2648_v33 = vpack.c.bf16 %v2427_v31, %v2427_v31  ;;  %v2649_v34 = vpack.c.bf16 %v2452_v32, %v2452_v32  ;;  %v2478_v36 = vpop.f32.mrf.mxu0  ;;  %v2503_v37 = vpop.f32.mrf.mxu1  ;;  %v6758_v31 = vld [vmem:[%s9207_s3 + $0x18] sm:$0xf] }
 0x782   : > { %v2774_v32 = vsel %vm1773_vm2, %v6758_v31, 0 }
 0x783   : > { %v2656_v38 = vsel %vm1773_vm2, %v2648_v33, 0  ;;  %v2675_v39 = vsel %vm1773_vm2, %v2649_v34, 0  ;;  %2783 = vmatpush.bf16.msra.mxu0 %v2774_v32  ;;  %v6756_v33 = vld [vmem:[%s9207_s3 + $0x10] sm:$0xf]  ;;  %v6757_v34 = vld [vmem:[%s9207_s3 + $0x14] sm:$0xf] }
 0x784   : > { %2665 = vmatpush.bf16.msra.mxu2 %v2656_v38  ;;  %2684 = vmatpush.bf16.msra.mxu3 %v2675_v39  ;;  %v2736_v36 = vsel %vm1773_vm2, %v6756_v33, 0  ;;  %v2755_v37 = vsel %vm1773_vm2, %v6757_v34, 0  ;;  %v6759_v38 = vld [vmem:[%s9207_s3 + $0x1c] sm:$0xf]  ;;  %v7792_v32 = vld [vmem:[%s9203_s14 + $0x1] ss:$0 sm:$0xff] }
 0x785   : > { %v2793_v39 = vsel %vm1773_vm2, %v6759_v38, 0  ;;  %v7793_v34 = vld [vmem:[%s9202_s19 + $0x1] ss:$0 sm:$0xff]  ;;  %s9225_s14 = sld [smem:[#allocation31_spill]] }
 0x786   : > { %v2428_v40 = vpop.f32.mrf.mxu2  ;;  %v2453_v41 = vpop.f32.mrf.mxu3  ;;  %2802 = vmatpush.bf16.msra.mxu1 %v2793_v39  ;;  %v7585_v39 = vld [vmem:[%s9216_s28 + $0x68] sm:$0xff]  ;;  %s9226_s19 = sld [smem:[#allocation29_spill]] }
 0x788   : > { %2745 = vmatpush.bf16.msrb.mxu2 %v2736_v36  ;;  %2764 = vmatpush.bf16.msrb.mxu3 %v2755_v37 }
 0x7f3   : > { %v2577_v42 = vpop.f32.mrf.mxu0  ;;  %v2596_v43 = vpop.f32.mrf.mxu1 }
 0x7f4   : > { %v2578_v44 = vadd.f32 %v2577_v42, %v8409_v35  ;;  %v2597_v54 = vadd.f32 %v2596_v43, %v8409_v35 }
 0x7f6   : > { %v2606_v45 = vsel %vm1641_vm1, %v2578_v44, -inf  ;;  %v2609_v57 = vsel %vm1641_vm1, %v2597_v54, -inf }
 0x7f7   : > { %2607 = vmax.xlane.f32.xlu2 %v2606_v45 }
 0x7fb   : > { %v2579_v46 = vpop.f32.mrf.mxu0  ;;  %v2598_v47 = vpop.f32.mrf.mxu1 }
 0x7fe   : > { %v2539_v48 = vpop.f32.mrf.mxu2  ;;  %v2558_v49 = vpop.f32.mrf.mxu3 }
 0x7ff   : > { %v2540_v50 = vadd.f32 %v2539_v48, %v8409_v35  ;;  %v2559_v51 = vadd.f32 %v2558_v49, %v8409_v35 }
 0x801   : > { %v2603_v52 = vsel %vm1641_vm1, %v2559_v51, -inf  ;;  %v2600_v53 = vsel %vm1641_vm1, %v2540_v50, -inf }
 0x802   : > { %2604 = vmax.xlane.f32.xlu1 %v2603_v52  ;;  %2601 = vmax.xlane.f32.xlu0 %v2600_v53 }
 0x806   : > { %v2541_v55 = vpop.f32.mrf.mxu2  ;;  %v2560_v56 = vpop.f32.mrf.mxu3 }
 0x80a   : > { %2610 = vmax.xlane.f32.xlu0 %v2609_v57 }
 0x86a   : > { %v2608_v58 = vpop.xlane.xlu2 %2607 }
 0x86b   : > { %v2614_v59 = vsub.f32 %v2578_v44, %v2608_v58 }
 0x86d   : > { %v2620_v60 = vmul.f32 1.442695, %v2614_v59 }
 0x86f   : > { %7888 = vpow2.f32 %v2620_v60 }
 0x875   : > { %v7889_v61 = vpop.eup %7888  ;;  %v2605_v62 = vpop.xlane.xlu1 %2604 }
 0x876   : > { %v2602_v63 = vpop.xlane.xlu0 %2601  ;;  %v2613_v0 = vsub.f32 %v2559_v51, %v2605_v62  ;;  %v2630_v2 = vsel %vm1641_vm1, %v7889_v61, 0.0 }
 0x877   : > { %v2612_v1 = vsub.f32 %v2540_v50, %v2602_v63  ;;  %2631 = vadd.xlane.f32.xlu0 %v2630_v2  ;;  %v7791_v63 = vld [vmem:[%s9205_s8 + $0x1] ss:$0 sm:$0xff]  ;;  %s9222_s8 = sld [smem:[#allocation30_spill]] }
 0x878   : > { %v2618_v3 = vmul.f32 1.442695, %v2613_v0 }
 0x879   : > { %v2616_v4 = vmul.f32 1.442695, %v2612_v1 }
 0x87a   : > { %7890 = vpow2.f32 %v2618_v3 }
 0x87b   : > { %7892 = vpow2.f32 %v2616_v4 }
 0x87e   : > { %v2611_v35 = vpop.xlane.xlu0 %2610 }
 0x87f   : > { %v2615_v5 = vsub.f32 %v2597_v54, %v2611_v35 }
 0x880   : > { %v7891_v6 = vpop.eup %7890 }
 0x881   : > { %v2622_v8 = vmul.f32 1.442695, %v2615_v5  ;;  %v7893_v12 = vpop.eup %7892  ;;  %v2627_v9 = vsel %vm1641_vm1, %v7891_v6, 0.0 }
 0x882   : > { %2628 = vadd.xlane.f32.xlu2 %v2627_v9  ;;  %v2624_v10 = vsel %vm1641_vm1, %v7893_v12, 0.0  ;;  %v7581_v9 = vld [vmem:[%s9216_s28 + $0x48] sm:$0xff] }
 0x883   : > { %7894 = vpow2.f32 %v2622_v8  ;;  %2625 = vadd.xlane.f32.xlu1 %v2624_v10  ;;  %v7572_v8 = vld [vmem:[%s9216_s28] sm:$0xff] }
 0x889   : > { %v7895_v11 = vpop.eup %7894 }
 0x88a   : > { %v2633_v13 = vsel %vm1641_vm1, %v7895_v11, 0.0 }
 0x88b   : > { %2634 = vadd.xlane.f32.xlu1 %v2633_v13 }
 0x8ea   : > { %v2632_v14 = vpop.xlane.xlu0 %2631 }
 0x8eb   : > { %7896 = vrcp.f32 %v2632_v14 }
 0x8f1   : > { %v7897_v15 = vpop.eup %7896 }
 0x8f2   : > { %v2642_v16 = vmul.f32 %v7897_v15, %v7889_v61 }
 0x8f4   : > { %v2646_v17 = vpack.c.bf16 %v2642_v16, %v2642_v16 }
 0x8f5   : > { %v2629_v18 = vpop.xlane.xlu2 %2628 }
 0x8f6   : > { %7898 = vrcp.f32 %v2629_v18  ;;  %v2626_v19 = vpop.xlane.xlu1 %2625  ;;  %6767 = vmatmul.msk.bf16.vlgmr.msrb.gmra.mxu0 %vm1641_vm1, %v2646_v17  ;;  %v7567_v17 = vld [vmem:[%s9200_s24 + $0x18] sm:$0xff]  ;;  %v7566_v18 = vld [vmem:[%s9200_s24 + $0x10] sm:$0xff] }
 0x8f7   : > { %7900 = vrcp.f32 %v2626_v19  ;;  %v7577_v19 = vld [vmem:[%s9216_s28 + $0x28] sm:$0xff] }
 0x8fc   : > { %v7899_v21 = vpop.eup %7898 }
 0x8fd   : > { %v7901_v22 = vpop.eup %7900  ;;  %v2641_v23 = vmul.f32 %v7899_v21, %v7891_v6  ;;  %v7573_v6 = vld [vmem:[%s9216_s28 + $0x8] sm:$0xff] }
 0x8fe   : > { %v2640_v24 = vmul.f32 %v7901_v22, %v7893_v12  ;;  %v2635_v25 = vpop.xlane.xlu1 %2634  ;;  %3104 = vmatpush.bf16.msrb.mxu0 %v7573_v6  ;;  %v8572_v12 = vld [vmem:[%s1205_s1] sm:$0xff]  ;;  %v7591_v6 = vld [vmem:[%s9216_s28 + $0x98] sm:$0xff]  ;;  %s9218_s1 = sld [smem:[#allocation8_spill]] }
 0x8ff   : > { %v2645_v26 = vpack.c.bf16 %v2641_v23, %v2641_v23  ;;  %7902 = vrcp.f32 %v2635_v25  ;;  %v8577_v10 = vpack.c.bf16 %v8572_v12, %v8572_v12  ;;  %v7576_v23 = vld [vmem:[%s9216_s28 + $0x20] sm:$0xff] }
 0x900   : > { %v2644_v27 = vpack.c.bf16 %v2640_v24, %v2640_v24 }
 0x901   : > { %6766 = vmatmul.msk.bf16.vlgmr.msra.gmra.mxu3 %vm1641_vm1, %v2645_v26 }
 0x902   : > { %6765 = vmatmul.msk.bf16.vlgmr.msra.gmra.mxu2 %vm1641_vm1, %v2644_v27  ;;  %3105 = vmatpush.bf16.msrb.mxu0 %v7572_v8 }
 0x903   : > { %2897 = vmatpush.bf16.msra.mxu2 %v7567_v17  ;;  %v7800_v17 = vld [vmem:[%s9217_s11 + $0x5] ss:$0 sm:$0xff] }
 0x904   : > { %s8647_s3 = scalar_lea.vmem %s9218_s1, %s8347_s23  ;;  %s9219_s1 = sld [smem:[#allocation24_spill]] }
 0x905   : > { %v7903_v28 = vpop.eup %7902 }
 0x906   : > { %v2643_v29 = vmul.f32 %v7903_v28, %v7895_v11  ;;  %v7575_v28 = vld [vmem:[%s9216_s28 + $0x18] sm:$0xff] }
 0x907   : > { %2898 = vmatpush.bf16.msra.mxu2 %v7566_v18  ;;  %v7801_v18 = vld [vmem:[%s9217_s11 + $0x8] ss:$0 sm:$0xff] }
 0x908   : > { %v2647_v30 = vpack.c.bf16 %v2643_v29, %v2643_v29 }
 0x90a   : > { %6768 = vmatmul.msk.bf16.vlgmr.msrb.gmra.mxu1 %vm1641_vm1, %v2647_v30 }
 0x90b   : > { %3129 = vmatpush.bf16.msrb.mxu1 %v7575_v28 }
 0x973   : > { %v2705_v40 = vpop.f32.mrf.mxu0 }
 0x974   : > { %v2730_v41 = vpack.c.bf16 %v2705_v40, %v2705_v40 }
 0x976   : > { %6771 = vmatmul.msk.bf16.vlgmr.msra.gmra.mxu0 %vm1641_vm1, %v2730_v41  ;;  %v7574_v41 = vld [vmem:[%s9216_s28 + $0x10] sm:$0xff] }
 0x977   : > { %3204 = vmatpush.bf16.msra.mxu0 %v7581_v9  ;;  %3130 = vmatpush.bf16.msrb.mxu1 %v7574_v41  ;;  %v7587_v9 = vld [vmem:[%s9216_s28 + $0x78] sm:$0xff] }
 0x97b   : > { %v2707_v42 = vpop.f32.mrf.mxu0 }
 0x984   : > { %v2686_v43 = vpop.f32.mrf.mxu3 }
 0x985   : > { %v2667_v44 = vpop.f32.mrf.mxu2  ;;  %v2729_v45 = vpack.c.bf16 %v2686_v43, %v2686_v43  ;;  %v7583_v43 = vld [vmem:[%s9216_s28 + $0x58] sm:$0xff] }
 0x986   : > { %v2728_v46 = vpack.c.bf16 %v2667_v44, %v2667_v44  ;;  %6825 = vmatmul.msk.bf16.vlgmr.msrb.gmra.mxu0 %vm1332_vm0, %v8577_v10  ;;  %v7589_v44 = vld [vmem:[%s9216_s28 + $0x88] sm:$0xff] }
 0x987   : > { %v2724_v47 = vpop.f32.mrf.mxu1  ;;  %6770 = vmatmul.msk.bf16.vlgmr.msrb.gmra.mxu3 %vm1641_vm1, %v2729_v45  ;;  %v7584_v45 = vld [vmem:[%s9216_s28 + $0x60] sm:$0xff] }
 0x988   : > { %v2731_v48 = vpack.c.bf16 %v2724_v47, %v2724_v47  ;;  %6769 = vmatmul.msk.bf16.vlgmr.msrb.gmra.mxu2 %vm1641_vm1, %v2728_v46  ;;  %v7582_v46 = vld [vmem:[%s9216_s28 + $0x50] sm:$0xff]  ;;  %v7588_v47 = vld [vmem:[%s9216_s28 + $0x80] sm:$0xff] }
 0x989   : > { %3154 = vmatpush.bf16.msrb.mxu2 %v7577_v19 }
 0x98a   : > { %6772 = vmatmul.msk.bf16.vlgmr.msra.gmra.mxu1 %vm1641_vm1, %v2731_v48  ;;  %v7571_v48 = vld [vmem:[%s9206_s6 + $0x38] sm:$0xff] }
 0x98b   : > { %3229 = vmatpush.bf16.msra.mxu1 %v7583_v43  ;;  %2940 = vmatpush.bf16.msra.mxu3 %v7571_v48 }
 0x98c   : > { %v2688_v49 = vpop.f32.mrf.mxu3 }
 0x98d   : > { %v2669_v50 = vpop.f32.mrf.mxu2  ;;  %3155 = vmatpush.bf16.msrb.mxu2 %v7576_v23  ;;  %v7570_v49 = vld [vmem:[%s9206_s6 + $0x30] sm:$0xff] }
 0x98f   : > { %v2726_v51 = vpop.f32.mrf.mxu1  ;;  %3230 = vmatpush.bf16.msra.mxu1 %v7582_v46  ;;  %2941 = vmatpush.bf16.msra.mxu3 %v7570_v49 }
 0x990   : > { %v7794_v51 = vld [vmem:[%s9217_s11] ss:$0 sm:$0xff] }
 0x99a   : > { %6834 = vmatmul.msk.bf16.vlgmr.msrb.gmra.mxu1 %vm1332_vm0, %v8577_v10 }
 0x99b   : > { %3329 = vmatpush.bf16.msrb.mxu1 %v7591_v6  ;;  %v7806_v6 = vld [vmem:[%s9217_s11 + $0x7] ss:$0 sm:$0xff] }
 0x9aa   : > { %6870 = vmatmul.msk.bf16.vlgmr.msra.gmra.mxu1 %vm1332_vm0, %v8577_v10 }
 0x9f3   : > { %v2785_v52 = vpop.f32.mrf.mxu0 }
 0x9f4   : > { %v2811_v60 = vsel %vm1332_vm0, %v2785_v52, 0.0  ;;  %v7795_v52 = vld [vmem:[%s9217_s11 + $0x4] ss:$0 sm:$0xff] }
 0x9fb   : > { %v2787_v53 = vpop.f32.mrf.mxu0 }
 0xa03   : > { %v3107_v42 = vpop.f32.mrf.mxu0 }
 0xa07   : > { %v2804_v54 = vpop.f32.mrf.mxu1 }
 0xa08   : > { %v2813_v0 = vsel %vm1332_vm0, %v2804_v54, 0.0  ;;  %v3108_v54 = vadd.f32 %v7794_v51, %v3107_v42 }
 0xa0a   : > { %v2766_v55 = vpop.f32.mrf.mxu3 }
 0xa0b   : > { %v2747_v56 = vpop.f32.mrf.mxu2  ;;  %v2809_v57 = vsel %vm1332_vm0, %v2766_v55, 0.0  ;;  %v3109_v50 = vpop.f32.mrf.mxu0 }
 0xa0c   : > { %v2808_v58 = vsel %vm1332_vm0, %v2747_v56, 0.0 }
 0xa0d   : > { %v2810_v59 = vadd.f32 %v2809_v57, %v2808_v58  ;;  %v3391_v57 = vmul.f32 0.35355338, %v3108_v54  ;;  %v7804_v54 = vld [vmem:[%s9217_s11 + $0xa] ss:$0 sm:$0xff] }
 0xa0f   : > { %v2812_v61 = vadd.f32 %v2811_v60, %v2810_v59  ;;  %v2806_v62 = vpop.f32.mrf.mxu1  ;;  %v3395_v60 = vpack.c.bf16 %v3391_v57, %v3391_v57 }
 0xa10   : > { %v7568_v62 = vld [vmem:[%s9206_s6 + $0x20] sm:$0xff] }
 0xa11   : > { %v2814_v1 = vadd.f32 %v2813_v0, %v2812_v61  ;;  %v7569_v61 = vld [vmem:[%s9206_s6 + $0x28] sm:$0xff]  ;;  %v7578_v0 = vld [vmem:[%s9216_s28 + $0x30] sm:$0xff]  ;;  %s9221_s6 = sld [smem:[#allocation28_spill]] }
 0xa12   : > { %v2768_v2 = vpop.f32.mrf.mxu3  ;;  %2942 = vmatpush.bf16.msra.mxu3 %v7569_v61 }
 0xa13   : > { %v2749_v3 = vpop.f32.mrf.mxu2  ;;  %v2818_v4 = vadd.f32 %v7791_v63, %v2814_v1  ;;  %v7579_v63 = vld [vmem:[%s9216_s28 + $0x38] sm:$0xff]  ;;  %v7593_v1 = vld [vmem:[%s9216_s28 + $0xa8] sm:$0xff]  ;;  %v7592_v2 = vld [vmem:[%s9216_s28 + $0xa0] sm:$0xff] }
 0xa14   : > { %v7796_v3 = vld [vmem:[%s9196_s30 + $0x1] ss:$0 sm:$0xff]  ;;  %s9233_s30 = sld [smem:[#allocation35_spill]] }
 0xa15   : > { %v2819_v35 = vadd.f32 %v2818_v4, %v8485_v20  ;;  %v7580_v20 = vld [vmem:[%s9216_s28 + $0x40] sm:$0xff] }
 0xa16   : > { %3205 = vmatpush.bf16.msra.mxu0 %v7580_v20  ;;  %2943 = vmatpush.bf16.msra.mxu3 %v7568_v62 }
 0xa17   : > { %v2824_v5 = vsel %vm1332_vm0, %v2819_v35, 0.0  ;;  %v3132_v4 = vpop.f32.mrf.mxu1 }
 0xa18   : > { %2825 = vadd.xlane.f32.xlu2 %v2824_v5 }
 0xa19   : > { %6861 = vmatmul.msk.bf16.vlgmr.msra.gmra.mxu0 %vm1332_vm0, %v8577_v10 }
 0xa1a   : > { %3304 = vmatpush.bf16.msrb.mxu0 %v7589_v44  ;;  %3179 = vmatpush.bf16.msrb.mxu3 %v7579_v63 }
 0xa1e   : > { %3305 = vmatpush.bf16.msrb.mxu0 %v7588_v47  ;;  %3180 = vmatpush.bf16.msrb.mxu3 %v7578_v0 }
 0xa29   : > { %6897 = vmatmul.msk.bf16.vlgmr.msrb.gmra.mxu0 %vm1332_vm0, %v8577_v10 }
 0xa8b   : > { %v2826_v11 = vpop.xlane.xlu2 %2825 }
 0xa8c   : > { %v2827_v13 = vmul.f32 %v2826_v11, %v8446_v7  ;;  %v3134_v11 = vpop.f32.mrf.mxu1 }
 0xa8e   : > { %v2828_v14 = vsub.f32 %v2819_v35, %v2827_v13  ;;  %v7590_v13 = vld [vmem:[%s9216_s28 + $0x90] sm:$0xff] }
 0xa8f   : > { %3330 = vmatpush.bf16.msrb.mxu1 %v7590_v13 }
 0xa90   : > { %v2829_v15 = vmul.f32 %v2828_v14, %v2828_v14 }
 0xa92   : > { %v2830_v16 = vsel %vm1332_vm0, %v2829_v15, 0.0  ;;  %v7586_v15 = vld [vmem:[%s9216_s28 + $0x70] sm:$0xff]  ;;  %6906 = vmatmul.msk.bf16.vlgmr.msrb.gmra.mxu1 %vm1332_vm0, %v8577_v10 }
 0xa93   : > { %2831 = vadd.xlane.f32.xlu0 %v2830_v16  ;;  %v7798_v16 = vld [vmem:[%s9217_s11 + $0x1] ss:$0 sm:$0xff] }
 0xa96   : > { %v3207_v53 = vpop.f32.mrf.mxu0 }
 0xa97   : > { %v3208_v55 = vadd.f32 %v7795_v52, %v3207_v53  ;;  %v7595_v52 = vld [vmem:[%s9216_s28 + $0xb8] sm:$0xff]  ;;  %v7594_v53 = vld [vmem:[%s9216_s28 + $0xb0] sm:$0xff] }
 0xa99   : > { %v3399_v56 = vpack.c.bf16 %v3208_v55, %v3208_v55 }
 0xa9b   : > { %v3407_v58 = vsel %vm1641_vm1, %v3399_v56, 0 }
 0xa9c   : > { %3416 = vmatpush.bf16.xpose.msra.mxu0 %v3407_v58 }
 0xa9e   : > { %v3209_v59 = vpop.f32.mrf.mxu0 }
 0xa9f   : > { %v7805_v59 = vld [vmem:[%s9217_s11 + $0x9] ss:$0 sm:$0xff] }
 0xaa3   : > { %6925 = vmatmul.msk.bf16.vlgmr.msra.gmra.mxu0 %vm1641_vm1, %v3395_v60 }
 0xaa6   : > { %v3307_v19 = vpop.f32.mrf.mxu0 }
 0xb06   : > { %v2832_v21 = vpop.xlane.xlu0 %2831 }
 0xb07   : > { %v2833_v22 = vmul.f32 %v2832_v21, %v8446_v7  ;;  %v3232_v21 = vpop.f32.mrf.mxu1 }
 0xb08   : > { %v3233_v23 = vadd.f32 %v7800_v17, %v3232_v21 }
 0xb09   : > { %v2834_v24 = vadd.f32 1e-05, %v2833_v22  ;;  %v3133_v22 = vadd.f32 %v7798_v16, %v3132_v4 }
 0xb0b   : > { %7904 = vrsqrt.f32 %v2834_v24  ;;  %vm2841_vm12 = vweird.f32 %v2834_v24  ;;  %v3392_v28 = vmul.f32 0.35355338, %v3133_v22 }
 0xb11   : > { %v7905_v25 = vpop.eup %7904 }
 0xb12   : > { %v2836_v26 = vmul.f32 %v7905_v25, %v2834_v24  ;;  %vm2842_vm11 = vweird.f32 %v7905_v25  ;;  %v3308_v24 = vadd.f32 %v7801_v18, %v3307_v19 }
 0xb13   : > { %vm2843_vm13 = vmor %vm2841_vm12, %vm2842_vm11 }
 0xb14   : > { %v2837_v27 = vmul.f32 %v7905_v25, %v2836_v26  ;;  %v3400_v26 = vpack.c.bf16 %v3233_v23, %v3233_v23 }
 0xb16   : > { %v2838_v29 = vmul.f32 0.5, %v2837_v27  ;;  %v3527_v27 = vpack.c.bf16 %v3308_v24, %v3308_v24 }
 0xb18   : > { %v2839_v30 = vsub.f32 1.5, %v2838_v29  ;;  %v3426_v29 = vsel %vm1641_vm1, %v3400_v26, 0 }
 0xb19   : > { %3435 = vmatpush.bf16.xpose.msra.mxu1 %v3426_v29  ;;  %v7802_v29 = vld [vmem:[%s9204_s12 + $0x1] ss:$0 sm:$0xff]  ;;  %s9223_s12 = sld [smem:[#allocation26_spill]] }
 0xb1a   : > { %v2840_v31 = vmul.f32 %v7905_v25, %v2839_v30  ;;  %v3535_v30 = vsel %vm1773_vm2, %v3527_v27, 0 }
 0xb1b   : > { %3544 = vmatpush.bf16.msrb.mxu0 %v3535_v30 }
 0xb1c   : > { %v2844_v33 = vsel %vm2843_vm13, %v7905_v25, %v2840_v31  ;;  %v3309_v31 = vpop.f32.mrf.mxu0 }
 0xb1d   : > { %v2845_v36 = vmul.f32 %v2844_v33, %v2828_v14  ;;  %v3396_v33 = vpack.c.bf16 %v3392_v28, %v3392_v28 }
 0xb1f   : > { %v2849_v37 = vmul.f32 %v7792_v32, %v2845_v36  ;;  %v3234_v32 = vpop.f32.mrf.mxu1  ;;  %v8651_v36 = vld [vmem:[%s8647_s3] sm:$0xff] }
 0xb20   : > { %6926 = vmatmul.msk.bf16.vlgmr.msra.gmra.mxu1 %vm1641_vm1, %v3396_v33 }
 0xb21   : > { %v8594_v38 = vadd.f32 %v7793_v34, %v2849_v37  ;;  %v7797_v37 = vld [vmem:[%s9217_s11 + $0x2] ss:$0 sm:$0xff] }
 0xb23   : > { %v2854_v40 = vpack.c.bf16 %v8594_v38, %v8594_v38 }
 0xb25   : > { %6797 = vmatmul.msk.bf16.vlgmr.msra.gmra.mxu2 %vm1332_vm0, %v2854_v40  ;;  %v3418_v40 = vpop.f32.mrf.mxu0 }
 0xb26   : > { %3254 = vmatpush.bf16.msra.mxu2 %v7585_v39  ;;  %v7799_v39 = vld [vmem:[%s9217_s11 + $0x6] ss:$0 sm:$0xff]  ;;  %v3419_v41 = vadd.f32 %v3418_v40, %v8651_v36 }
 0xb27   : > { %v3332_v60 = vpop.f32.mrf.mxu1 }
 0xb28   : > { %v3479_v43 = vsel %vm1641_vm1, %v3419_v41, -inf  ;;  %v3333_v62 = vadd.f32 %v7805_v59, %v3332_v60  ;;  %v3386_v59 = vld [vmem:[%s9219_s1] sm:$0xf] }
 0xb29   : > { %3480 = vmax.xlane.f32.xlu0 %v3479_v43  ;;  %v3615_v60 = vsel %vm1773_vm2, %v3386_v59, 0 }
 0xb2a   : > { %3255 = vmatpush.bf16.msra.mxu2 %v7584_v45  ;;  %v3528_v0 = vpack.c.bf16 %v3333_v62, %v3333_v62  ;;  %3624 = vmatpush.bf16.msra.mxu0 %v3615_v60 }
 0xb2d   : > { %v3420_v49 = vpop.f32.mrf.mxu0 }
 0xb35   : > { %6843 = vmatmul.msk.bf16.vlgmr.msrb.gmra.mxu2 %vm1332_vm0, %v8577_v10 }
 0xb36   : > { %3354 = vmatpush.bf16.msrb.mxu2 %v7593_v1  ;;  %v3554_v1 = vsel %vm1773_vm2, %v3528_v0, 0 }
 0xb37   : > { %3563 = vmatpush.bf16.msrb.mxu1 %v3554_v1 }
 0xb3a   : > { %3355 = vmatpush.bf16.msrb.mxu2 %v7592_v2  ;;  %v3334_v2 = vpop.f32.mrf.mxu1 }
 0xb45   : > { %6879 = vmatmul.msk.bf16.vlgmr.msra.gmra.mxu2 %vm1332_vm0, %v8577_v10 }
 0xb55   : > { %6915 = vmatmul.msk.bf16.vlgmr.msrb.gmra.mxu2 %vm1332_vm0, %v8577_v10 }
 0xba8   : > { %v2900_v35 = vpop.f32.mrf.mxu2 }
 0xba9   : > { %v2901_v5 = vadd.f32 %v7796_v3, %v2900_v35  ;;  %v3437_v3 = vpop.f32.mrf.mxu1 }
 0xbab   : > { %v2904_v8 = vmax.f32 %v2901_v5, 0.0 }
 0xbad   : > { %v2905_v20 = vpack.c.bf16 %v2904_v8, %v2904_v8  ;;  %v7803_v8 = vld [vmem:[%s9217_s11 + $0x3] ss:$0 sm:$0xff] }
 0xbaf   : > { %6814 = vmatmul.msk.bf16.vlgmr.msra.gmra.mxu3 %vm2053_vm7, %v2905_v20 }
 0xbb0   : > { %v2902_v14 = vpop.f32.mrf.mxu2  ;;  %3279 = vmatpush.bf16.msra.mxu3 %v7587_v9 }
 0xbb1   : > { %v3439_v35 = vpop.f32.mrf.mxu1  ;;  %v3481_v14 = vpop.xlane.xlu0 %3480 }
 0xbb2   : > { %v3491_v17 = vsub.f32 %v3419_v41, %v3481_v14 }
 0xbb4   : > { %3280 = vmatpush.bf16.msra.mxu3 %v7586_v15  ;;  %v3495_v23 = vmul.f32 1.442695, %v3491_v17 }
 0xbb6   : > { %7906 = vpow2.f32 %v3495_v23 }
 0xbb8   : > { %v3157_v25 = vpop.f32.mrf.mxu2 }
 0xbb9   : > { %v3158_v44 = vadd.f32 %v7797_v37, %v3157_v25  ;;  %v3438_v25 = vadd.f32 %v3437_v3, %v8651_v36 }
 0xbbb   : > { %v3393_v47 = vmul.f32 0.35355338, %v3158_v44  ;;  %v3482_v27 = vsel %vm1641_vm1, %v3438_v25, -inf }
 0xbbc   : > { %v7907_v28 = vpop.eup %7906 }
 0xbbd   : > { %v3397_v51 = vpack.c.bf16 %v3393_v47, %v3393_v47  ;;  %v3503_v30 = vsel %vm1641_vm1, %v7907_v28, 0.0 }
 0xbbf   : > { %6852 = vmatmul.msk.bf16.vlgmr.msrb.gmra.mxu3 %vm1332_vm0, %v8577_v10 }
 0xbc0   : > { %v3159_v34 = vpop.f32.mrf.mxu2  ;;  %3379 = vmatpush.bf16.msrb.mxu3 %v7595_v52 }
 0xbc1   : > { %v7807_v34 = vld [vmem:[%s9217_s11 + $0xb] ss:$0 sm:$0xff] }
 0xbc4   : > { %3380 = vmatpush.bf16.msrb.mxu3 %v7594_v53 }
 0xbc8   : > { %v3257_v42 = vpop.f32.mrf.mxu2 }
 0xbc9   : > { %v3258_v45 = vadd.f32 %v7799_v39, %v3257_v42 }
 0xbcb   : > { %v3401_v46 = vpack.c.bf16 %v3258_v45, %v3258_v45 }
 0xbcd   : > { %v3445_v48 = vsel %vm1641_vm1, %v3401_v46, 0 }
 0xbce   : > { %3454 = vmatpush.bf16.xpose.msra.mxu2 %v3445_v48 }
 0xbcf   : > { %6888 = vmatmul.msk.bf16.vlgmr.msra.gmra.mxu3 %vm1332_vm0, %v8577_v10 }
 0xbd0   : > { %v3259_v50 = vpop.f32.mrf.mxu2 }
 0xbd5   : > { %6927 = vmatmul.msk.bf16.vlgmr.msra.gmra.mxu2 %vm1641_vm1, %v3397_v51 }
 0xbd8   : > { %v3357_v55 = vpop.f32.mrf.mxu2 }
 0xbd9   : > { %v3358_v56 = vadd.f32 %v7804_v54, %v3357_v55 }
 0xbdb   : > { %v3529_v57 = vpack.c.bf16 %v3358_v56, %v3358_v56 }
 0xbdd   : > { %v3573_v58 = vsel %vm1773_vm2, %v3529_v57, 0 }
 0xbde   : > { %3582 = vmatpush.bf16.msrb.mxu2 %v3573_v58 }
 0xbdf   : > { %6924 = vmatmul.msk.bf16.vlgmr.msrb.gmra.mxu3 %vm1332_vm0, %v8577_v10 }
 0xbe0   : > { %v3359_v61 = vpop.f32.mrf.mxu2 }
 0xc32   : > { %v2945_v63 = vpop.f32.mrf.mxu3 }
 0xc33   : > { %v2946_v31 = vadd.f32 %v7802_v29, %v2945_v63 }
 0xc35   : > { %v8680_v32 = vadd.f32 %v2946_v31, %v8594_v38 }
 0xc37   : > { %v2954_v33 = vsel %vm1332_vm0, %v8680_v32, 0.0 }
 0xc3a   : > { %v2947_v10 = vpop.f32.mrf.mxu3 }
 0xc42   : > { %v3182_v4 = vpop.f32.mrf.mxu3 }
 0xc43   : > { %v3183_v11 = vadd.f32 %v7803_v8, %v3182_v4 }
 0xc45   : > { %v3394_v18 = vmul.f32 0.35355338, %v3183_v11 }
 0xc47   : > { %v3398_v24 = vpack.c.bf16 %v3394_v18, %v3394_v18  ;;  %v3389_v18 = vld [vmem:[%s9219_s1 + $0xc] sm:$0xf] }
 0xc4a   : > { %v3184_v5 = vpop.f32.mrf.mxu3 }
 0xc52   : > { %v3282_v9 = vpop.f32.mrf.mxu3 }
 0xc53   : > { %v3283_v20 = vadd.f32 %v7806_v6, %v3282_v9 }
 0xc55   : > { %v3402_v13 = vpack.c.bf16 %v3283_v20, %v3283_v20 }
 0xc57   : > { %v3464_v15 = vsel %vm1641_vm1, %v3402_v13, 0  ;;  %v3388_v13 = vld [vmem:[%s9219_s1 + $0x8] sm:$0xf] }
 0xc58   : > { %v3456_v16 = vpop.f32.mrf.mxu2  ;;  %3473 = vmatpush.bf16.xpose.msra.mxu3 %v3464_v15  ;;  %v3653_v14 = vsel %vm1773_vm2, %v3388_v13, 0  ;;  %v3387_v15 = vld [vmem:[%s9219_s1 + $0x4] sm:$0xf] }
 0xc59   : > { %v3457_v19 = vadd.f32 %v3456_v16, %v8651_v36  ;;  %3662 = vmatpush.bf16.msra.mxu2 %v3653_v14  ;;  %v3634_v16 = vsel %vm1773_vm2, %v3387_v15, 0  ;;  %v7611_v14 = vld [vmem:[%s9222_s8 + $0x38] sm:$0xff]  ;;  %v7604_v15 = vld [vmem:[%s9222_s8] sm:$0xff] }
 0xc5a   : > { %v3284_v21 = vpop.f32.mrf.mxu3  ;;  %3643 = vmatpush.bf16.msra.mxu1 %v3634_v16  ;;  %v7606_v16 = vld [vmem:[%s9222_s8 + $0x10] sm:$0xff] }
 0xc5b   : > { %v3485_v22 = vsel %vm1641_vm1, %v3457_v19, -inf }
 0xc5c   : > { %3486 = vmax.xlane.f32.xlu1 %v3485_v22 }
 0xc5f   : > { %6928 = vmatmul.msk.bf16.vlgmr.msra.gmra.mxu3 %vm1641_vm1, %v3398_v24 }
 0xc60   : > { %v3458_v26 = vpop.f32.mrf.mxu2 }
 0xc62   : > { %v3382_v37 = vpop.f32.mrf.mxu3 }
 0xc63   : > { %v3383_v39 = vadd.f32 %v7807_v34, %v3382_v37 }
 0xc64   : > { %3483 = vmax.xlane.f32.xlu1 %v3482_v27 }
 0xc65   : > { %v3530_v40 = vpack.c.bf16 %v3383_v39, %v3383_v39 }
 0xc67   : > { %v3592_v41 = vsel %vm1773_vm2, %v3530_v40, 0 }
 0xc68   : > { %3601 = vmatpush.bf16.msrb.mxu3 %v3592_v41 }
 0xc6a   : > { %v3384_v42 = vpop.f32.mrf.mxu3 }
 0xc6c   : > { %3504 = vadd.xlane.f32.xlu1 %v3503_v30 }
 0xc74   : > { %2955 = vadd.xlane.f32.xlu1 %v2954_v33 }
 0xccf   : > { %v3487_v43 = vpop.xlane.xlu1 %3486 }
 0xcd0   : > { %v3493_v45 = vsub.f32 %v3457_v19, %v3487_v43  ;;  %v3672_v19 = vsel %vm1773_vm2, %v3389_v18, 0  ;;  %v7608_v18 = vld [vmem:[%s9222_s8 + $0x20] sm:$0xff] }
 0xcd1   : > { %3681 = vmatpush.bf16.msra.mxu3 %v3672_v19  ;;  %v7610_v19 = vld [vmem:[%s9222_s8 + $0x30] sm:$0xff] }
 0xcd2   : > { %v3499_v47 = vmul.f32 1.442695, %v3493_v45 }
 0xcd7   : > { %v3484_v44 = vpop.xlane.xlu1 %3483 }
 0xcd8   : > { %v3492_v49 = vsub.f32 %v3438_v25, %v3484_v44 }
 0xcda   : > { %v3497_v53 = vmul.f32 1.442695, %v3492_v49 }
 0xcdf   : > { %v3505_v46 = vpop.xlane.xlu1 %3504 }
 0xce0   : > { %7908 = vrcp.f32 %v3505_v46 }
 0xce1   : > { %7910 = vpow2.f32 %v3499_v47 }
 0xce2   : > { %v3475_v38 = vpop.f32.mrf.mxu3  ;;  %7912 = vpow2.f32 %v3497_v53 }
 0xce3   : > { %v3476_v48 = vadd.f32 %v3475_v38, %v8651_v36 }
 0xce5   : > { %v3488_v50 = vsel %vm1641_vm1, %v3476_v48, -inf }
 0xce6   : > { %v7909_v51 = vpop.eup %7908  ;;  %3489 = vmax.xlane.f32.xlu2 %v3488_v50 }
 0xce7   : > { %v3519_v52 = vmul.f32 %v7909_v51, %v7907_v28  ;;  %v7911_v55 = vpop.eup %7910  ;;  %v2956_v49 = vpop.xlane.xlu1 %2955 }
 0xce8   : > { %v3509_v57 = vsel %vm1641_vm1, %v7911_v55, 0.0  ;;  %v7913_v58 = vpop.eup %7912 }
 0xce9   : > { %v3523_v54 = vpack.c.bf16 %v3519_v52, %v3519_v52  ;;  %v3506_v36 = vsel %vm1641_vm1, %v7913_v58, 0.0  ;;  %v2957_v52 = vmul.f32 %v2956_v49, %v8446_v7 }
 0xcea   : > { %v3477_v56 = vpop.f32.mrf.mxu3 }
 0xceb   : > { %6929 = vmatmul.msk.bf16.vlgmr.msrb.gmra.mxu0 %vm1641_vm1, %v3523_v54 }
 0xcee   : > { %3510 = vadd.xlane.f32.xlu2 %v3509_v57 }
 0xcf6   : > { %3507 = vadd.xlane.f32.xlu2 %v3506_v36 }
 0xd59   : > { %v3490_v61 = vpop.xlane.xlu2 %3489 }
 0xd5a   : > { %v3494_v62 = vsub.f32 %v3476_v48, %v3490_v61  ;;  %v7808_v48 = vld [vmem:[%s9220_s5] ss:$0 sm:$0xff] }
 0xd5c   : > { %v3501_v63 = vmul.f32 1.442695, %v3494_v62 }
 0xd5e   : > { %7914 = vpow2.f32 %v3501_v63  ;;  %v7597_v63 = vld [vmem:[%s9221_s6 + $0x8] sm:$0xff] }
 0xd5f   : > { %3785 = vmatpush.bf16.msrb.mxu0 %v7597_v63 }
 0xd61   : > { %v3511_v0 = vpop.xlane.xlu2 %3510 }
 0xd62   : > { %7916 = vrcp.f32 %v3511_v0  ;;  %v7599_v0 = vld [vmem:[%s9221_s6 + $0x18] sm:$0xff] }
 0xd64   : > { %v7915_v1 = vpop.eup %7914 }
 0xd65   : > { %v3512_v2 = vsel %vm1641_vm1, %v7915_v1, 0.0 }
 0xd66   : > { %3513 = vadd.xlane.f32.xlu0 %v3512_v2  ;;  %v7603_v2 = vld [vmem:[%s9221_s6 + $0x38] sm:$0xff] }
 0xd68   : > { %v7917_v10 = vpop.eup %7916  ;;  %v3546_v3 = vpop.f32.mrf.mxu0 }
 0xd69   : > { %v3521_v4 = vmul.f32 %v7917_v10, %v7911_v55  ;;  %v3607_v35 = vpack.c.bf16 %v3546_v3, %v3546_v3  ;;  %v3508_v5 = vpop.xlane.xlu2 %3507  ;;  %v8715_v55 = vsub.f32 %v8680_v32, %v2957_v52  ;;  %v7596_v3 = vld [vmem:[%s9221_s6] sm:$0xff] }
 0xd6a   : > { %7918 = vrcp.f32 %v3508_v5  ;;  %v7602_v5 = vld [vmem:[%s9221_s6 + $0x30] sm:$0xff]  ;;  %3786 = vmatpush.bf16.msrb.mxu0 %v7596_v3  ;;  %v7616_v52 = vld [vmem:[%s9222_s8 + $0x60] sm:$0xff] }
 0xd6b   : > { %v3525_v6 = vpack.c.bf16 %v3521_v4, %v3521_v4  ;;  %6933 = vmatmul.msk.bf16.vlgmr.msra.gmra.mxu0 %vm1641_vm1, %v3607_v35  ;;  %v7598_v4 = vld [vmem:[%s9221_s6 + $0x10] sm:$0xff]  ;;  %v7600_v35 = vld [vmem:[%s9221_s6 + $0x20] sm:$0xff] }
 0xd6d   : > { %6931 = vmatmul.msk.bf16.vlgmr.msrb.gmra.mxu2 %vm1641_vm1, %v3525_v6 }
 0xd70   : > { %v7919_v8 = vpop.eup %7918  ;;  %v3548_v9 = vpop.f32.mrf.mxu0 }
 0xd71   : > { %v3520_v20 = vmul.f32 %v7919_v8, %v7913_v58  ;;  %v2959_v58 = vmul.f32 %v8715_v55, %v8715_v55  ;;  %v7605_v9 = vld [vmem:[%s9222_s8 + $0x8] sm:$0xff] }
 0xd72   : > { %3952 = vmatpush.bf16.msra.mxu0 %v7605_v9 }
 0xd73   : > { %v3524_v11 = vpack.c.bf16 %v3520_v20, %v3520_v20  ;;  %v2960_v36 = vsel %vm1332_vm0, %v2959_v58, 0.0  ;;  %v7607_v20 = vld [vmem:[%s9222_s8 + $0x18] sm:$0xff] }
 0xd75   : > { %6930 = vmatmul.msk.bf16.vlgmr.msrb.gmra.mxu1 %vm1641_vm1, %v3524_v11  ;;  %v7609_v11 = vld [vmem:[%s9222_s8 + $0x28] sm:$0xff] }
 0xd76   : > { %3810 = vmatpush.bf16.msrb.mxu1 %v7599_v0  ;;  %3953 = vmatpush.bf16.msra.mxu0 %v7604_v15  ;;  %v7815_v15 = vld [vmem:[%s9226_s19 + $0x2] ss:$0 sm:$0xff] }
 0xd7a   : > { %3811 = vmatpush.bf16.msrb.mxu1 %v7598_v4 }
 0xdd9   : > { %v3514_v17 = vpop.xlane.xlu0 %3513 }
 0xdda   : > { %7920 = vrcp.f32 %v3514_v17 }
 0xde0   : > { %v7921_v21 = vpop.eup %7920 }
 0xde1   : > { %v3522_v22 = vmul.f32 %v7921_v21, %v7915_v1  ;;  %v7601_v1 = vld [vmem:[%s9221_s6 + $0x28] sm:$0xff] }
 0xde2   : > { %3835 = vmatpush.bf16.msrb.mxu2 %v7601_v1  ;;  %v7813_v1 = vld [vmem:[%s9226_s19] ss:$0 sm:$0xff] }
 0xde3   : > { %v3526_v23 = vpack.c.bf16 %v3522_v22, %v3522_v22 }
 0xde5   : > { %6932 = vmatmul.msk.bf16.vlgmr.msrb.gmra.mxu3 %vm1641_vm1, %v3526_v23 }
 0xde6   : > { %3860 = vmatpush.bf16.msrb.mxu3 %v7603_v2  ;;  %3836 = vmatpush.bf16.msrb.mxu2 %v7600_v35  ;;  %v7814_v2 = vld [vmem:[%s9226_s19 + $0x1] ss:$0 sm:$0xff] }
 0xde8   : > { %v3626_v24 = vpop.f32.mrf.mxu0 }
 0xde9   : > { %v3687_v40 = vsel %vm1332_vm0, %v3626_v24, 0.0 }
 0xdea   : > { %3861 = vmatpush.bf16.msrb.mxu3 %v7602_v5 }
 0xdf0   : > { %v3584_v25 = vpop.f32.mrf.mxu2  ;;  %v3628_v26 = vpop.f32.mrf.mxu0 }
 0xdf1   : > { %v3609_v27 = vpack.c.bf16 %v3584_v25, %v3584_v25 }
 0xdf2   : > { %v3565_v28 = vpop.f32.mrf.mxu1 }
 0xdf3   : > { %v3608_v29 = vpack.c.bf16 %v3565_v28, %v3565_v28  ;;  %6935 = vmatmul.msk.bf16.vlgmr.msra.gmra.mxu2 %vm1641_vm1, %v3609_v27 }
 0xdf4   : > { %4002 = vmatpush.bf16.msra.mxu2 %v7609_v11  ;;  %v7820_v11 = vld [vmem:[%s9225_s14 + $0x3] ss:$0 sm:$0xff] }
 0xdf5   : > { %6934 = vmatmul.msk.bf16.vlgmr.msra.gmra.mxu1 %vm1641_vm1, %v3608_v29 }
 0xdf6   : > { %3977 = vmatpush.bf16.msra.mxu1 %v7607_v20  ;;  %v7819_v20 = vld [vmem:[%s9225_s14 + $0x2] ss:$0 sm:$0xff] }
 0xdf8   : > { %v3586_v30 = vpop.f32.mrf.mxu2  ;;  %4003 = vmatpush.bf16.msra.mxu2 %v7608_v18 }
 0xdfa   : > { %v3567_v31 = vpop.f32.mrf.mxu1  ;;  %3978 = vmatpush.bf16.msra.mxu1 %v7606_v16  ;;  %v7816_v16 = vld [vmem:[%s9226_s19 + $0x3] ss:$0 sm:$0xff] }
 0xdfb   : > { %v7811_v31 = vld [vmem:[%s9223_s12] ss:$0 sm:$0xff] }
 0xe68   : > { %v3603_v33 = vpop.f32.mrf.mxu3 }
 0xe69   : > { %v3610_v34 = vpack.c.bf16 %v3603_v33, %v3603_v33 }
 0xe6b   : > { %6936 = vmatmul.msk.bf16.vlgmr.msra.gmra.mxu3 %vm1641_vm1, %v3610_v34 }
 0xe6c   : > { %4027 = vmatpush.bf16.msra.mxu3 %v7611_v14 }
 0xe70   : > { %v3605_v37 = vpop.f32.mrf.mxu3  ;;  %4028 = vmatpush.bf16.msra.mxu3 %v7610_v19 }
 0xe71   : > { %v7812_v37 = vld [vmem:[%s9224_s13] ss:$0 sm:$0xff] }
 0xe72   : > { %v3645_v39 = vpop.f32.mrf.mxu1 }
 0xe73   : > { %v3688_v41 = vsel %vm1332_vm0, %v3645_v39, 0.0 }
 0xe74   : > { %v3689_v42 = vadd.f32 %v3688_v41, %v3687_v40 }
 0xe76   : > { %v3664_v43 = vpop.f32.mrf.mxu2 }
 0xe77   : > { %v3690_v44 = vsel %vm1332_vm0, %v3664_v43, 0.0 }
 0xe78   : > { %v3691_v45 = vadd.f32 %v3690_v44, %v3689_v42  ;;  %v7613_v44 = vld [vmem:[%s9222_s8 + $0x48] sm:$0xff] }
 0xe7a   : > { %v3647_v46 = vpop.f32.mrf.mxu1 }
 0xe7e   : > { %v3666_v47 = vpop.f32.mrf.mxu2 }
 0xe7f   : > { %v7617_v47 = vld [vmem:[%s9222_s8 + $0x68] sm:$0xff] }
 0xeee   : > { %v3683_v38 = vpop.f32.mrf.mxu3 }
 0xeef   : > { %v3692_v50 = vsel %vm1332_vm0, %v3683_v38, 0.0  ;;  %v7619_v38 = vld [vmem:[%s9222_s8 + $0x78] sm:$0xff] }
 0xef0   : > { %v3693_v51 = vadd.f32 %v3692_v50, %v3691_v45  ;;  %v7615_v45 = vld [vmem:[%s9222_s8 + $0x58] sm:$0xff]  ;;  %v7612_v50 = vld [vmem:[%s9222_s8 + $0x40] sm:$0xff] }
 0xef2   : > { %v3697_v53 = vadd.f32 %v7808_v48, %v3693_v51  ;;  %v7809_v48 = vld [vmem:[%s9201_s20 + $0x1] ss:$0 sm:$0xff]  ;;  %v7614_v51 = vld [vmem:[%s9222_s8 + $0x50] sm:$0xff]  ;;  %s9227_s20 = sld [smem:[#allocation9_spill]] }
 0xef4   : > { %v3698_v54 = vadd.f32 %v3697_v53, %v8572_v12  ;;  %v7618_v53 = vld [vmem:[%s9222_s8 + $0x70] sm:$0xff] }
 0xef6   : > { %v3685_v56 = vpop.f32.mrf.mxu3  ;;  %v3701_v57 = vsel %vm1332_vm0, %v3698_v54, 0.0 }
 0xef7   : > { %3702 = vadd.xlane.f32.xlu0 %v3701_v57 }
 0xef8   : > { %s8806_s24 = scalar_lea.vmem %s9227_s20, %s8347_s23  ;;  %s9228_s20 = sld [smem:[#allocation32_spill]] }
 0xef9   : > { %s9229_s23 = sld [smem:[#allocation33_spill]] }
 0xeff   : > { %2961 = vadd.xlane.f32.xlu0 %v2960_v36 }
 0xf6a   : > { %v3703_v59 = vpop.xlane.xlu0 %3702 }
 0xf6b   : > { %v3704_v12 = vmul.f32 %v3703_v59, %v8446_v7 }
 0xf6d   : > { %v3705_v60 = vsub.f32 %v3698_v54, %v3704_v12  ;;  %v7810_v54 = vld [vmem:[%s9198_s27 + $0x1] ss:$0 sm:$0xff]  ;;  %s9231_s27 = sld [smem:[#allocation38_spill]] }
 0xf6f   : > { %v3706_v32 = vmul.f32 %v3705_v60, %v3705_v60 }
 0xf71   : > { %v3707_v61 = vsel %vm1332_vm0, %v3706_v32, 0.0 }
 0xf72   : > { %3708 = vadd.xlane.f32.xlu2 %v3707_v61  ;;  %v2962_v62 = vpop.xlane.xlu0 %2961  ;;  %v7817_v61 = vld [vmem:[%s9225_s14] ss:$0 sm:$0xff] }
 0xf73   : > { %v2963_v10 = vmul.f32 %v2962_v62, %v8446_v7  ;;  %v7818_v62 = vld [vmem:[%s9225_s14 + $0x1] ss:$0 sm:$0xff] }
 0xf75   : > { %v2964_v6 = vadd.f32 1e-05, %v2963_v10 }
 0xf77   : > { %7922 = vrsqrt.f32 %v2964_v6  ;;  %vm2971_vm5 = vweird.f32 %v2964_v6 }
 0xf7d   : > { %v7923_v21 = vpop.eup %7922 }
 0xf7e   : > { %v2966_v22 = vmul.f32 %v7923_v21, %v2964_v6  ;;  %vm2972_vm4 = vweird.f32 %v7923_v21 }
 0xf7f   : > { %vm2973_vm6 = vmor %vm2971_vm5, %vm2972_vm4 }
 0xf80   : > { %v2967_v25 = vmul.f32 %v7923_v21, %v2966_v22 }
 0xf82   : > { %v2968_v28 = vmul.f32 0.5, %v2967_v25 }
 0xf84   : > { %v2969_v33 = vsub.f32 1.5, %v2968_v28 }
 0xf86   : > { %v2970_v41 = vmul.f32 %v7923_v21, %v2969_v33 }
 0xf88   : > { %v2974_v46 = vsel %vm2973_vm6, %v7923_v21, %v2970_v41 }
 0xf89   : > { %v2975_v49 = vmul.f32 %v2974_v46, %v8715_v55 }
 0xf8b   : > { %v2979_v56 = vmul.f32 %v7809_v48, %v2975_v49 }
 0xf8d   : > { %v2983_v57 = vadd.f32 %v7810_v54, %v2979_v56 }
 0xf8f   : > { %v8762_v58 = vpack.c.bf16 %v2983_v57, %v2983_v57 }
 0xfe5   : > { %v3709_v8 = vpop.xlane.xlu2 %3708 }
 0xfe6   : > { %v3710_v13 = vmul.f32 %v3709_v8, %v8446_v7 }
 0xfe8   : > { %v3711_v17 = vadd.f32 1e-05, %v3710_v13 }
 0xfea   : > { %7924 = vrsqrt.f32 %v3711_v17  ;;  %vm3718_vm15 = vweird.f32 %v3711_v17 }
 0xff0   : > { %v7925_v23 = vpop.eup %7924 }
 0xff1   : > { %v3713_v24 = vmul.f32 %v7925_v23, %v3711_v17  ;;  %vm3719_vm14 = vweird.f32 %v7925_v23 }
 0xff2   : > { %vm3720_vm3 = vmor %vm3718_vm15, %vm3719_vm14 }
 0xff3   : > { %v3714_v26 = vmul.f32 %v7925_v23, %v3713_v24 }
 0xff5   : > { %v3715_v27 = vmul.f32 0.5, %v3714_v26 }
 0xff7   : > { %v3716_v29 = vsub.f32 1.5, %v3715_v27 }
 0xff9   : > { %v3717_v30 = vmul.f32 %v7925_v23, %v3716_v29 }
 0xffb   : > { %v3721_v34 = vsel %vm3720_vm3, %v7925_v23, %v3717_v30 }
 0xffc   : > { %v3722_v39 = vmul.f32 %v3721_v34, %v3705_v60 }
 0xffe   : > { %v3726_v40 = vmul.f32 %v7811_v31, %v3722_v39  ;;  %v7822_v39 = vld [vmem:[%s9225_s14 + $0x5] ss:$0 sm:$0xff] }
0x1000   : > { %v8743_v42 = vadd.f32 %v7812_v37, %v3726_v40  ;;  %v7821_v37 = vld [vmem:[%s9225_s14 + $0x4] ss:$0 sm:$0xff] }
0x1002   : > { %v3731_v43 = vpack.c.bf16 %v8743_v42, %v8743_v42 }
0x1004   : > { %6945 = vmatmul.msk.bf16.vlgmr.msrb.gmra.mxu0 %vm1332_vm0, %v3731_v43  ;;  %6954 = vmatmul.msk.bf16.vlgmr.msrb.gmra.mxu1 %vm1332_vm0, %v3731_v43 }
0x1005   : > { %6963 = vmatmul.msk.bf16.vlgmr.msrb.gmra.mxu2 %vm1332_vm0, %v3731_v43  ;;  %6972 = vmatmul.msk.bf16.vlgmr.msrb.gmra.mxu3 %vm1332_vm0, %v3731_v43 }
0x1006   : > { %4052 = vmatpush.bf16.msrb.mxu0 %v7613_v44  ;;  %4077 = vmatpush.bf16.msrb.mxu1 %v7615_v45 }
0x1007   : > { %4102 = vmatpush.bf16.msrb.mxu2 %v7617_v47  ;;  %4127 = vmatpush.bf16.msrb.mxu3 %v7619_v38 }
0x100a   : > { %4053 = vmatpush.bf16.msrb.mxu0 %v7612_v50  ;;  %4078 = vmatpush.bf16.msrb.mxu1 %v7614_v51 }
0x100b   : > { %4103 = vmatpush.bf16.msrb.mxu2 %v7616_v52  ;;  %4128 = vmatpush.bf16.msrb.mxu3 %v7618_v53  ;;  %v7823_v52 = vld [vmem:[%s9225_s14 + $0x6] ss:$0 sm:$0xff]  ;;  %v7824_v53 = vld [vmem:[%s9225_s14 + $0x7] ss:$0 sm:$0xff] }
0x1014   : > { %6981 = vmatmul.msk.bf16.vlgmr.msra.gmra.mxu0 %vm1332_vm0, %v8762_v58  ;;  %6990 = vmatmul.msk.bf16.vlgmr.msra.gmra.mxu1 %vm1332_vm0, %v8762_v58 }
0x1015   : > { %6999 = vmatmul.msk.bf16.vlgmr.msra.gmra.mxu2 %vm1332_vm0, %v8762_v58  ;;  %7008 = vmatmul.msk.bf16.vlgmr.msra.gmra.mxu3 %vm1332_vm0, %v8762_v58 }
0x1024   : > { %7017 = vmatmul.msk.bf16.vlgmr.msrb.gmra.mxu0 %vm1332_vm0, %v8762_v58  ;;  %7026 = vmatmul.msk.bf16.vlgmr.msrb.gmra.mxu1 %vm1332_vm0, %v8762_v58 }
0x1025   : > { %7035 = vmatmul.msk.bf16.vlgmr.msrb.gmra.mxu2 %vm1332_vm0, %v8762_v58  ;;  %7044 = vmatmul.msk.bf16.vlgmr.msrb.gmra.mxu3 %vm1332_vm0, %v8762_v58 }
0x1081   : > { %v3788_v55 = vpop.f32.mrf.mxu0  ;;  %v3813_v36 = vpop.f32.mrf.mxu1 }
0x1082   : > { %v3789_v8 = vadd.f32 %v7813_v1, %v3788_v55  ;;  %v3814_v9 = vadd.f32 %v7814_v2, %v3813_v36  ;;  %v1221_v2 = vld [vmem:[%s8806_s24] sm:$0xff] }
0x1084   : > { %v4139_v19 = vmul.f32 0.35355338, %v3789_v8  ;;  %v4140_v21 = vmul.f32 0.35355338, %v3814_v9 }
0x1086   : > { %v4143_v30 = vpack.c.bf16 %v4139_v19, %v4139_v19  ;;  %v4144_v31 = vpack.c.bf16 %v4140_v21, %v4140_v21 }
0x1088   : > { %v3838_v59 = vpop.f32.mrf.mxu2  ;;  %v3863_v12 = vpop.f32.mrf.mxu3 }
0x1089   : > { %v3790_v60 = vpop.f32.mrf.mxu0  ;;  %v3815_v32 = vpop.f32.mrf.mxu1  ;;  %v3839_v26 = vadd.f32 %v7815_v15, %v3838_v59  ;;  %v3864_v27 = vadd.f32 %v7816_v16, %v3863_v12 }
0x108b   : > { %v4141_v40 = vmul.f32 0.35355338, %v3839_v26  ;;  %v4142_v41 = vmul.f32 0.35355338, %v3864_v27 }
0x108d   : > { %v4145_v48 = vpack.c.bf16 %v4141_v40, %v4141_v40  ;;  %v4146_v49 = vpack.c.bf16 %v4142_v41, %v4142_v41 }
0x1090   : > { %v3840_v63 = vpop.f32.mrf.mxu2  ;;  %v3865_v0 = vpop.f32.mrf.mxu3 }
0x1091   : > { %v3955_v10 = vpop.f32.mrf.mxu0  ;;  %v3980_v3 = vpop.f32.mrf.mxu1 }
0x1092   : > { %v3956_v4 = vadd.f32 %v7817_v61, %v3955_v10  ;;  %v3981_v35 = vadd.f32 %v7818_v62, %v3980_v3 }
0x1094   : > { %v4147_v5 = vpack.c.bf16 %v3956_v4, %v3956_v4  ;;  %v4148_v6 = vpack.c.bf16 %v3981_v35, %v3981_v35 }
0x1096   : > { %v4155_v13 = vsel %vm1641_vm1, %v4147_v5, 0  ;;  %v4174_v14 = vsel %vm1641_vm1, %v4148_v6, 0 }
0x1097   : > { %4164 = vmatpush.bf16.xpose.msra.mxu0 %v4155_v13  ;;  %4183 = vmatpush.bf16.xpose.msra.mxu1 %v4174_v14 }
0x1098   : > { %v4005_v17 = vpop.f32.mrf.mxu2  ;;  %v4030_v18 = vpop.f32.mrf.mxu3 }
0x1099   : > { %v4006_v22 = vadd.f32 %v7819_v20, %v4005_v17  ;;  %v4031_v23 = vadd.f32 %v7820_v11, %v4030_v18  ;;  %v3957_v24 = vpop.f32.mrf.mxu0  ;;  %v3982_v25 = vpop.f32.mrf.mxu1 }
0x109b   : > { %v4149_v28 = vpack.c.bf16 %v4006_v22, %v4006_v22  ;;  %v4150_v29 = vpack.c.bf16 %v4031_v23, %v4031_v23 }
0x109d   : > { %v4193_v33 = vsel %vm1641_vm1, %v4149_v28, 0  ;;  %v4212_v34 = vsel %vm1641_vm1, %v4150_v29, 0 }
0x109e   : > { %4202 = vmatpush.bf16.xpose.msra.mxu2 %v4193_v33  ;;  %4221 = vmatpush.bf16.xpose.msra.mxu3 %v4212_v34 }
0x109f   : > { %7045 = vmatmul.msk.bf16.vlgmr.msra.gmra.mxu0 %vm1641_vm1, %v4143_v30  ;;  %7046 = vmatmul.msk.bf16.vlgmr.msra.gmra.mxu1 %vm1641_vm1, %v4144_v31 }
0x10a0   : > { %v4007_v43 = vpop.f32.mrf.mxu2  ;;  %v4032_v44 = vpop.f32.mrf.mxu3 }
0x10a1   : > { %v4055_v45 = vpop.f32.mrf.mxu0  ;;  %v4080_v46 = vpop.f32.mrf.mxu1 }
0x10a2   : > { %v4056_v47 = vadd.f32 %v7821_v37, %v4055_v45  ;;  %v4081_v38 = vadd.f32 %v7822_v39, %v4080_v46 }
0x10a4   : > { %v4275_v50 = vpack.c.bf16 %v4056_v47, %v4056_v47  ;;  %v4276_v51 = vpack.c.bf16 %v4081_v38, %v4081_v38 }
0x10a5   : > { %7047 = vmatmul.msk.bf16.vlgmr.msra.gmra.mxu2 %vm1641_vm1, %v4145_v48  ;;  %7048 = vmatmul.msk.bf16.vlgmr.msra.gmra.mxu3 %vm1641_vm1, %v4146_v49 }
0x10a6   : > { %v4283_v54 = vsel %vm1773_vm2, %v4275_v50, 0  ;;  %v4302_v56 = vsel %vm1773_vm2, %v4276_v51, 0 }
0x10a7   : > { %4292 = vmatpush.bf16.msrb.mxu0 %v4283_v54  ;;  %4311 = vmatpush.bf16.msrb.mxu1 %v4302_v56 }
0x10a8   : > { %v4105_v57 = vpop.f32.mrf.mxu2  ;;  %v4130_v55 = vpop.f32.mrf.mxu3 }
0x10a9   : > { %v4106_v36 = vadd.f32 %v7823_v52, %v4105_v57  ;;  %v4131_v59 = vadd.f32 %v7824_v53, %v4130_v55  ;;  %v4057_v12 = vpop.f32.mrf.mxu0  ;;  %v4082_v60 = vpop.f32.mrf.mxu1 }
0x10aa   : > { %v4134_v12 = vld [vmem:[%s9228_s20] sm:$0xf] }
0x10ab   : > { %v4277_v32 = vpack.c.bf16 %v4106_v36, %v4106_v36  ;;  %v4278_v61 = vpack.c.bf16 %v4131_v59, %v4131_v59  ;;  %v4363_v60 = vsel %vm1773_vm2, %v4134_v12, 0 }
0x10ac   : > { %4372 = vmatpush.bf16.msra.mxu0 %v4363_v60 }
0x10ad   : > { %v4321_v62 = vsel %vm1773_vm2, %v4277_v32, 0  ;;  %v4340_v63 = vsel %vm1773_vm2, %v4278_v61, 0  ;;  %v4136_v32 = vld [vmem:[%s9228_s20 + $0x8] sm:$0xf]  ;;  %v4137_v61 = vld [vmem:[%s9228_s20 + $0xc] sm:$0xf] }
0x10ae   : > { %4330 = vmatpush.bf16.msrb.mxu2 %v4321_v62  ;;  %4349 = vmatpush.bf16.msrb.mxu3 %v4340_v63  ;;  %v4401_v62 = vsel %vm1773_vm2, %v4136_v32, 0  ;;  %v4420_v63 = vsel %vm1773_vm2, %v4137_v61, 0  ;;  %v7623_v32 = vld [vmem:[%s9231_s27 + $0x8] sm:$0xff]  ;;  %v7622_v61 = vld [vmem:[%s9231_s27] sm:$0xff] }
0x10b0   : > { %v4107_v0 = vpop.f32.mrf.mxu2  ;;  %v4132_v1 = vpop.f32.mrf.mxu3 }
0x10b1   : > { %v4135_v0 = vld [vmem:[%s9228_s20 + $0x4] sm:$0xf] }
0x10b2   : > { %4410 = vmatpush.bf16.msra.mxu2 %v4401_v62  ;;  %4429 = vmatpush.bf16.msra.mxu3 %v4420_v63  ;;  %v4382_v1 = vsel %vm1773_vm2, %v4135_v0, 0  ;;  %v7828_v62 = vld [vmem:[%s9234_s2] ss:$0 sm:$0xff] }
0x10b3   : > { %4391 = vmatpush.bf16.msra.mxu1 %v4382_v1 }
0x111c   : > { %v4166_v10 = vpop.f32.mrf.mxu0  ;;  %v4185_v3 = vpop.f32.mrf.mxu1 }
0x111d   : > { %v4167_v4 = vadd.f32 %v4166_v10, %v1221_v2  ;;  %v4186_v15 = vadd.f32 %v4185_v3, %v1221_v2 }
0x111f   : > { %v4227_v35 = vsel %vm1641_vm1, %v4167_v4, -inf  ;;  %v4230_v18 = vsel %vm1641_vm1, %v4186_v15, -inf }
0x1120   : > { %4228 = vmax.xlane.f32.xlu0 %v4227_v35 }
0x1124   : > { %v4168_v5 = vpop.f32.mrf.mxu0  ;;  %v4187_v6 = vpop.f32.mrf.mxu1 }
0x1128   : > { %v4204_v8 = vpop.f32.mrf.mxu2  ;;  %v4223_v9 = vpop.f32.mrf.mxu3 }
0x1129   : > { %v4205_v20 = vadd.f32 %v4204_v8, %v1221_v2  ;;  %v4224_v11 = vadd.f32 %v4223_v9, %v1221_v2 }
0x112b   : > { %v4233_v13 = vsel %vm1641_vm1, %v4205_v20, -inf  ;;  %v4236_v14 = vsel %vm1641_vm1, %v4224_v11, -inf }
0x112c   : > { %4234 = vmax.xlane.f32.xlu1 %v4233_v13  ;;  %4237 = vmax.xlane.f32.xlu2 %v4236_v14 }
0x1130   : > { %v4206_v16 = vpop.f32.mrf.mxu2  ;;  %v4225_v17 = vpop.f32.mrf.mxu3 }
0x1134   : > { %4231 = vmax.xlane.f32.xlu1 %v4230_v18 }
0x1193   : > { %v4229_v19 = vpop.xlane.xlu0 %4228 }
0x1194   : > { %v4239_v21 = vsub.f32 %v4167_v4, %v4229_v19 }
0x1196   : > { %v4243_v22 = vmul.f32 1.442695, %v4239_v21 }
0x1198   : > { %7926 = vpow2.f32 %v4243_v22 }
0x119e   : > { %v7927_v23 = vpop.eup %7926 }
0x119f   : > { %v4235_v24 = vpop.xlane.xlu1 %4234  ;;  %v4238_v25 = vpop.xlane.xlu2 %4237  ;;  %v4251_v26 = vsel %vm1641_vm1, %v7927_v23, 0.0 }
0x11a0   : > { %v4241_v27 = vsub.f32 %v4205_v20, %v4235_v24  ;;  %v4242_v28 = vsub.f32 %v4224_v11, %v4238_v25  ;;  %4252 = vadd.xlane.f32.xlu1 %v4251_v26  ;;  %v7825_v25 = vld [vmem:[%s9229_s23] ss:$0 sm:$0xff] }
0x11a2   : > { %v4247_v29 = vmul.f32 1.442695, %v4241_v27  ;;  %v4249_v30 = vmul.f32 1.442695, %v4242_v28 }
0x11a4   : > { %7928 = vpow2.f32 %v4247_v29 }
0x11a5   : > { %7930 = vpow2.f32 %v4249_v30 }
0x11a7   : > { %v4232_v31 = vpop.xlane.xlu1 %4231 }
0x11a8   : > { %v4240_v33 = vsub.f32 %v4186_v15, %v4232_v31 }
0x11aa   : > { %v7929_v34 = vpop.eup %7928  ;;  %v4245_v37 = vmul.f32 1.442695, %v4240_v33 }
0x11ab   : > { %v7931_v39 = vpop.eup %7930  ;;  %v4257_v40 = vsel %vm1641_vm1, %v7929_v34, 0.0 }
0x11ac   : > { %7932 = vpow2.f32 %v4245_v37  ;;  %4258 = vadd.xlane.f32.xlu2 %v4257_v40  ;;  %v4260_v41 = vsel %vm1641_vm1, %v7931_v39, 0.0 }
0x11ad   : > { %4261 = vadd.xlane.f32.xlu0 %v4260_v41 }
0x11b2   : > { %v7933_v43 = vpop.eup %7932 }
0x11b3   : > { %v4254_v44 = vsel %vm1641_vm1, %v7933_v43, 0.0 }
0x11b4   : > { %4255 = vadd.xlane.f32.xlu2 %v4254_v44  ;;  %v7621_v44 = vld [vmem:[%s9230_s25 + $0x8] sm:$0xff] }
0x1213   : > { %v4253_v45 = vpop.xlane.xlu1 %4252 }
0x1214   : > { %7934 = vrcp.f32 %v4253_v45  ;;  %v7620_v45 = vld [vmem:[%s9230_s25] sm:$0xff] }
0x121a   : > { %v7935_v46 = vpop.eup %7934 }
0x121b   : > { %v4267_v47 = vmul.f32 %v7935_v46, %v7927_v23  ;;  %v7625_v46 = vld [vmem:[%s9231_s27 + $0x18] sm:$0xff] }
0x121d   : > { %v4271_v38 = vpack.c.bf16 %v4267_v47, %v4267_v47 }
0x121f   : > { %7049 = vmatmul.msk.bf16.vlgmr.msrb.gmra.mxu0 %vm1641_vm1, %v4271_v38  ;;  %v4259_v48 = vpop.xlane.xlu2 %4258  ;;  %v7624_v38 = vld [vmem:[%s9231_s27 + $0x10] sm:$0xff] }
0x1220   : > { %v4262_v49 = vpop.xlane.xlu0 %4261  ;;  %7936 = vrcp.f32 %v4259_v48  ;;  %4518 = vmatpush.bf16.msrb.mxu0 %v7621_v44 }
0x1221   : > { %7938 = vrcp.f32 %v4262_v49 }
0x1224   : > { %4519 = vmatpush.bf16.msrb.mxu0 %v7620_v45 }
0x1226   : > { %v7937_v50 = vpop.eup %7936 }
0x1227   : > { %v7939_v51 = vpop.eup %7938  ;;  %v4269_v52 = vmul.f32 %v7937_v50, %v7929_v34  ;;  %v4256_v53 = vpop.xlane.xlu2 %4255 }
0x1228   : > { %v4270_v54 = vmul.f32 %v7939_v51, %v7931_v39  ;;  %7940 = vrcp.f32 %v4256_v53 }
0x1229   : > { %v4273_v56 = vpack.c.bf16 %v4269_v52, %v4269_v52 }
0x122a   : > { %v4274_v57 = vpack.c.bf16 %v4270_v54, %v4270_v54 }
0x122b   : > { %7051 = vmatmul.msk.bf16.vlgmr.msrb.gmra.mxu2 %vm1641_vm1, %v4273_v56  ;;  %v7826_v56 = vld [vmem:[%s9232_s29] ss:$0 sm:$0xff] }
0x122c   : > { %7052 = vmatmul.msk.bf16.vlgmr.msrb.gmra.mxu3 %vm1641_vm1, %v4274_v57 }
0x122e   : > { %v7941_v55 = vpop.eup %7940 }
0x122f   : > { %v4268_v36 = vmul.f32 %v7941_v55, %v7933_v43  ;;  %v7827_v55 = vld [vmem:[%s9233_s30] ss:$0 sm:$0xff] }
0x1231   : > { %v4272_v59 = vpack.c.bf16 %v4268_v36, %v4268_v36 }
0x1233   : > { %7050 = vmatmul.msk.bf16.vlgmr.msrb.gmra.mxu1 %vm1641_vm1, %v4272_v59 }
0x1234   : > { %4561 = vmatpush.bf16.msrb.mxu1 %v7625_v46  ;;  %v7830_v46 = vld [vmem:[%s8272_s17] ss:$0 sm:$0xff] }
0x1238   : > { %4562 = vmatpush.bf16.msrb.mxu1 %v7624_v38 }
0x123c   : > { %4563 = vmatpush.bf16.msrb.mxu1 %v7623_v32 }
0x1240   : > { %4564 = vmatpush.bf16.msrb.mxu1 %v7622_v61 }
0x129c   : > { %v4294_v2 = vpop.f32.mrf.mxu0 }
0x129d   : > { %v4355_v10 = vpack.c.bf16 %v4294_v2, %v4294_v2 }
0x129f   : > { %7053 = vmatmul.msk.bf16.vlgmr.msra.gmra.mxu0 %vm1641_vm1, %v4355_v10 }
0x12a4   : > { %v4296_v3 = vpop.f32.mrf.mxu0 }
0x12a5   : > { %v7829_v3 = vld [vmem:[%s9235_s18] ss:$0 sm:$0xff] }
0x12ae   : > { %v4332_v4 = vpop.f32.mrf.mxu2 }
0x12af   : > { %v4357_v35 = vpack.c.bf16 %v4332_v4, %v4332_v4  ;;  %v4351_v5 = vpop.f32.mrf.mxu3 }
0x12b0   : > { %v4358_v6 = vpack.c.bf16 %v4351_v5, %v4351_v5  ;;  %v4313_v8 = vpop.f32.mrf.mxu1 }
0x12b1   : > { %v4356_v9 = vpack.c.bf16 %v4313_v8, %v4313_v8  ;;  %7055 = vmatmul.msk.bf16.vlgmr.msra.gmra.mxu2 %vm1641_vm1, %v4357_v35 }
0x12b2   : > { %7056 = vmatmul.msk.bf16.vlgmr.msra.gmra.mxu3 %vm1641_vm1, %v4358_v6 }
0x12b3   : > { %7054 = vmatmul.msk.bf16.vlgmr.msra.gmra.mxu1 %vm1641_vm1, %v4356_v9 }
0x12b6   : > { %v4334_v20 = vpop.f32.mrf.mxu2 }
0x12b7   : > { %v4353_v11 = vpop.f32.mrf.mxu3 }
0x12b8   : > { %v4315_v13 = vpop.f32.mrf.mxu1 }
0x131c   : > { %v4374_v14 = vpop.f32.mrf.mxu0 }
0x131d   : > { %v4435_v18 = vsel %vm1332_vm0, %v4374_v14, 0.0 }
0x1324   : > { %v4376_v15 = vpop.f32.mrf.mxu0 }
0x1325   : > { %v7627_v15 = vld [vmem:[%s9216_s28 + $0xc8] sm:$0xff] }
0x1326   : > { %4723 = vmatpush.bf16.msrb.mxu2 %v7627_v15  ;;  %v7834_v15 = vld [vmem:[%s9217_s11 + $0xc] ss:$0 sm:$0xff] }
0x1330   : > { %v4393_v16 = vpop.f32.mrf.mxu1 }
0x1331   : > { %v4436_v17 = vsel %vm1332_vm0, %v4393_v16, 0.0  ;;  %v7629_v16 = vld [vmem:[%s9216_s28 + $0xd8] sm:$0xff] }
0x1332   : > { %v4437_v19 = vadd.f32 %v4436_v17, %v4435_v18  ;;  %v7631_v17 = vld [vmem:[%s9216_s28 + $0xe8] sm:$0xff]  ;;  %v7633_v18 = vld [vmem:[%s9216_s28 + $0xf8] sm:$0xff]  ;;  %4748 = vmatpush.bf16.msrb.mxu3 %v7629_v16 }
0x1333   : > { %4773 = vmatpush.bf16.msra.mxu0 %v7631_v17  ;;  %4798 = vmatpush.bf16.msra.mxu1 %v7633_v18  ;;  %v7835_v16 = vld [vmem:[%s9217_s11 + $0xd] ss:$0 sm:$0xff] }
0x1334   : > { %v4412_v21 = vpop.f32.mrf.mxu2 }
0x1335   : > { %v4438_v22 = vsel %vm1332_vm0, %v4412_v21, 0.0  ;;  %v4431_v23 = vpop.f32.mrf.mxu3  ;;  %v7628_v21 = vld [vmem:[%s9216_s28 + $0xd0] sm:$0xff] }
0x1336   : > { %v4439_v24 = vadd.f32 %v4438_v22, %v4437_v19  ;;  %v4440_v26 = vsel %vm1332_vm0, %v4431_v23, 0.0  ;;  %v7626_v19 = vld [vmem:[%s9216_s28 + $0xc0] sm:$0xff]  ;;  %v7632_v23 = vld [vmem:[%s9216_s28 + $0xf0] sm:$0xff]  ;;  %4749 = vmatpush.bf16.msrb.mxu3 %v7628_v21 }
0x1337   : > { %v7630_v22 = vld [vmem:[%s9216_s28 + $0xe0] sm:$0xff]  ;;  %4724 = vmatpush.bf16.msrb.mxu2 %v7626_v19  ;;  %4799 = vmatpush.bf16.msra.mxu1 %v7632_v23 }
0x1338   : > { %v4441_v27 = vadd.f32 %v4440_v26, %v4439_v24  ;;  %v4395_v28 = vpop.f32.mrf.mxu1  ;;  %4774 = vmatpush.bf16.msra.mxu0 %v7630_v22  ;;  %v7637_v26 = vld [vmem:[%s9216_s28 + $0x118] sm:$0xff] }
0x133a   : > { %v4445_v29 = vadd.f32 %v7825_v25, %v4441_v27  ;;  %v7635_v25 = vld [vmem:[%s9216_s28 + $0x108] sm:$0xff]  ;;  %4848 = vmatpush.bf16.msra.mxu3 %v7637_v26 }
0x133b   : > { %v7639_v27 = vld [vmem:[%s9216_s28 + $0x128] sm:$0xff]  ;;  %4823 = vmatpush.bf16.msra.mxu2 %v7635_v25 }
0x133c   : > { %v4414_v30 = vpop.f32.mrf.mxu2  ;;  %v4446_v31 = vadd.f32 %v4445_v29, %v8743_v42  ;;  %v7641_v29 = vld [vmem:[%s9216_s28 + $0x138] sm:$0xff] }
0x133d   : > { %v4433_v33 = vpop.f32.mrf.mxu3  ;;  %v7634_v30 = vld [vmem:[%s9216_s28 + $0x100] sm:$0xff] }
0x133e   : > { %v4449_v34 = vsel %vm1332_vm0, %v4446_v31, 0.0 }
0x133f   : > { %4450 = vadd.xlane.f32.xlu0 %v4449_v34  ;;  %v7638_v34 = vld [vmem:[%s9216_s28 + $0x120] sm:$0xff]  ;;  %4824 = vmatpush.bf16.msra.mxu2 %v7634_v30 }
0x13b2   : > { %v4451_v37 = vpop.xlane.xlu0 %4450 }
0x13b3   : > { %v4452_v39 = vmul.f32 %v4451_v37, %v8446_v7  ;;  %v7640_v37 = vld [vmem:[%s9216_s28 + $0x130] sm:$0xff] }
0x13b5   : > { %v4453_v40 = vsub.f32 %v4446_v31, %v4452_v39  ;;  %v7636_v31 = vld [vmem:[%s9216_s28 + $0x110] sm:$0xff] }
0x13b6   : > { %4849 = vmatpush.bf16.msra.mxu3 %v7636_v31 }
0x13b7   : > { %v4454_v41 = vmul.f32 %v4453_v40, %v4453_v40 }
0x13b9   : > { %v4455_v43 = vsel %vm1332_vm0, %v4454_v41, 0.0 }
0x13ba   : > { %4456 = vadd.xlane.f32.xlu1 %v4455_v43 }
0x142d   : > { %v4457_v42 = vpop.xlane.xlu1 %4456 }
0x142e   : > { %v4458_v47 = vmul.f32 %v4457_v42, %v8446_v7 }
0x1430   : > { %v4459_v48 = vadd.f32 1e-05, %v4458_v47  ;;  %v7831_v47 = vld [vmem:[%s9194_s9] ss:$0 sm:$0xff] }
0x1432   : > { %7942 = vrsqrt.f32 %v4459_v48  ;;  %vm4466_vm9 = vweird.f32 %v4459_v48 }
0x1438   : > { %v7943_v49 = vpop.eup %7942 }
0x1439   : > { %v4461_v50 = vmul.f32 %v7943_v49, %v4459_v48  ;;  %vm4467_vm8 = vweird.f32 %v7943_v49 }
0x143a   : > { %vm4468_vm10 = vmor %vm4466_vm9, %vm4467_vm8 }
0x143b   : > { %v4462_v51 = vmul.f32 %v7943_v49, %v4461_v50 }
0x143d   : > { %v4463_v52 = vmul.f32 0.5, %v4462_v51  ;;  %v7643_v51 = vld [vmem:[%s9216_s28 + $0x148] sm:$0xff] }
0x143f   : > { %v4464_v53 = vsub.f32 1.5, %v4463_v52  ;;  %v7645_v52 = vld [vmem:[%s9216_s28 + $0x158] sm:$0xff] }
0x1441   : > { %v4465_v54 = vmul.f32 %v7943_v49, %v4464_v53  ;;  %v7647_v53 = vld [vmem:[%s9216_s28 + $0x168] sm:$0xff] }
0x1443   : > { %v4469_v57 = vsel %vm4468_vm10, %v7943_v49, %v4465_v54  ;;  %v7649_v54 = vld [vmem:[%s9216_s28 + $0x178] sm:$0xff] }
0x1444   : > { %v4470_v36 = vmul.f32 %v4469_v57, %v4453_v40  ;;  %v7644_v57 = vld [vmem:[%s9216_s28 + $0x150] sm:$0xff] }
0x1446   : > { %v4474_v59 = vmul.f32 %v7826_v56, %v4470_v36  ;;  %v7642_v56 = vld [vmem:[%s9216_s28 + $0x140] sm:$0xff]  ;;  %v7648_v36 = vld [vmem:[%s9216_s28 + $0x170] sm:$0xff] }
0x1448   : > { %v4478_v12 = vadd.f32 %v7827_v55, %v4474_v59  ;;  %v7646_v55 = vld [vmem:[%s9216_s28 + $0x160] sm:$0xff] }
0x144a   : > { %v4479_v60 = vpack.c.bf16 %v4478_v12, %v4478_v12 }
0x144c   : > { %7065 = vmatmul.msk.bf16.vlgmr.msrb.gmra.mxu0 %vm1332_vm0, %v4479_v60 }
0x144d   : > { %4873 = vmatpush.bf16.msrb.mxu0 %v7639_v27 }
0x1451   : > { %4874 = vmatpush.bf16.msrb.mxu0 %v7638_v34 }
0x14c9   : > { %v4521_v63 = vpop.f32.mrf.mxu0 }
0x14ca   : > { %v4522_v0 = vadd.f32 %v7828_v62, %v4521_v63 }
0x14cc   : > { %v4525_v1 = vmax.f32 %v4522_v0, 0.0 }
0x14ce   : > { %v4526_v2 = vpack.c.bf16 %v4525_v1, %v4525_v1  ;;  %v7836_v1 = vld [vmem:[%s9217_s11 + $0x12] ss:$0 sm:$0xff] }
0x14d0   : > { %7082 = vmatmul.msk.bf16.vlgmr.msrb.gmra.mxu1 %vm2053_vm7, %v4526_v2  ;;  %v7837_v2 = vld [vmem:[%s9217_s11 + $0x13] ss:$0 sm:$0xff] }
0x14d1   : > { %v4523_v10 = vpop.f32.mrf.mxu0  ;;  %4898 = vmatpush.bf16.msrb.mxu1 %v7641_v29 }
0x14d2   : > { %v7832_v10 = vld [vmem:[%s9217_s11 + $0xe] ss:$0 sm:$0xff] }
0x14d5   : > { %4899 = vmatpush.bf16.msrb.mxu1 %v7640_v37 }
0x154d   : > { %v4566_v4 = vpop.f32.mrf.mxu1 }
0x154e   : > { %v4567_v35 = vadd.f32 %v7829_v3, %v4566_v4  ;;  %v7833_v3 = vld [vmem:[%s9217_s11 + $0xf] ss:$0 sm:$0xff] }
0x1550   : > { %v4570_v5 = vadd.f32 %v4567_v35, %v4478_v12 }
0x1552   : > { %v4573_v6 = vsel %vm1332_vm0, %v4570_v5, 0.0 }
0x1553   : > { %4574 = vadd.xlane.f32.xlu2 %v4573_v6 }
0x1555   : > { %v4568_v8 = vpop.f32.mrf.mxu1 }
0x1556   : > { %v7838_v8 = vld [vmem:[%s9217_s11 + $0x10] ss:$0 sm:$0xff] }
0x15c6   : > { %v4575_v9 = vpop.xlane.xlu2 %4574 }
0x15c7   : > { %v4576_v20 = vmul.f32 %v4575_v9, %v8446_v7  ;;  %v7839_v9 = vld [vmem:[%s9217_s11 + $0x11] ss:$0 sm:$0xff] }
0x15c9   : > { %v4577_v11 = vsub.f32 %v4570_v5, %v4576_v20 }
0x15cb   : > { %v4578_v13 = vmul.f32 %v4577_v11, %v4577_v11 }
0x15cd   : > { %v4579_v14 = vsel %vm1332_vm0, %v4578_v13, 0.0 }
0x15ce   : > { %4580 = vadd.xlane.f32.xlu0 %v4579_v14 }
0x1641   : > { %v4581_v24 = vpop.xlane.xlu0 %4580 }
0x1642   : > { %v4582_v28 = vmul.f32 %v4581_v24, %v8446_v7 }
0x1644   : > { %v4583_v33 = vadd.f32 1e-05, %v4582_v28 }
0x1646   : > { %7944 = vrsqrt.f32 %v4583_v33  ;;  %vm4590_vm12 = vweird.f32 %v4583_v33 }
0x164c   : > { %v7945_v39 = vpop.eup %7944 }
0x164d   : > { %v4585_v40 = vmul.f32 %v7945_v39, %v4583_v33  ;;  %vm4591_vm11 = vweird.f32 %v7945_v39 }
0x164e   : > { %vm4592_vm13 = vmor %vm4590_vm12, %vm4591_vm11 }
0x164f   : > { %v4586_v41 = vmul.f32 %v7945_v39, %v4585_v40 }
0x1651   : > { %v4587_v43 = vmul.f32 0.5, %v4586_v41 }
0x1653   : > { %v4588_v44 = vsub.f32 1.5, %v4587_v43 }
0x1655   : > { %v4589_v45 = vmul.f32 %v7945_v39, %v4588_v44 }
0x1657   : > { %v4593_v42 = vsel %vm4592_vm13, %v7945_v39, %v4589_v45  ;;  %v7840_v45 = vld [vmem:[%s9217_s11 + $0x16] ss:$0 sm:$0xff] }
0x1658   : > { %v4594_v38 = vmul.f32 %v4593_v42, %v4577_v11 }
0x165a   : > { %v4598_v48 = vmul.f32 %v7830_v46, %v4594_v38  ;;  %v7841_v46 = vld [vmem:[%s9217_s11 + $0x17] ss:$0 sm:$0xff] }
0x165c   : > { %v8877_v49 = vadd.f32 %v7831_v47, %v4598_v48 }
0x165e   : > { %v4603_v50 = vpack.c.bf16 %v8877_v49, %v8877_v49 }
0x1660   : > { %7151 = vmatmul.msk.bf16.vlgmr.msrb.gmra.mxu2 %vm1332_vm0, %v4603_v50  ;;  %7160 = vmatmul.msk.bf16.vlgmr.msrb.gmra.mxu3 %vm1332_vm0, %v4603_v50 }
0x1661   : > { %7169 = vmatmul.msk.bf16.vlgmr.msra.gmra.mxu0 %vm1332_vm0, %v4603_v50  ;;  %7178 = vmatmul.msk.bf16.vlgmr.msra.gmra.mxu1 %vm1332_vm0, %v4603_v50 }
0x1662   : > { %4923 = vmatpush.bf16.msrb.mxu2 %v7643_v51  ;;  %4948 = vmatpush.bf16.msrb.mxu3 %v7645_v52  ;;  %v7842_v52 = vld [vmem:[%s9217_s11 + $0x14] ss:$0 sm:$0xff] }
0x1663   : > { %4973 = vmatpush.bf16.msra.mxu0 %v7647_v53  ;;  %4998 = vmatpush.bf16.msra.mxu1 %v7649_v54  ;;  %v7843_v53 = vld [vmem:[%s9217_s11 + $0x15] ss:$0 sm:$0xff] }
0x1666   : > { %4924 = vmatpush.bf16.msrb.mxu2 %v7642_v56  ;;  %4949 = vmatpush.bf16.msrb.mxu3 %v7644_v57 }
0x1667   : > { %4974 = vmatpush.bf16.msra.mxu0 %v7646_v55  ;;  %4999 = vmatpush.bf16.msra.mxu1 %v7648_v36 }
0x1670   : > { %7187 = vmatmul.msk.bf16.vlgmr.msra.gmra.mxu2 %vm1332_vm0, %v4603_v50  ;;  %7196 = vmatmul.msk.bf16.vlgmr.msra.gmra.mxu3 %vm1332_vm0, %v4603_v50 }
0x1671   : > { %7205 = vmatmul.msk.bf16.vlgmr.msrb.gmra.mxu0 %vm1332_vm0, %v4603_v50  ;;  %7214 = vmatmul.msk.bf16.vlgmr.msrb.gmra.mxu1 %vm1332_vm0, %v4603_v50 }
0x1680   : > { %7223 = vmatmul.msk.bf16.vlgmr.msrb.gmra.mxu2 %vm1332_vm0, %v4603_v50  ;;  %7232 = vmatmul.msk.bf16.vlgmr.msrb.gmra.mxu3 %vm1332_vm0, %v4603_v50 }
0x1681   : > { %7241 = vmatmul.msk.bf16.vlgmr.msra.gmra.mxu0 %vm1332_vm0, %v4603_v50  ;;  %7250 = vmatmul.msk.bf16.vlgmr.msra.gmra.mxu1 %vm1332_vm0, %v4603_v50 }
0x16de   : > { %v4776_v59 = vpop.f32.mrf.mxu0  ;;  %v4801_v12 = vpop.f32.mrf.mxu1 }
0x16df   : > { %v4777_v20 = vadd.f32 %v7832_v10, %v4776_v59  ;;  %v4802_v11 = vadd.f32 %v7833_v3, %v4801_v12 }
0x16e1   : > { %v5014_v24 = vmul.f32 0.35355338, %v4777_v20  ;;  %v5015_v25 = vmul.f32 0.35355338, %v4802_v11 }
0x16e3   : > { %v4726_v60 = vpop.f32.mrf.mxu2  ;;  %v4751_v32 = vpop.f32.mrf.mxu3  ;;  %v5018_v37 = vpack.c.bf16 %v5014_v24, %v5014_v24  ;;  %v5019_v39 = vpack.c.bf16 %v5015_v25, %v5015_v25 }
0x16e4   : > { %v4727_v26 = vadd.f32 %v7834_v15, %v4726_v60  ;;  %v4752_v27 = vadd.f32 %v7835_v16, %v4751_v32 }
0x16e6   : > { %v4778_v61 = vpop.f32.mrf.mxu0  ;;  %v4803_v62 = vpop.f32.mrf.mxu1  ;;  %v5012_v40 = vmul.f32 0.35355338, %v4727_v26  ;;  %v5013_v41 = vmul.f32 0.35355338, %v4752_v27 }
0x16e8   : > { %v5016_v42 = vpack.c.bf16 %v5012_v40, %v5012_v40  ;;  %v5017_v47 = vpack.c.bf16 %v5013_v41, %v5013_v41 }
0x16eb   : > { %v4728_v63 = vpop.f32.mrf.mxu2  ;;  %v4753_v0 = vpop.f32.mrf.mxu3 }
0x16ee   : > { %v4876_v4 = vpop.f32.mrf.mxu0  ;;  %v4901_v35 = vpop.f32.mrf.mxu1 }
0x16ef   : > { %v4877_v5 = vadd.f32 %v7836_v1, %v4876_v4  ;;  %v4902_v6 = vadd.f32 %v7837_v2, %v4901_v35  ;;  %v7984_v35 = vld [vmem:[%s8647_s3] sm:$0xff]  ;;  %s1195_s3 = sand.u32 1, %s8040_s16  }
0x16f0   : > { %s6436_s18 = sshll.u32 %s1195_s3, 3 }
0x16f1   : > { %v5022_v13 = vpack.c.bf16 %v4877_v5, %v4877_v5  ;;  %v5023_v14 = vpack.c.bf16 %v4902_v6, %v4902_v6 }
0x16f3   : > { %v5066_v17 = vsel %vm1641_vm1, %v5022_v13, 0  ;;  %v5085_v18 = vsel %vm1641_vm1, %v5023_v14, 0  ;;  %v4826_v19 = vpop.f32.mrf.mxu2  ;;  %v4851_v21 = vpop.f32.mrf.mxu3 }
0x16f4   : > { %v4827_v22 = vadd.f32 %v7838_v8, %v4826_v19  ;;  %v4852_v23 = vadd.f32 %v7839_v9, %v4851_v21  ;;  %5075 = vmatpush.bf16.xpose.msrb.mxu0 %v5066_v17  ;;  %5094 = vmatpush.bf16.xpose.msrb.mxu1 %v5085_v18 }
0x16f6   : > { %v5020_v28 = vpack.c.bf16 %v4827_v22, %v4827_v22  ;;  %v5021_v29 = vpack.c.bf16 %v4852_v23, %v4852_v23  ;;  %v4878_v30 = vpop.f32.mrf.mxu0  ;;  %v4903_v31 = vpop.f32.mrf.mxu1 }
0x16f8   : > { %v5028_v33 = vsel %vm1641_vm1, %v5020_v28, 0  ;;  %v5047_v34 = vsel %vm1641_vm1, %v5021_v29, 0 }
0x16f9   : > { %5037 = vmatpush.bf16.xpose.msra.mxu2 %v5028_v33  ;;  %5056 = vmatpush.bf16.xpose.msra.mxu3 %v5047_v34 }
0x16fb   : > { %7258 = vmatmul.msk.bf16.vlgmr.msrb.gmra.mxu0 %vm1641_vm1, %v5018_v37  ;;  %7259 = vmatmul.msk.bf16.vlgmr.msrb.gmra.mxu1 %vm1641_vm1, %v5019_v39  ;;  %v4828_v43 = vpop.f32.mrf.mxu2  ;;  %v4853_v44 = vpop.f32.mrf.mxu3 }
0x16fe   : > { %v4976_v38 = vpop.f32.mrf.mxu0  ;;  %v5001_v48 = vpop.f32.mrf.mxu1 }
0x16ff   : > { %v4977_v50 = vadd.f32 %v7840_v45, %v4976_v38  ;;  %v5002_v51 = vadd.f32 %v7841_v46, %v5001_v48 }
0x1700   : > { %7256 = vmatmul.msk.bf16.vlgmr.msra.gmra.mxu2 %vm1641_vm1, %v5016_v42  ;;  %7257 = vmatmul.msk.bf16.vlgmr.msra.gmra.mxu3 %vm1641_vm1, %v5017_v47 }
0x1701   : > { %v5150_v54 = vpack.c.bf16 %v4977_v50, %v4977_v50  ;;  %v5151_v56 = vpack.c.bf16 %v5002_v51, %v5002_v51 }
0x1703   : > { %v5194_v57 = vsel %vm1773_vm2, %v5150_v54, 0  ;;  %v5213_v55 = vsel %vm1773_vm2, %v5151_v56, 0  ;;  %v4926_v36 = vpop.f32.mrf.mxu2  ;;  %v4951_v59 = vpop.f32.mrf.mxu3 }
0x1704   : > { %v4927_v12 = vadd.f32 %v7842_v52, %v4926_v36  ;;  %v4952_v60 = vadd.f32 %v7843_v53, %v4951_v59  ;;  %5203 = vmatpush.bf16.msra.mxu0 %v5194_v57  ;;  %5222 = vmatpush.bf16.msra.mxu1 %v5213_v55 }
0x1706   : > { %v5148_v32 = vpack.c.bf16 %v4927_v12, %v4927_v12  ;;  %v5149_v61 = vpack.c.bf16 %v4952_v60, %v4952_v60  ;;  %v4978_v62 = vpop.f32.mrf.mxu0  ;;  %v5003_v63 = vpop.f32.mrf.mxu1 }
0x1707   : > { %v7251_v62 = vld [vmem:[%s9219_s1 + $0x10] sm:$0xf]  ;;  %v7252_v63 = vld [vmem:[%s9219_s1 + $0x14] sm:$0xf] }
0x1708   : > { %v5156_v0 = vsel %vm1773_vm2, %v5148_v32, 0  ;;  %v5175_v1 = vsel %vm1773_vm2, %v5149_v61, 0  ;;  %v7253_v32 = vld [vmem:[%s9219_s1 + $0x18] sm:$0xf] }
0x1709   : > { %5165 = vmatpush.bf16.msrb.mxu2 %v5156_v0  ;;  %5184 = vmatpush.bf16.msrb.mxu3 %v5175_v1  ;;  %v5274_v61 = vsel %vm1773_vm2, %v7253_v32, 0  ;;  %v5236_v0 = vsel %vm1773_vm2, %v7251_v62, 0  ;;  %v5255_v1 = vsel %vm1773_vm2, %v7252_v63, 0  ;;  %v7664_v32 = vld [vmem:[%s9222_s8 + $0xb0] sm:$0xff] }
0x170a   : > { %5283 = vmatpush.bf16.msrb.mxu0 %v5274_v61 }
0x170b   : > { %v4928_v2 = vpop.f32.mrf.mxu2  ;;  %v4953_v10 = vpop.f32.mrf.mxu3 }
0x170c   : > { %v7254_v2 = vld [vmem:[%s9219_s1 + $0x1c] sm:$0xf] }
0x170d   : > { %5245 = vmatpush.bf16.msra.mxu2 %v5236_v0  ;;  %5264 = vmatpush.bf16.msra.mxu3 %v5255_v1  ;;  %v5293_v10 = vsel %vm1773_vm2, %v7254_v2, 0 }
0x170e   : > { %5302 = vmatpush.bf16.msrb.mxu1 %v5293_v10  ;;  %v7845_v10 = vld [vmem:[%s9223_s12 + $0x1] ss:$0 sm:$0xff] }
0x1778   : > { %v5077_v3 = vpop.f32.mrf.mxu0  ;;  %v5096_v4 = vpop.f32.mrf.mxu1 }
0x1779   : > { %v5078_v5 = vadd.f32 %v7984_v35, %v5077_v3  ;;  %v5097_v17 = vadd.f32 %v7984_v35, %v5096_v4 }
0x177b   : > { %v5106_v6 = vsel %vm1641_vm1, %v5078_v5, -inf  ;;  %v5109_v21 = vsel %vm1641_vm1, %v5097_v17, -inf }
0x177c   : > { %5107 = vmax.xlane.f32.xlu0 %v5106_v6 }
0x1780   : > { %v5079_v8 = vpop.f32.mrf.mxu0  ;;  %v5098_v9 = vpop.f32.mrf.mxu1 }
0x1783   : > { %v5039_v20 = vpop.f32.mrf.mxu2  ;;  %v5058_v11 = vpop.f32.mrf.mxu3 }
0x1784   : > { %v5040_v13 = vadd.f32 %v7984_v35, %v5039_v20  ;;  %v5059_v14 = vadd.f32 %v7984_v35, %v5058_v11 }
0x1786   : > { %v5103_v15 = vsel %vm1641_vm1, %v5059_v14, -inf  ;;  %v5100_v16 = vsel %vm1641_vm1, %v5040_v13, -inf }
0x1787   : > { %5104 = vmax.xlane.f32.xlu2 %v5103_v15  ;;  %5101 = vmax.xlane.f32.xlu1 %v5100_v16 }
0x178b   : > { %v5041_v18 = vpop.f32.mrf.mxu2  ;;  %v5060_v19 = vpop.f32.mrf.mxu3 }
0x178f   : > { %5110 = vmax.xlane.f32.xlu1 %v5109_v21 }
0x17ef   : > { %v5108_v22 = vpop.xlane.xlu0 %5107 }
0x17f0   : > { %v5114_v23 = vsub.f32 %v5078_v5, %v5108_v22 }
0x17f2   : > { %v5120_v24 = vmul.f32 1.442695, %v5114_v23 }
0x17f4   : > { %7946 = vpow2.f32 %v5120_v24 }
0x17fa   : > { %v7947_v25 = vpop.eup %7946  ;;  %v5105_v26 = vpop.xlane.xlu2 %5104 }
0x17fb   : > { %v5102_v27 = vpop.xlane.xlu1 %5101  ;;  %v5113_v28 = vsub.f32 %v5059_v14, %v5105_v26  ;;  %v5130_v30 = vsel %vm1641_vm1, %v7947_v25, 0.0 }
0x17fc   : > { %v5112_v29 = vsub.f32 %v5040_v13, %v5102_v27  ;;  %5131 = vadd.xlane.f32.xlu1 %v5130_v30 }
0x17fd   : > { %v5118_v31 = vmul.f32 1.442695, %v5113_v28  ;;  %v7844_v28 = vld [vmem:[%s9220_s5 + $0x1] ss:$0 sm:$0xff] }
0x17fe   : > { %v5116_v33 = vmul.f32 1.442695, %v5112_v29 }
0x17ff   : > { %7948 = vpow2.f32 %v5118_v31 }
0x1800   : > { %7950 = vpow2.f32 %v5116_v33 }
0x1803   : > { %v5111_v34 = vpop.xlane.xlu1 %5110 }
0x1804   : > { %v5115_v37 = vsub.f32 %v5097_v17, %v5111_v34 }
0x1805   : > { %v7949_v39 = vpop.eup %7948 }
0x1806   : > { %v5122_v40 = vmul.f32 1.442695, %v5115_v37  ;;  %v7951_v41 = vpop.eup %7950  ;;  %v5127_v43 = vsel %vm1641_vm1, %v7949_v39, 0.0 }
0x1807   : > { %5128 = vadd.xlane.f32.xlu0 %v5127_v43  ;;  %v5124_v44 = vsel %vm1641_vm1, %v7951_v41, 0.0 }
0x1808   : > { %7952 = vpow2.f32 %v5122_v40  ;;  %5125 = vadd.xlane.f32.xlu2 %v5124_v44 }
0x180e   : > { %v7953_v45 = vpop.eup %7952 }
0x180f   : > { %v5133_v46 = vsel %vm1641_vm1, %v7953_v45, 0.0 }
0x1810   : > { %5134 = vadd.xlane.f32.xlu2 %v5133_v46  ;;  %v7651_v46 = vld [vmem:[%s9221_s6 + $0x48] sm:$0xff] }
0x186f   : > { %v5132_v42 = vpop.xlane.xlu1 %5131 }
0x1870   : > { %7954 = vrcp.f32 %v5132_v42  ;;  %v7653_v42 = vld [vmem:[%s9221_s6 + $0x58] sm:$0xff] }
0x1876   : > { %v7955_v47 = vpop.eup %7954 }
0x1877   : > { %v5142_v38 = vmul.f32 %v7955_v47, %v7947_v25  ;;  %v7655_v47 = vld [vmem:[%s9221_s6 + $0x68] sm:$0xff] }
0x1879   : > { %v5146_v48 = vpack.c.bf16 %v5142_v38, %v5142_v38  ;;  %v7650_v38 = vld [vmem:[%s9221_s6 + $0x40] sm:$0xff] }
0x187a   : > { %v5129_v50 = vpop.xlane.xlu0 %5128 }
0x187b   : > { %7956 = vrcp.f32 %v5129_v50  ;;  %v5126_v51 = vpop.xlane.xlu2 %5125  ;;  %7262 = vmatmul.msk.bf16.vlgmr.msra.gmra.mxu0 %vm1641_vm1, %v5146_v48  ;;  %v7652_v48 = vld [vmem:[%s9221_s6 + $0x50] sm:$0xff]  ;;  %v7654_v50 = vld [vmem:[%s9221_s6 + $0x60] sm:$0xff] }
0x187c   : > { %7958 = vrcp.f32 %v5126_v51  ;;  %5460 = vmatpush.bf16.msra.mxu0 %v7655_v47  ;;  %v7656_v51 = vld [vmem:[%s9221_s6 + $0x70] sm:$0xff] }
0x1880   : > { %5461 = vmatpush.bf16.msra.mxu0 %v7654_v50 }
0x1881   : > { %v7957_v52 = vpop.eup %7956 }
0x1882   : > { %v7959_v53 = vpop.eup %7958  ;;  %v5141_v54 = vmul.f32 %v7957_v52, %v7949_v39 }
0x1883   : > { %v5140_v56 = vmul.f32 %v7959_v53, %v7951_v41  ;;  %v5135_v57 = vpop.xlane.xlu2 %5134  ;;  %v7659_v53 = vld [vmem:[%s9222_s8 + $0x88] sm:$0xff] }
0x1884   : > { %v5145_v55 = vpack.c.bf16 %v5141_v54, %v5141_v54  ;;  %7960 = vrcp.f32 %v5135_v57  ;;  %v7661_v54 = vld [vmem:[%s9222_s8 + $0x98] sm:$0xff] }
0x1885   : > { %v5144_v36 = vpack.c.bf16 %v5140_v56, %v5140_v56  ;;  %v7663_v56 = vld [vmem:[%s9222_s8 + $0xa8] sm:$0xff] }
0x1886   : > { %7261 = vmatmul.msk.bf16.vlgmr.msrb.gmra.mxu3 %vm1641_vm1, %v5145_v55  ;;  %v7665_v55 = vld [vmem:[%s9222_s8 + $0xb8] sm:$0xff] }
0x1887   : > { %7260 = vmatmul.msk.bf16.vlgmr.msrb.gmra.mxu2 %vm1641_vm1, %v5144_v36  ;;  %5435 = vmatpush.bf16.msrb.mxu3 %v7653_v42  ;;  %v7658_v36 = vld [vmem:[%s9222_s8 + $0x80] sm:$0xff] }
0x1888   : > { %5410 = vmatpush.bf16.msrb.mxu2 %v7651_v46  ;;  %v7850_v46 = vld [vmem:[%s9226_s19 + $0x5] ss:$0 sm:$0xff] }
0x188a   : > { %v7961_v59 = vpop.eup %7960 }
0x188b   : > { %v5143_v12 = vmul.f32 %v7961_v59, %v7953_v45  ;;  %5436 = vmatpush.bf16.msrb.mxu3 %v7652_v48  ;;  %v7660_v59 = vld [vmem:[%s9222_s8 + $0x90] sm:$0xff] }
0x188c   : > { %5411 = vmatpush.bf16.msrb.mxu2 %v7650_v38 }
0x188d   : > { %v5147_v60 = vpack.c.bf16 %v5143_v12, %v5143_v12 }
0x188f   : > { %7263 = vmatmul.msk.bf16.vlgmr.msra.gmra.mxu1 %vm1641_vm1, %v5147_v60  ;;  %v7662_v60 = vld [vmem:[%s9222_s8 + $0xa0] sm:$0xff] }
0x18f8   : > { %v5205_v3 = vpop.f32.mrf.mxu0 }
0x18f9   : > { %v5230_v4 = vpack.c.bf16 %v5205_v3, %v5205_v3 }
0x18fb   : > { %7266 = vmatmul.msk.bf16.vlgmr.msrb.gmra.mxu0 %vm1641_vm1, %v5230_v4  ;;  %v7846_v4 = vld [vmem:[%s9224_s13 + $0x1] ss:$0 sm:$0xff] }
0x18fc   : > { %5626 = vmatpush.bf16.msrb.mxu0 %v7663_v56 }
0x1900   : > { %v5207_v35 = vpop.f32.mrf.mxu0  ;;  %5627 = vmatpush.bf16.msrb.mxu0 %v7662_v60 }
0x1909   : > { %v5186_v5 = vpop.f32.mrf.mxu3 }
0x190a   : > { %v5167_v6 = vpop.f32.mrf.mxu2  ;;  %v5229_v8 = vpack.c.bf16 %v5186_v5, %v5186_v5 }
0x190b   : > { %v5228_v9 = vpack.c.bf16 %v5167_v6, %v5167_v6 }
0x190c   : > { %v5224_v20 = vpop.f32.mrf.mxu1  ;;  %7265 = vmatmul.msk.bf16.vlgmr.msra.gmra.mxu3 %vm1641_vm1, %v5229_v8 }
0x190d   : > { %v5231_v11 = vpack.c.bf16 %v5224_v20, %v5224_v20  ;;  %7264 = vmatmul.msk.bf16.vlgmr.msra.gmra.mxu2 %vm1641_vm1, %v5228_v9  ;;  %5601 = vmatpush.bf16.msra.mxu3 %v7661_v54  ;;  %v7667_v9 = vld [vmem:[%s9222_s8 + $0xc8] sm:$0xff]  ;;  %v7669_v20 = vld [vmem:[%s9222_s8 + $0xd8] sm:$0xff] }
0x190e   : > { %5576 = vmatpush.bf16.msra.mxu2 %v7659_v53 }
0x190f   : > { %7267 = vmatmul.msk.bf16.vlgmr.msrb.gmra.mxu1 %vm1641_vm1, %v5231_v11  ;;  %v7671_v11 = vld [vmem:[%s9222_s8 + $0xe8] sm:$0xff] }
0x1911   : > { %v5188_v13 = vpop.f32.mrf.mxu3  ;;  %5602 = vmatpush.bf16.msra.mxu3 %v7660_v59 }
0x1912   : > { %v5169_v14 = vpop.f32.mrf.mxu2  ;;  %5577 = vmatpush.bf16.msra.mxu2 %v7658_v36  ;;  %v7673_v13 = vld [vmem:[%s9222_s8 + $0xf8] sm:$0xff] }
0x1913   : > { %v7666_v14 = vld [vmem:[%s9222_s8 + $0xc0] sm:$0xff] }
0x1914   : > { %v5226_v15 = vpop.f32.mrf.mxu1 }
0x1915   : > { %v7668_v15 = vld [vmem:[%s9222_s8 + $0xd0] sm:$0xff] }
0x1978   : > { %v5285_v16 = vpop.f32.mrf.mxu0 }
0x1979   : > { %v5311_v25 = vsel %vm1332_vm0, %v5285_v16, 0.0  ;;  %v7670_v16 = vld [vmem:[%s9222_s8 + $0xe0] sm:$0xff] }
0x1980   : > { %v5287_v17 = vpop.f32.mrf.mxu0 }
0x1981   : > { %v7672_v17 = vld [vmem:[%s9222_s8 + $0xf0] sm:$0xff] }
0x198c   : > { %v5304_v18 = vpop.f32.mrf.mxu1 }
0x198d   : > { %v5313_v29 = vsel %vm1332_vm0, %v5304_v18, 0.0 }
0x198f   : > { %v5266_v19 = vpop.f32.mrf.mxu3 }
0x1990   : > { %v5247_v21 = vpop.f32.mrf.mxu2  ;;  %v5309_v22 = vsel %vm1332_vm0, %v5266_v19, 0.0 }
0x1991   : > { %v5308_v23 = vsel %vm1332_vm0, %v5247_v21, 0.0 }
0x1992   : > { %v5310_v24 = vadd.f32 %v5309_v22, %v5308_v23 }
0x1994   : > { %v5312_v26 = vadd.f32 %v5311_v25, %v5310_v24  ;;  %v5306_v27 = vpop.f32.mrf.mxu1 }
0x1995   : > { %v7851_v27 = vld [vmem:[%s9225_s14 + $0xa] ss:$0 sm:$0xff] }
0x1996   : > { %v5314_v30 = vadd.f32 %v5313_v29, %v5312_v26  ;;  %v7847_v29 = vld [vmem:[%s9226_s19 + $0x6] ss:$0 sm:$0xff] }
0x1997   : > { %v5268_v31 = vpop.f32.mrf.mxu3 }
0x1998   : > { %v5249_v33 = vpop.f32.mrf.mxu2  ;;  %v5318_v34 = vadd.f32 %v7844_v28, %v5314_v30  ;;  %v7852_v28 = vld [vmem:[%s9225_s14 + $0xb] ss:$0 sm:$0xff]  ;;  %v7848_v30 = vld [vmem:[%s9226_s19 + $0x7] ss:$0 sm:$0xff] }
0x199a   : > { %v5319_v37 = vadd.f32 %v5318_v34, %v8877_v49  ;;  %v7657_v49 = vld [vmem:[%s9221_s6 + $0x78] sm:$0xff]  ;;  %s6272_s6 = scalar_lea.sflag [#allocation3], %s1195_s3 }
0x199b   : > { %5485 = vmatpush.bf16.msra.mxu1 %v7657_v49 }
0x199c   : > { %v5324_v39 = vsel %vm1332_vm0, %v5319_v37, 0.0 }
0x199d   : > { %5325 = vadd.xlane.f32.xlu0 %v5324_v39  ;;  %v7854_v39 = vld [vmem:[%s9225_s14 + $0x9] ss:$0 sm:$0xff] }
0x199f   : > { %5486 = vmatpush.bf16.msra.mxu1 %v7656_v51 }
0x19a3   : > { %5651 = vmatpush.bf16.msrb.mxu1 %v7665_v55 }
0x19a7   : > { %5652 = vmatpush.bf16.msrb.mxu1 %v7664_v32 }
0x1a10   : > { %v5326_v40 = vpop.xlane.xlu0 %5325 }
0x1a11   : > { %v5327_v41 = vmul.f32 %v5326_v40, %v8446_v7 }
0x1a13   : > { %v5328_v43 = vsub.f32 %v5319_v37, %v5327_v41  ;;  %v7853_v37 = vld [vmem:[%s9225_s14 + $0x8] ss:$0 sm:$0xff] }
0x1a15   : > { %v5329_v44 = vmul.f32 %v5328_v43, %v5328_v43 }
0x1a17   : > { %v5330_v45 = vsel %vm1332_vm0, %v5329_v44, 0.0 }
0x1a18   : > { %5331 = vadd.xlane.f32.xlu1 %v5330_v45  ;;  %v7849_v45 = vld [vmem:[%s9226_s19 + $0x4] ss:$0 sm:$0xff] }
0x1a8b   : > { %v5332_v52 = vpop.xlane.xlu1 %5331 }
0x1a8c   : > { %v5333_v57 = vmul.f32 %v5332_v52, %v8446_v7 }
0x1a8e   : > { %v5334_v12 = vadd.f32 1e-05, %v5333_v57 }
0x1a90   : > { %7962 = vrsqrt.f32 %v5334_v12  ;;  %vm5341_vm15 = vweird.f32 %v5334_v12 }
0x1a96   : > { %v7963_v61 = vpop.eup %7962 }
0x1a97   : > { %v5336_v62 = vmul.f32 %v7963_v61, %v5334_v12  ;;  %vm5342_vm14 = vweird.f32 %v7963_v61 }
0x1a98   : > { %vm5343_vm3 = vmor %vm5341_vm15, %vm5342_vm14 }
0x1a99   : > { %v5337_v63 = vmul.f32 %v7963_v61, %v5336_v62 }
0x1a9b   : > { %v5338_v0 = vmul.f32 0.5, %v5337_v63 }
0x1a9d   : > { %v5339_v1 = vsub.f32 1.5, %v5338_v0 }
0x1a9f   : > { %v5340_v2 = vmul.f32 %v7963_v61, %v5339_v1  ;;  %v7855_v1 = vld [vmem:[%s9225_s14 + $0xe] ss:$0 sm:$0xff] }
0x1aa1   : > { %v5344_v3 = vsel %vm5343_vm3, %v7963_v61, %v5340_v2  ;;  %v7856_v2 = vld [vmem:[%s9225_s14 + $0xf] ss:$0 sm:$0xff] }
0x1aa2   : > { %v5345_v35 = vmul.f32 %v5344_v3, %v5328_v43 }
0x1aa4   : > { %v5349_v5 = vmul.f32 %v7845_v10, %v5345_v35 }
0x1aa6   : > { %v8978_v6 = vadd.f32 %v7846_v4, %v5349_v5 }
0x1aa8   : > { %v5354_v8 = vpack.c.bf16 %v8978_v6, %v8978_v6 }
0x1aaa   : > { %7298 = vmatmul.msk.bf16.vlgmr.msrb.gmra.mxu2 %vm1332_vm0, %v5354_v8  ;;  %7307 = vmatmul.msk.bf16.vlgmr.msrb.gmra.mxu3 %vm1332_vm0, %v5354_v8 }
0x1aab   : > { %7316 = vmatmul.msk.bf16.vlgmr.msra.gmra.mxu0 %vm1332_vm0, %v5354_v8  ;;  %7325 = vmatmul.msk.bf16.vlgmr.msra.gmra.mxu1 %vm1332_vm0, %v5354_v8 }
0x1aac   : > { %5676 = vmatpush.bf16.msrb.mxu2 %v7667_v9  ;;  %5701 = vmatpush.bf16.msrb.mxu3 %v7669_v20  ;;  %v7857_v9 = vld [vmem:[%s9225_s14 + $0xc] ss:$0 sm:$0xff]  ;;  %v7858_v20 = vld [vmem:[%s9225_s14 + $0xd] ss:$0 sm:$0xff] }
0x1aad   : > { %5726 = vmatpush.bf16.msra.mxu0 %v7671_v11  ;;  %5751 = vmatpush.bf16.msra.mxu1 %v7673_v13 }
0x1ab0   : > { %5677 = vmatpush.bf16.msrb.mxu2 %v7666_v14  ;;  %5702 = vmatpush.bf16.msrb.mxu3 %v7668_v15 }
0x1ab1   : > { %5727 = vmatpush.bf16.msra.mxu0 %v7670_v16  ;;  %5752 = vmatpush.bf16.msra.mxu1 %v7672_v17 }
0x1aba   : > { %7374 = vmatmul.msk.bf16.vlgmr.msra.gmra.mxu2 %vm1332_vm0, %v8762_v58  ;;  %7383 = vmatmul.msk.bf16.vlgmr.msra.gmra.mxu3 %vm1332_vm0, %v8762_v58 }
0x1abb   : > { %7392 = vmatmul.msk.bf16.vlgmr.msrb.gmra.mxu0 %vm1332_vm0, %v8762_v58  ;;  %7401 = vmatmul.msk.bf16.vlgmr.msrb.gmra.mxu1 %vm1332_vm0, %v8762_v58 }
0x1aca   : > { %7410 = vmatmul.msk.bf16.vlgmr.msrb.gmra.mxu2 %vm1332_vm0, %v8762_v58  ;;  %7419 = vmatmul.msk.bf16.vlgmr.msrb.gmra.mxu3 %vm1332_vm0, %v8762_v58 }
0x1acb   : > { %7428 = vmatmul.msk.bf16.vlgmr.msra.gmra.mxu0 %vm1332_vm0, %v8762_v58  ;;  %7437 = vmatmul.msk.bf16.vlgmr.msra.gmra.mxu1 %vm1332_vm0, %v8762_v58 }
0x1b28   : > { %v5463_v18 = vpop.f32.mrf.mxu0  ;;  %v5488_v19 = vpop.f32.mrf.mxu1 }
0x1b29   : > { %v5464_v40 = vadd.f32 %v7847_v29, %v5463_v18  ;;  %v5489_v41 = vadd.f32 %v7848_v30, %v5488_v19 }
0x1b2b   : > { %v5767_v51 = vmul.f32 0.35355338, %v5464_v40  ;;  %v5768_v52 = vmul.f32 0.35355338, %v5489_v41 }
0x1b2d   : > { %v5413_v21 = vpop.f32.mrf.mxu2  ;;  %v5438_v22 = vpop.f32.mrf.mxu3  ;;  %v5771_v60 = vpack.c.bf16 %v5767_v51, %v5767_v51  ;;  %v5772_v32 = vpack.c.bf16 %v5768_v52, %v5768_v52 }
0x1b2e   : > { %v5414_v53 = vadd.f32 %v7849_v45, %v5413_v21  ;;  %v5439_v54 = vadd.f32 %v7850_v46, %v5438_v22 }
0x1b30   : > { %v5465_v23 = vpop.f32.mrf.mxu0  ;;  %v5490_v24 = vpop.f32.mrf.mxu1  ;;  %v5765_v61 = vmul.f32 0.35355338, %v5414_v53  ;;  %v5766_v62 = vmul.f32 0.35355338, %v5439_v54 }
0x1b32   : > { %v5769_v10 = vpack.c.bf16 %v5765_v61, %v5765_v61  ;;  %v5770_v3 = vpack.c.bf16 %v5766_v62, %v5766_v62 }
0x1b35   : > { %v5415_v25 = vpop.f32.mrf.mxu2  ;;  %v5440_v26 = vpop.f32.mrf.mxu3 }
0x1b38   : > { %v5629_v31 = vpop.f32.mrf.mxu0  ;;  %v5654_v33 = vpop.f32.mrf.mxu1 }
0x1b39   : > { %v5630_v34 = vadd.f32 %v7851_v27, %v5629_v31  ;;  %v5655_v58 = vadd.f32 %v7852_v28, %v5654_v33  ;;  %v7985_v31 = vld [vmem:[%s8806_s24] sm:$0xff]  ;;  %s7509_s24 = sshll.u32 %s8310_s0, 3  ;;  %s8006_s0 = scalar_lea.hbm %s8287_s21, 16 }
0x1b3a   : > { %s6282_s1 = scalar_lea.hbm %s8287_s21, %s7509_s24 }
0x1b3b   : > { %v5775_v43 = vpack.c.bf16 %v5630_v34, %v5630_v34  ;;  %v5776_v44 = vpack.c.bf16 %v5655_v58, %v5655_v58  ;;  %s6286_s5 = sshll.u32 %s6282_s1, 4  ;;  %s6287_s5 = int_to_ptr.hbm [resolvable:$true] %s6286_s5 }
0x1b3c   : > { %s8000_s8 = sshra.s32 %s6287_s5, 4  ;;  %s8001_s8 = int_to_ptr.hbm [resolvable:$true] %s8000_s8 }
0x1b3d   : > { %v5819_v42 = vsel %vm1641_vm1, %v5775_v43, 0  ;;  %v5838_v47 = vsel %vm1641_vm1, %v5776_v44, 0  ;;  %v5579_v49 = vpop.f32.mrf.mxu2  ;;  %v5604_v38 = vpop.f32.mrf.mxu3  ;;  %p8007_p0 = scmp.lt.s32.totalorder %s8001_s8, %s8287_s21 }
0x1b3e   : > { %v5580_v48 = vadd.f32 %v7853_v37, %v5579_v49  ;;  %v5605_v50 = vadd.f32 %v7854_v39, %v5604_v38  ;;  %5828 = vmatpush.bf16.xpose.msrb.mxu0 %v5819_v42  ;;  %5847 = vmatpush.bf16.xpose.msrb.mxu1 %v5838_v47 }
0x1b40   : > { %v5773_v56 = vpack.c.bf16 %v5580_v48, %v5580_v48  ;;  %v5774_v57 = vpack.c.bf16 %v5605_v50, %v5605_v50  ;;  %v5631_v55 = vpop.f32.mrf.mxu0  ;;  %v5656_v36 = vpop.f32.mrf.mxu1 }
0x1b42   : > { %v5781_v59 = vsel %vm1641_vm1, %v5773_v56, 0  ;;  %v5800_v12 = vsel %vm1641_vm1, %v5774_v57, 0 }
0x1b43   : > { %5790 = vmatpush.bf16.xpose.msra.mxu2 %v5781_v59  ;;  %5809 = vmatpush.bf16.xpose.msra.mxu3 %v5800_v12 }
0x1b45   : > { %7445 = vmatmul.msk.bf16.vlgmr.msrb.gmra.mxu0 %vm1641_vm1, %v5771_v60  ;;  %7446 = vmatmul.msk.bf16.vlgmr.msrb.gmra.mxu1 %vm1641_vm1, %v5772_v32  ;;  %v5581_v63 = vpop.f32.mrf.mxu2  ;;  %v5606_v0 = vpop.f32.mrf.mxu3 }
0x1b48   : > { %v5729_v4 = vpop.f32.mrf.mxu0  ;;  %v5754_v35 = vpop.f32.mrf.mxu1 }
0x1b49   : > { %v5730_v5 = vadd.f32 %v7855_v1, %v5729_v4  ;;  %v5755_v8 = vadd.f32 %v7856_v2, %v5754_v35 }
0x1b4a   : > { %7443 = vmatmul.msk.bf16.vlgmr.msra.gmra.mxu2 %vm1641_vm1, %v5769_v10  ;;  %7444 = vmatmul.msk.bf16.vlgmr.msra.gmra.mxu3 %vm1641_vm1, %v5770_v3 }
0x1b4b   : > { %v5903_v11 = vpack.c.bf16 %v5730_v5, %v5730_v5  ;;  %v5904_v13 = vpack.c.bf16 %v5755_v8, %v5755_v8 }
0x1b4d   : > { %v5947_v14 = vsel %vm1773_vm2, %v5903_v11, 0  ;;  %v5966_v15 = vsel %vm1773_vm2, %v5904_v13, 0  ;;  %v5679_v16 = vpop.f32.mrf.mxu2  ;;  %v5704_v17 = vpop.f32.mrf.mxu3 }
0x1b4e   : > { %v5680_v18 = vadd.f32 %v7857_v9, %v5679_v16  ;;  %v5705_v19 = vadd.f32 %v7858_v20, %v5704_v17  ;;  %5956 = vmatpush.bf16.msra.mxu0 %v5947_v14  ;;  %5975 = vmatpush.bf16.msra.mxu1 %v5966_v15 }
0x1b50   : > { %v5901_v21 = vpack.c.bf16 %v5680_v18, %v5680_v18  ;;  %v5902_v22 = vpack.c.bf16 %v5705_v19, %v5705_v19  ;;  %v5731_v23 = vpop.f32.mrf.mxu0  ;;  %v5756_v24 = vpop.f32.mrf.mxu1  ;;  %v7440_v19 = vld [vmem:[%s9228_s20 + $0x18] sm:$0xf] }
0x1b51   : > { %v7439_v23 = vld [vmem:[%s9228_s20 + $0x14] sm:$0xf] }
0x1b52   : > { %v5909_v25 = vsel %vm1773_vm2, %v5901_v21, 0  ;;  %v5928_v26 = vsel %vm1773_vm2, %v5902_v22, 0  ;;  %v6027_v21 = vsel %vm1773_vm2, %v7440_v19, 0  ;;  %v7438_v22 = vld [vmem:[%s9228_s20 + $0x10] sm:$0xf] }
0x1b53   : > { %5918 = vmatpush.bf16.msrb.mxu2 %v5909_v25  ;;  %5937 = vmatpush.bf16.msrb.mxu3 %v5928_v26  ;;  %v5989_v24 = vsel %vm1773_vm2, %v7438_v22, 0  ;;  %v6008_v25 = vsel %vm1773_vm2, %v7439_v23, 0  ;;  %v7441_v26 = vld [vmem:[%s9228_s20 + $0x1c] sm:$0xf]  ;;  %v7676_v22 = vld [vmem:[%s9231_s27 + $0x20] sm:$0xff] }
0x1b54   : > { %6036 = vmatpush.bf16.msrb.mxu0 %v6027_v21  ;;  %v7677_v21 = vld [vmem:[%s9231_s27 + $0x28] sm:$0xff]  ;;  %v7862_v23 = vld [vmem:[%s9234_s2 + $0x1] ss:$0 sm:$0xff]  ;;  %s1197_s2 = scalar_lea.vmem [#allocation2], %s6436_s18 }
0x1b55   : > { %v5681_v27 = vpop.f32.mrf.mxu2  ;;  %v5706_v28 = vpop.f32.mrf.mxu3 }
0x1b56   : > { %v6046_v27 = vsel %vm1773_vm2, %v7441_v26, 0 }
0x1b57   : > { %5998 = vmatpush.bf16.msra.mxu2 %v5989_v24  ;;  %6017 = vmatpush.bf16.msra.mxu3 %v6008_v25 }
0x1b58   : > { %6055 = vmatpush.bf16.msrb.mxu1 %v6046_v27 }
0x1bc2   : > { %v5830_v29 = vpop.f32.mrf.mxu0  ;;  %v5849_v30 = vpop.f32.mrf.mxu1 }
0x1bc3   : > { %v5831_v33 = vadd.f32 %v7985_v31, %v5830_v29  ;;  %v5850_v46 = vadd.f32 %v7985_v31, %v5849_v30 }
0x1bc5   : > { %v5859_v34 = vsel %vm1641_vm1, %v5831_v33, -inf  ;;  %v5862_v49 = vsel %vm1641_vm1, %v5850_v46, -inf }
0x1bc6   : > { %5860 = vmax.xlane.f32.xlu1 %v5859_v34 }
0x1bca   : > { %v5832_v58 = vpop.f32.mrf.mxu0  ;;  %v5851_v37 = vpop.f32.mrf.mxu1 }
0x1bcd   : > { %v5792_v39 = vpop.f32.mrf.mxu2  ;;  %v5811_v40 = vpop.f32.mrf.mxu3 }
0x1bce   : > { %v5793_v41 = vadd.f32 %v7985_v31, %v5792_v39  ;;  %v5812_v43 = vadd.f32 %v7985_v31, %v5811_v40 }
0x1bd0   : > { %v5856_v44 = vsel %vm1641_vm1, %v5812_v43, -inf  ;;  %v5853_v45 = vsel %vm1641_vm1, %v5793_v41, -inf }
0x1bd1   : > { %5857 = vmax.xlane.f32.xlu0 %v5856_v44  ;;  %5854 = vmax.xlane.f32.xlu2 %v5853_v45 }
0x1bd5   : > { %v5794_v42 = vpop.f32.mrf.mxu2  ;;  %v5813_v47 = vpop.f32.mrf.mxu3 }
0x1bd9   : > { %5863 = vmax.xlane.f32.xlu2 %v5862_v49 }
0x1c39   : > { %v5861_v38 = vpop.xlane.xlu1 %5860 }
0x1c3a   : > { %v5867_v48 = vsub.f32 %v5831_v33, %v5861_v38 }
0x1c3c   : > { %v5873_v50 = vmul.f32 1.442695, %v5867_v48 }
0x1c3e   : > { %7964 = vpow2.f32 %v5873_v50 }
0x1c44   : > { %v7965_v51 = vpop.eup %7964  ;;  %v5858_v52 = vpop.xlane.xlu0 %5857 }
0x1c45   : > { %v5855_v53 = vpop.xlane.xlu2 %5854  ;;  %v5866_v54 = vsub.f32 %v5812_v43, %v5858_v52  ;;  %v5883_v57 = vsel %vm1641_vm1, %v7965_v51, 0.0 }
0x1c46   : > { %v5865_v56 = vsub.f32 %v5793_v41, %v5855_v53  ;;  %5884 = vadd.xlane.f32.xlu2 %v5883_v57  ;;  %v7859_v53 = vld [vmem:[%s9229_s23 + $0x1] ss:$0 sm:$0xff] }
0x1c47   : > { %v5871_v55 = vmul.f32 1.442695, %v5866_v54 }
0x1c48   : > { %v5869_v36 = vmul.f32 1.442695, %v5865_v56 }
0x1c49   : > { %7966 = vpow2.f32 %v5871_v55 }
0x1c4a   : > { %7968 = vpow2.f32 %v5869_v36 }
0x1c4d   : > { %v5864_v59 = vpop.xlane.xlu2 %5863 }
0x1c4e   : > { %v5868_v12 = vsub.f32 %v5850_v46, %v5864_v59 }
0x1c4f   : > { %v7967_v60 = vpop.eup %7966 }
0x1c50   : > { %v5875_v32 = vmul.f32 1.442695, %v5868_v12  ;;  %v7969_v61 = vpop.eup %7968  ;;  %v5880_v62 = vsel %vm1641_vm1, %v7967_v60, 0.0 }
0x1c51   : > { %v5877_v63 = vsel %vm1641_vm1, %v7969_v61, 0.0  ;;  %5881 = vadd.xlane.f32.xlu1 %v5880_v62 }
0x1c52   : > { %7970 = vpow2.f32 %v5875_v32  ;;  %5878 = vadd.xlane.f32.xlu0 %v5877_v63 }
0x1c58   : > { %v7971_v0 = vpop.eup %7970 }
0x1c59   : > { %v5886_v1 = vsel %vm1641_vm1, %v7971_v0, 0.0 }
0x1c5a   : > { %5887 = vadd.xlane.f32.xlu0 %v5886_v1  ;;  %v7674_v1 = vld [vmem:[%s9230_s25 + $0x10] sm:$0xff] }
0x1cb9   : > { %v5885_v2 = vpop.xlane.xlu2 %5884 }
0x1cba   : > { %7972 = vrcp.f32 %v5885_v2  ;;  %v7679_v2 = vld [vmem:[%s9231_s27 + $0x38] sm:$0xff] }
0x1cc0   : > { %v7973_v10 = vpop.eup %7972 }
0x1cc1   : > { %v5895_v3 = vmul.f32 %v7973_v10, %v7965_v51 }
0x1cc3   : > { %v5899_v4 = vpack.c.bf16 %v5895_v3, %v5895_v3  ;;  %v7678_v3 = vld [vmem:[%s9231_s27 + $0x30] sm:$0xff] }
0x1cc4   : > { %v5882_v35 = vpop.xlane.xlu1 %5881 }
0x1cc5   : > { %v5879_v5 = vpop.xlane.xlu0 %5878  ;;  %7449 = vmatmul.msk.bf16.vlgmr.msra.gmra.mxu0 %vm1641_vm1, %v5899_v4  ;;  %7974 = vrcp.f32 %v5882_v35 }
0x1cc6   : > { %7976 = vrcp.f32 %v5879_v5 }
0x1ccb   : > { %v7975_v8 = vpop.eup %7974 }
0x1ccc   : > { %v7977_v9 = vpop.eup %7976  ;;  %v5894_v20 = vmul.f32 %v7975_v8, %v7967_v60 }
0x1ccd   : > { %v5893_v11 = vmul.f32 %v7977_v9, %v7969_v61  ;;  %v5888_v13 = vpop.xlane.xlu0 %5887 }
0x1cce   : > { %v5898_v14 = vpack.c.bf16 %v5894_v20, %v5894_v20  ;;  %7978 = vrcp.f32 %v5888_v13  ;;  %v7860_v13 = vld [vmem:[%s9232_s29 + $0x1] ss:$0 sm:$0xff] }
0x1ccf   : > { %v5897_v15 = vpack.c.bf16 %v5893_v11, %v5893_v11 }
0x1cd0   : > { %7448 = vmatmul.msk.bf16.vlgmr.msrb.gmra.mxu3 %vm1641_vm1, %v5898_v14 }
0x1cd1   : > { %7447 = vmatmul.msk.bf16.vlgmr.msrb.gmra.mxu2 %vm1641_vm1, %v5897_v15  ;;  %6193 = vmatpush.bf16.msrb.mxu3 %v7679_v2  ;;  %v7861_v15 = vld [vmem:[%s9233_s30 + $0x1] ss:$0 sm:$0xff] }
0x1cd4   : > { %v7979_v16 = vpop.eup %7978 }
0x1cd5   : > { %v5896_v17 = vmul.f32 %v7979_v16, %v7971_v0  ;;  %v7675_v0 = vld [vmem:[%s9230_s25 + $0x18] sm:$0xff]  ;;  %6194 = vmatpush.bf16.msrb.mxu3 %v7678_v3 }
0x1cd6   : > { %6150 = vmatpush.bf16.msrb.mxu2 %v7675_v0 }
0x1cd7   : > { %v5900_v18 = vpack.c.bf16 %v5896_v17, %v5896_v17 }
0x1cd9   : > { %7450 = vmatmul.msk.bf16.vlgmr.msra.gmra.mxu1 %vm1641_vm1, %v5900_v18  ;;  %6195 = vmatpush.bf16.msrb.mxu3 %v7677_v21 }
0x1cda   : > { %6151 = vmatpush.bf16.msrb.mxu2 %v7674_v1 }
0x1cdd   : > { %6196 = vmatpush.bf16.msrb.mxu3 %v7676_v22 }
0x1d42   : > { %v5958_v28 = vpop.f32.mrf.mxu0 }
0x1d43   : > { %v5983_v29 = vpack.c.bf16 %v5958_v28, %v5958_v28 }
0x1d45   : > { %7453 = vmatmul.msk.bf16.vlgmr.msrb.gmra.mxu0 %vm1641_vm1, %v5983_v29  ;;  %v7863_v29 = vld [vmem:[%s9236_s26 + $0x1] ss:$0 sm:$0xff] }
0x1d4a   : > { %v5960_v30 = vpop.f32.mrf.mxu0 }
0x1d53   : > { %v5939_v31 = vpop.f32.mrf.mxu3 }
0x1d54   : > { %v5920_v33 = vpop.f32.mrf.mxu2  ;;  %v5982_v34 = vpack.c.bf16 %v5939_v31, %v5939_v31 }
0x1d55   : > { %v5981_v58 = vpack.c.bf16 %v5920_v33, %v5920_v33 }
0x1d56   : > { %v5977_v37 = vpop.f32.mrf.mxu1  ;;  %7452 = vmatmul.msk.bf16.vlgmr.msra.gmra.mxu3 %vm1641_vm1, %v5982_v34 }
0x1d57   : > { %v5984_v39 = vpack.c.bf16 %v5977_v37, %v5977_v37  ;;  %7451 = vmatmul.msk.bf16.vlgmr.msra.gmra.mxu2 %vm1641_vm1, %v5981_v58 }
0x1d59   : > { %7454 = vmatmul.msk.bf16.vlgmr.msrb.gmra.mxu1 %vm1641_vm1, %v5984_v39 }
0x1d5b   : > { %v5941_v40 = vpop.f32.mrf.mxu3 }
0x1d5c   : > { %v5922_v41 = vpop.f32.mrf.mxu2 }
0x1d5e   : > { %v5979_v43 = vpop.f32.mrf.mxu1 }
0x1dc2   : > { %v6038_v44 = vpop.f32.mrf.mxu0 }
0x1dc3   : > { %v6064_v50 = vsel %vm1332_vm0, %v6038_v44, 0.0  ;;  %v7681_v44 = vld [vmem:[%s9195_s4 + $0x8] sm:$0xff] }
0x1dc4   : > { %6263 = vmatpush.bf16.msra.mxu0 %v7681_v44 }
0x1dca   : > { %v6040_v45 = vpop.f32.mrf.mxu0 }
0x1dcb   : > { %v7680_v45 = vld [vmem:[%s9195_s4] sm:$0xff]  ;;  %s6284_s4 = sshll.u32 %s1197_s2, 4  ;;  %s6285_s4 = int_to_ptr.vmem [resolvable:$true] %s6284_s4 }
0x1dcc   : > { %6264 = vmatpush.bf16.msra.mxu0 %v7680_v45 }
0x1dd6   : > { %v6057_v46 = vpop.f32.mrf.mxu1 }
0x1dd7   : > { %v6066_v54 = vsel %vm1332_vm0, %v6057_v46, 0.0 }
0x1dd9   : > { %v6019_v42 = vpop.f32.mrf.mxu3 }
0x1dda   : > { %v6000_v47 = vpop.f32.mrf.mxu2  ;;  %v6062_v49 = vsel %vm1332_vm0, %v6019_v42, 0.0 }
0x1ddb   : > { %v6061_v38 = vsel %vm1332_vm0, %v6000_v47, 0.0 }
0x1ddc   : > { %v6063_v48 = vadd.f32 %v6062_v49, %v6061_v38 }
0x1dde   : > { %v6065_v51 = vadd.f32 %v6064_v50, %v6063_v48  ;;  %v6059_v52 = vpop.f32.mrf.mxu1 }
0x1de0   : > { %v6067_v56 = vadd.f32 %v6066_v54, %v6065_v51 }
0x1de1   : > { %v6021_v57 = vpop.f32.mrf.mxu3 }
0x1de2   : > { %v6002_v55 = vpop.f32.mrf.mxu2  ;;  %v6071_v36 = vadd.f32 %v7859_v53, %v6067_v56  ;;  %v7864_v53 = vld [vmem:[%s8272_s17 + $0x1] ss:$0 sm:$0xff] }
0x1de3   : > { %v7865_v56 = vld [vmem:[%s9194_s9 + $0x1] ss:$0 sm:$0xff]  ;;  %s8002_s9 = scalar_lea.hbm %s8001_s8, 8 }
0x1de4   : > { %v6072_v59 = vadd.f32 %v6071_v36, %v8978_v6  ;;  %p8003_p11 = scmp.ne.s32.totalorder %s8001_s8, %s8002_s9  ;;  %p8008_p1 = scmp.lt.s32.totalorder %s8006_s0, %s8002_s9 }
0x1de6   : > { %v6077_v12 = vsel %vm1332_vm0, %v6072_v59, 0.0  ;;  %p8004_p12 = pnand %p8003_p11, %p8327_p5  ;;  %p8009_p2 = por %p8008_p1, %p8007_p0 }
0x1de7   : > { %6078 = vadd.xlane.f32.xlu1 %v6077_v12 }
0x1de8   : > { %p8005_p13 = pneg %p8004_p12 }
0x1dea   : > { %p8010_p3 = pnand %p8009_p2, %p8005_p13 }
0x1e5a   : > { %v6079_v60 = vpop.xlane.xlu1 %6078 }
0x1e5b   : > { %v6080_v32 = vmul.f32 %v6079_v60, %v8446_v7 }
0x1e5d   : > { %v6081_v61 = vsub.f32 %v6072_v59, %v6080_v32 }
0x1e5f   : > { %v6082_v62 = vmul.f32 %v6081_v61, %v6081_v61 }
0x1e61   : > { %v6083_v63 = vsel %vm1332_vm0, %v6082_v62, 0.0 }
0x1e62   : > { %6084 = vadd.xlane.f32.xlu2 %v6083_v63 }
0x1ed5   : > { %v6085_v10 = vpop.xlane.xlu2 %6084 }
0x1ed6   : > { %v6086_v6 = vmul.f32 %v6085_v10, %v8446_v7 }
0x1ed8   : > { %v6087_v4 = vadd.f32 1e-05, %v6086_v6 }
0x1eda   : > { %7980 = vrsqrt.f32 %v6087_v4  ;;  %vm6094_vm2 = vweird.f32 %v6087_v4 }
0x1ee0   : > { %v7981_v35 = vpop.eup %7980 }
0x1ee1   : > { %v6089_v5 = vmul.f32 %v7981_v35, %v6087_v4  ;;  %vm6095_vm1 = vweird.f32 %v7981_v35 }
0x1ee2   : > { %vm6096_vm4 = vmor %vm6094_vm2, %vm6095_vm1 }
0x1ee3   : > { %v6090_v8 = vmul.f32 %v7981_v35, %v6089_v5 }
0x1ee5   : > { %v6091_v9 = vmul.f32 0.5, %v6090_v8 }
0x1ee7   : > { %v6092_v20 = vsub.f32 1.5, %v6091_v9 }
0x1ee9   : > { %v6093_v11 = vmul.f32 %v7981_v35, %v6092_v20 }
0x1eeb   : > { %v6097_v14 = vsel %vm6096_vm4, %v7981_v35, %v6093_v11 }
0x1eec   : > { %v6098_v16 = vmul.f32 %v6097_v14, %v6081_v61 }
0x1eee   : > { %v6102_v17 = vmul.f32 %v7860_v13, %v6098_v16 }
0x1ef0   : > { %v6106_v18 = vadd.f32 %v7861_v15, %v6102_v17 }
0x1ef2   : > { %v6107_v19 = vpack.c.bf16 %v6106_v18, %v6106_v18 }
0x1ef4   : > { %7479 = vmatmul.msk.bf16.vlgmr.msrb.gmra.mxu2 %vm1332_vm0, %v6107_v19 }
0x1f77   : > { %v6153_v24 = vpop.f32.mrf.mxu2 }
0x1f78   : > { %v6154_v25 = vadd.f32 %v7862_v23, %v6153_v24 }
0x1f7a   : > { %v6157_v26 = vmax.f32 %v6154_v25, 0.0 }
0x1f7c   : > { %v6158_v27 = vpack.c.bf16 %v6157_v26, %v6157_v26 }
0x1f7e   : > { %7496 = vmatmul.msk.bf16.vlgmr.msrb.gmra.mxu3 %vm2053_vm7, %v6158_v27 }
0x1f7f   : > { %v6155_v28 = vpop.f32.mrf.mxu2 }
0x2001   : > { %v6198_v30 = vpop.f32.mrf.mxu3 }
0x2002   : > { %v6199_v31 = vadd.f32 %v7863_v29, %v6198_v30 }
0x2004   : > { %v6202_v33 = vadd.f32 %v6199_v31, %v6106_v18 }
0x2006   : > { %v6207_v34 = vsel %vm1332_vm0, %v6202_v33, 0.0 }
0x2007   : > { %6208 = vadd.xlane.f32.xlu0 %v6207_v34 }
0x2009   : > { %v6200_v58 = vpop.f32.mrf.mxu3 }
0x207a   : > { %v6209_v37 = vpop.xlane.xlu0 %6208 }
0x207b   : > { %v6210_v39 = vmul.f32 %v6209_v37, %v8446_v7 }
0x207d   : > { %v6211_v40 = vsub.f32 %v6202_v33, %v6210_v39 }
0x207f   : > { %v6212_v41 = vmul.f32 %v6211_v40, %v6211_v40 }
0x2081   : > { %v6213_v43 = vsel %vm1332_vm0, %v6212_v41, 0.0 }
0x2082   : > { %6214 = vadd.xlane.f32.xlu1 %v6213_v43 }
0x20f5   : > { %v6215_v46 = vpop.xlane.xlu1 %6214 }
0x20f6   : > { %v6216_v42 = vmul.f32 %v6215_v46, %v8446_v7 }
0x20f8   : > { %v6217_v47 = vadd.f32 1e-05, %v6216_v42 }
0x20fa   : > { %7982 = vrsqrt.f32 %v6217_v47  ;;  %vm6224_vm5 = vweird.f32 %v6217_v47 }
0x2100   : > { %v7983_v49 = vpop.eup %7982 }
0x2101   : > { %v6219_v38 = vmul.f32 %v7983_v49, %v6217_v47  ;;  %vm6225_vm7 = vweird.f32 %v7983_v49 }
0x2102   : > { %vm6226_vm6 = vmor %vm6224_vm5, %vm6225_vm7 }
0x2103   : > { %v6220_v48 = vmul.f32 %v7983_v49, %v6219_v38 }
0x2105   : > { %v6221_v50 = vmul.f32 0.5, %v6220_v48 }
0x2107   : > { %v6222_v51 = vsub.f32 1.5, %v6221_v50 }
0x2109   : > { %v6223_v52 = vmul.f32 %v7983_v49, %v6222_v51 }
0x210b   : > { %v6227_v54 = vsel %vm6226_vm6, %v7983_v49, %v6223_v52 }
0x210c   : > { %v6228_v57 = vmul.f32 %v6227_v54, %v6211_v40 }
0x210e   : > { %v6232_v55 = vmul.f32 %v7864_v53, %v6228_v57 }
0x2110   : > { %v6236_v7 = vadd.f32 %v7865_v56, %v6232_v55 }
0x2112   : > { %v6237_v36 = vpack.c.bf16 %v6236_v7, %v6236_v7 }
0x2114   : > { %7507 = vmatmul.msk.bf16.vlgmr.msra.gmra.mxu0 %vm1332_vm0, %v6237_v36 }
0x2191   : > { %v6266_v59 = vpop.f32.mrf.mxu0 }
0x2192   : > { %6270 = vst [vmem:[%s1197_s2] sm:$0xff] %v6266_v59 }
0x2193   : > { %8013 = shalt.err (!%p8010_p3)
}
0x2194   : > { %7682 = dma.vmem_to_hbm [thread:$0]  (%p8327_p5), %s6285_s4, 128, %s6287_s5, %s6272_s6  }
0x2199   : > { %v6268_v12 = vpop.f32.mrf.mxu0 }
0x219a PF: > { %p7688_p4 = scmp.ge.s32.totalorder %s8048_s22, 2  ;;  %s6298_s2 = sand.u32 1, %s8036_s15  }
0x219b   : > { %s6299_s1 = scalar_lea.sflag [#allocation3], %s6298_s2 }
0x219c   : > { %p7685_p7 = pnand %p7688_p4, %p8331_p6 }
0x219e   : > { %p7686_p8 = pneg %p7685_p7 }
0x21a0   : > { %8031 = dma.done.wait (%p7686_p8), %s6299_s1, 128  }
0x21a1   : > { %8033 = vsyncadd (%p7686_p8), %s6299_s1, 4294967168  ;;  %s9237_s22 = sld [smem:[#allocation43_spill]]  ;;  %s9240_s15 = smov %s8040_s16 }
0x21a2   : > { %s9238_s9 = sld [smem:[#allocation42_spill]] }
0x21a3   : > { %s9239_s18 = sld [smem:[#allocation44_spill]] }
0x21a7   : > { %p87_p9 = scmp.ge.s32.totalorder %s9237_s22, 4  }
0x21a8   : > { %s9241_s16 = smov %s9238_s9 }
0x21a9   :  { %89 = sbr.rel (!%p87_p9) target bundleno = 90 (0x5a), region = 289 }
0x21ae   :  { %6305 = vsyncpa [#allocation3], 1 }
0x21af   :  { %6307 = vsyncpa [#allocation3 + $0x1], 1 }

</bundles_post_ra>
